<compile_context>
chip_gen: v6e
topology: v6e:2x2x1
jax: 0.10.0
libtpu: 0.0.40
codegen_flags: <defaults>
</compile_context>

<pallas_src>
import functools

import jax
import jax.numpy as jnp
from jax.experimental import pallas as pl
from jax.experimental.pallas import tpu as pltpu

_C_OUT = 64                 # out_channels of every temporal layer
_C_SP = 16                  # spatial_channels of both blocks
_LANES = 2 * _C_OUT         # fused conv1|conv2 lane width (=128)

_VMEM = functools.partial(pl.BlockSpec, memory_space=pltpu.MemorySpace.VMEM)


def _rup8(n):
    return (n + 7) // 8 * 8


# ------------------------------ fused kernel --------------------------------

def _stgcn_kernel(dims, off, x_ref, s_ref, w_ref, o_ref):
    nb, nn, nt, _nf, n_out = dims
    r = nb * nn * nt
    bn_rows = nb * nn
    t_keep = nt - 5
    f32, bf16 = jnp.float32, jnp.bfloat16

    def mm(a, b):
        # bf16 MXU operands, f32 accumulation (f32 matmuls would be emulated
        # with multiple bf16 passes).  Elementwise math stays f32 elsewhere.
        return jnp.dot(a.astype(bf16), b.astype(bf16), preferred_element_type=f32)

    # --- carve the two packed slabs with static slices (3 input DMAs total) --
    abig = s_ref[off["abig"]:off["abig"] + r, :]                       # (R, R)
    gsel = s_ref[off["gsel"]:off["gsel"] + t_keep * bn_rows, :]        # (Tk*B*N, R)
    pmat = s_ref[off["pmat"]:off["pmat"] + r, 0:nn]                    # (R, N)

    def temporal_glu(h, w_off, bias_row):
        # Conv2d(cin, cout, (1,2)) GLU:  out = conv1(x) * sigmoid(conv2(x)).
        # Both taps + both convs fused into ONE matmul:
        #   [h_t | h_{t+1}] (R, 2*cin) @ [[W_t(lin|gate)], [W_{t+1}(lin|gate)]]
        # The t+1 tap is a sublane roll (XLU) -- shift by r-1 == roll by -1,
        # so row r reads row r+1; the wrapped row only lands in an
        # already-garbage tail time slot.
        cin = h.shape[1]
        h_next = pltpu.roll(h, shift=r - 1, axis=0)
        cat_in = jnp.concatenate([h, h_next], axis=-1)                 # (R, 2*cin)
        w = w_ref[w_off:w_off + 2 * cin, :]                            # (2*cin, 2*Cout)
        b = w_ref[off["bias"] + bias_row:off["bias"] + bias_row + 1, :]
        cat = mm(cat_in, w) + b
        lin, gate = cat[:, :_C_OUT], cat[:, _C_OUT:]
        return lin * pl.reciprocal(1.0 + jnp.exp(-gate), approx=True)  # sigmoid on EUP

    def graph_conv(h, w_off):
        # relu(adj_agg(h) @ W) == relu(adj_agg(h @ W)): project 64->16 first,
        # then one kron-expanded (R, R) aggregation matmul (no transposes).
        w = w_ref[w_off:w_off + _C_OUT, 0:_C_SP]                       # (64, 16)
        return jnp.maximum(mm(abig, mm(h, w)), 0.0)

    def batch_norm(h, s_off):
        # BatchNorm2d over the node axis, training-mode batch statistics
        # (gamma=1, beta=0, as at PyTorch init).  s is a masked selection
        # matrix pre-scaled by 1/(B*valid_T*C), so one matmul over [h | h*h]
        # yields E[x] and E[x^2] per node in a single pass.
        # TODO(synk): learned affine params / running-stats update (training
        # side effects) are not modeled.
        s = s_ref[s_off:s_off + nn, :]                                 # (N, R)
        stats = mm(s, jnp.concatenate([h, h * h], axis=-1))            # (N, 2C)
        mu = jnp.sum(stats[:, :_C_OUT], axis=-1, keepdims=True)        # (N, 1)
        ex2 = jnp.sum(stats[:, _C_OUT:], axis=-1, keepdims=True)       # (N, 1)
        rstd = jax.lax.rsqrt(ex2 - mu * mu + 1e-5)
        # (N, 2) = [scale | bias] built with a lane-select (no 1-lane concat),
        # then ONE 2-lane broadcast matmul instead of two 1-lane ones.
        is_lane0 = jax.lax.broadcasted_iota(jnp.int32, (1, 2), 1) == 0
        nstats = jnp.where(is_lane0, rstd, -mu * rstd)                 # (N, 2)
        sb = mm(pmat, nstats)                                          # (R, 2)
        return h * sb[:, 0:1] + sb[:, 1:2]

    h = x_ref[...]
    # ---- block 1 ----
    h = temporal_glu(h, off["b1t1"], 0)
    h = graph_conv(h, off["b1gw"])
    h = temporal_glu(h, off["b1t2"], 1)
    h = batch_norm(h, off["s1"])
    # ---- block 2 ----
    h = temporal_glu(h, off["b2t1"], 2)
    h = graph_conv(h, off["b2gw"])
    h = temporal_glu(h, off["b2t2"], 3)
    h = batch_norm(h, off["s2"])
    # ---- final temporal layer + FC ----
    h = temporal_glu(h, off["tl3"], 4)

    g = mm(gsel, h)                                # one dense gather: (Tk*B*N, 64)
    acc = jnp.zeros((bn_rows, n_out), f32)
    for t in range(t_keep):                        # static unroll (t_keep is tiny)
        g_t = g[t * bn_rows:(t + 1) * bn_rows, :]
        w_t = w_ref[off["fc"] + t * _C_OUT:off["fc"] + (t + 1) * _C_OUT, 0:n_out]
        acc = acc + mm(g_t, w_t)
    fc_b = w_ref[off["bias"] + 5:off["bias"] + 6, 0:n_out]
    o_ref[...] = acc + fc_b


# --------------------------- constants & packing -----------------------------

def _structure_constants(adj, nb, nn, nt):
    """Constant matrices encoding the flat (b, n, t) row structure."""
    f32 = jnp.float32
    r = nb * nn * nt
    # Node aggregation on flat rows: out[(b,i,t)] = sum_j adj[i,j] x[(b,j,t)].
    abig = jnp.kron(jnp.kron(jnp.eye(nb, dtype=f32), adj.astype(f32)),
                    jnp.eye(nt, dtype=f32))
    r_idx = jnp.arange(r)
    node_of_r = (r_idx // nt) % nn
    t_of_r = r_idx % nt
    pmat = (node_of_r[:, None] == jnp.arange(nn)[None, :]).astype(f32)   # (R, N)

    def mean_mat(t_valid, c):
        sel = ((node_of_r[None, :] == jnp.arange(nn)[:, None])
               & (t_of_r[None, :] < t_valid))
        return sel.astype(f32) / (nb * t_valid * c)                      # (N, R)

    s1 = mean_mat(nt - 2, _C_OUT)    # BN after block 1 (valid T = T-2)
    s2 = mean_mat(nt - 4, _C_OUT)    # BN after block 2 (valid T = T-4)
    gsel = jnp.concatenate(
        [(r_idx[None, :] == (jnp.arange(nb * nn)[:, None] * nt + t)).astype(f32)
         for t in range(nt - 5)], axis=0)                                # (Tk*B*N, R)
    return abig, gsel, s1, s2, pmat


def _pack(blocks, width):
    """Stack named 2-D blocks into one f32 slab; every block starts on a
    sublane-tile boundary (multiple-of-8 row).  Returns (slab, {name: row})."""
    padded, offs, row = [], {}, 0
    for name, a in blocks:
        a = jnp.asarray(a, jnp.float32)
        rows = _rup8(a.shape[0])
        padded.append(jnp.pad(a, ((0, rows - a.shape[0]), (0, width - a.shape[1]))))
        offs[name] = row
        row += rows
    return jnp.concatenate(padded, axis=0), offs


# ------------------------------ model wrapper --------------------------------

def stgcn_model(adj, x, params):
    nb, nn, nt, nf = x.shape
    n_out = params["fc_b"].shape[-1]
    r = nb * nn * nt

    abig, gsel, s1, s2, pmat = _structure_constants(adj, nb, nn, nt)
    s_slab, s_off = _pack(
        [("abig", abig), ("gsel", gsel), ("s1", s1), ("s2", s2), ("pmat", pmat)], r)

    b1, b2, tl3 = params["block1"], params["block2"], params["tl"]

    def tl_w(p):   # fused two-tap weight: rows [0:cin] = tap t, [cin:2cin] = tap t+1
        return jnp.concatenate([p["w0"], p["w1"]], axis=0)

    def bias_row(b):
        b = b.reshape(1, -1)
        return jnp.pad(b, ((0, 0), (0, _LANES - b.shape[1])))

    bias_blk = jnp.concatenate(
        [bias_row(b1["tl1"]["b"]), bias_row(b1["tl2"]["b"]),
         bias_row(b2["tl1"]["b"]), bias_row(b2["tl2"]["b"]),
         bias_row(tl3["b"]), bias_row(params["fc_b"]),
         jnp.zeros((2, _LANES), jnp.float32)], axis=0)                    # (8, 128)

    w_slab, w_off = _pack(
        [("b1t1", tl_w(b1["tl1"])), ("b1gw", b1["gw"]), ("b1t2", tl_w(b1["tl2"])),
         ("b2t1", tl_w(b2["tl1"])), ("b2gw", b2["gw"]), ("b2t2", tl_w(b2["tl2"])),
         ("tl3", tl_w(tl3)), ("fc", params["fc_w"]), ("bias", bias_blk)],
        _LANES)

    off = {**s_off, **w_off}
    dims = (nb, nn, nt, nf, n_out)
    x2d = x.reshape(r, nf).astype(jnp.float32)

    out = pl.pallas_call(
        functools.partial(_stgcn_kernel, dims, off),
        out_shape=jax.ShapeDtypeStruct((nb * nn, n_out), jnp.float32),
        in_specs=[_VMEM(), _VMEM(), _VMEM()],
        out_specs=_VMEM(),
        # TODO(synk): at larger B/N/T add a row-tiled grid (tile boundaries on
        # whole (b, n) time-chunks so the temporal roll never crosses a tile),
        # dimension_semantics=("parallel",) for v7x's 2 TensorCores, and set
        # vmem_limit_bytes headroom (64 MiB on v7x vs 128 MiB on v5e/v6e).
    )(x2d, s_slab, w_slab)
    return out.reshape(nb, nn, n_out)


# ---------------------------- parameter creation ----------------------------

def init_params(key, features_num, input_timesteps, num_output):
    keys = iter(jax.random.split(key, 32))

    def uni(shape, scale):
        return jax.random.uniform(next(keys), shape, jnp.float32, -scale, scale)

    def temporal_params(cin, cout):
        # Conv2d(cin, cout, (1, 2)) pair (conv1|conv2) stored as two
        # (cin, 2*cout) matrices: w0 = tap at t, w1 = tap at t+1.
        # Lanes [0:cout] = conv1 ("linear") path, [cout:2*cout] = conv2 (gate).
        s = 1.0 / (2.0 * cin) ** 0.5
        return {"w0": uni((cin, 2 * cout), s),
                "w1": uni((cin, 2 * cout), s),
                "b": uni((1, 2 * cout), s)}

    def block_params(cin, spatial, cout):
        return {"tl1": temporal_params(cin, cout),
                "gw": uni((cout, spatial), 1.0 / spatial ** 0.5),
                "tl2": temporal_params(spatial, cout)}

    fc_in = (input_timesteps - 5) * _C_OUT
    return {
        "block1": block_params(features_num, _C_SP, _C_OUT),
        "block2": block_params(_C_OUT, _C_SP, _C_OUT),
        "tl": temporal_params(_C_OUT, _C_OUT),
        # fc_w rows are time-major blocks of 64 channels, matching
        # out3.reshape(B, N, -1) (index t*64 + c) in the PyTorch reference.
        "fc_w": uni((fc_in, num_output), 1.0 / fc_in ** 0.5),
        "fc_b": uni((1, num_output), 1.0 / fc_in ** 0.5),
    }


# ----------------------------------- main ------------------------------------

if __name__ == "__main__":
    B, N, T, F, num_output = 2, 8, 8, 4, 8  # nodes_num=8, features=4, timesteps=8

    key = jax.random.PRNGKey(0)
    kx, kadj, kp = jax.random.split(key, 3)

    x = jax.random.normal(kx, (B, N, T, F), jnp.float32)
    adj = jax.random.uniform(kadj, (N, N), jnp.float32)
    adj = adj / jnp.sum(adj, axis=1, keepdims=True)  # row-normalized adj_hat

    params = init_params(kp, F, T, num_output)

    fwd = jax.jit(lambda a, xx: stgcn_model(a, xx, params))
    out = fwd(adj, x)
    jax.block_until_ready(out)

    assert out.shape == (B, N, num_output), out.shape
    assert out.dtype == jnp.float32
    print("KERNEL_OK")
</pallas_src>

<mosaic_0001>
module attributes {stable_mosaic.version = 11 : i64} {
  func.func @_stgcn_kernel(%arg0: memref<128x4xf32, #tpu.memory_space<vmem>>, %arg1: memref<320x128xf32, #tpu.memory_space<vmem>>, %arg2: memref<656x128xf32, #tpu.memory_space<vmem>>, %arg3: memref<16x8xf32, #tpu.memory_space<vmem>>) attributes {dimension_semantics = [], scalar_prefetch = 0 : i64, scratch_operands = 0 : i64, tpu.core_type = #tpu.core_type<tc>} {
    %c0 = arith.constant 0 : index
    %c0_0 = arith.constant 0 : index
    %0 = vector.load %arg1[%c0, %c0_0] : memref<320x128xf32, #tpu.memory_space<vmem>>, vector<128x128xf32>
    %c128 = arith.constant 128 : index
    %c0_1 = arith.constant 0 : index
    %1 = vector.load %arg1[%c128, %c0_1] : memref<320x128xf32, #tpu.memory_space<vmem>>, vector<48x128xf32>
    %c192 = arith.constant 192 : index
    %c0_2 = arith.constant 0 : index
    %2 = vector.load %arg1[%c192, %c0_2] : memref<320x128xf32, #tpu.memory_space<vmem>>, vector<128x8xf32>
    %c0_3 = arith.constant 0 : index
    %c0_4 = arith.constant 0 : index
    %3 = vector.load %arg0[%c0_3, %c0_4] : memref<128x4xf32, #tpu.memory_space<vmem>>, vector<128x4xf32>
    %c127_i32 = arith.constant 127 : i32
    %4 = tpu.dynamic_rotate %3 by %c127_i32 dim 0 : vector<128x4xf32>, i32 -> vector<128x4xf32>
    %5 = tpu.concatenate %3, %4 in 1 : vector<128x4xf32>, vector<128x4xf32> -> vector<128x8xf32>
    %c0_5 = arith.constant 0 : index
    %c0_6 = arith.constant 0 : index
    %6 = vector.load %arg2[%c0_5, %c0_6] : memref<656x128xf32, #tpu.memory_space<vmem>>, vector<8x128xf32>
    %c648 = arith.constant 648 : index
    %c0_7 = arith.constant 0 : index
    %7 = vector.load %arg2[%c648, %c0_7] : memref<656x128xf32, #tpu.memory_space<vmem>>, vector<1x128xf32>
    %8 = arith.truncf %5 : vector<128x8xf32> to vector<128x8xbf16>
    %9 = arith.truncf %6 : vector<8x128xf32> to vector<8x128xbf16>
    %cst = arith.constant dense<0.000000e+00> : vector<128x128xf32>
    %10 = tpu.matmul %8, %9, %cst {dimension_numbers = #tpu.dot_dimension_numbers<[1], [0], [0], [1], [0, 0, 1, 1], [], []>} : vector<128x8xbf16>, vector<8x128xbf16>, vector<128x128xf32> -> vector<128x128xf32>
    %11 = vector.broadcast %7 : vector<1x128xf32> to vector<128x128xf32>
    %12 = arith.addf %10, %11 : vector<128x128xf32>
    %13 = vector.extract_strided_slice %12 {offsets = [0, 0], sizes = [128, 64], strides = [1, 1]} : vector<128x128xf32> to vector<128x64xf32>
    %14 = vector.extract_strided_slice %12 {offsets = [0, 64], sizes = [128, 64], strides = [1, 1]} : vector<128x128xf32> to vector<128x64xf32>
    %cst_8 = arith.constant 0.000000e+00 : f32
    %15 = vector.broadcast %cst_8 : f32 to vector<128x64xf32>
    %16 = arith.subf %15, %14 : vector<128x64xf32>
    %17 = math.exp %16 : vector<128x64xf32>
    %cst_9 = arith.constant 1.000000e+00 : f32
    %18 = vector.broadcast %cst_9 : f32 to vector<128x64xf32>
    %19 = arith.addf %18, %17 : vector<128x64xf32>
    %20 = tpu.reciprocal %19 {approx = true} : vector<128x64xf32> -> vector<128x64xf32>
    %21 = arith.mulf %13, %20 : vector<128x64xf32>
    %c8 = arith.constant 8 : index
    %c0_10 = arith.constant 0 : index
    %22 = vector.load %arg2[%c8, %c0_10] : memref<656x128xf32, #tpu.memory_space<vmem>>, vector<64x16xf32>
    %23 = arith.truncf %21 : vector<128x64xf32> to vector<128x64xbf16>
    %24 = arith.truncf %22 : vector<64x16xf32> to vector<64x16xbf16>
    %cst_11 = arith.constant dense<0.000000e+00> : vector<128x16xf32>
    %25 = tpu.matmul %23, %24, %cst_11 {dimension_numbers = #tpu.dot_dimension_numbers<[1], [0], [0], [1], [0, 0, 1, 1], [], []>} : vector<128x64xbf16>, vector<64x16xbf16>, vector<128x16xf32> -> vector<128x16xf32>
    %26 = arith.truncf %0 : vector<128x128xf32> to vector<128x128xbf16>
    %27 = arith.truncf %25 : vector<128x16xf32> to vector<128x16xbf16>
    %cst_12 = arith.constant dense<0.000000e+00> : vector<128x16xf32>
    %28 = tpu.matmul %26, %27, %cst_12 {dimension_numbers = #tpu.dot_dimension_numbers<[1], [0], [0], [1], [0, 0, 1, 1], [], []>} : vector<128x128xbf16>, vector<128x16xbf16>, vector<128x16xf32> -> vector<128x16xf32>
    %cst_13 = arith.constant 0.000000e+00 : f32
    %29 = vector.broadcast %cst_13 : f32 to vector<128x16xf32>
    %30 = arith.maximumf %28, %29 : vector<128x16xf32>
    %c127_i32_14 = arith.constant 127 : i32
    %31 = tpu.dynamic_rotate %30 by %c127_i32_14 dim 0 : vector<128x16xf32>, i32 -> vector<128x16xf32>
    %32 = tpu.concatenate %30, %31 in 1 : vector<128x16xf32>, vector<128x16xf32> -> vector<128x32xf32>
    %c72 = arith.constant 72 : index
    %c0_15 = arith.constant 0 : index
    %33 = vector.load %arg2[%c72, %c0_15] : memref<656x128xf32, #tpu.memory_space<vmem>>, vector<32x128xf32>
    %c649 = arith.constant 649 : index
    %c0_16 = arith.constant 0 : index
    %34 = vector.load %arg2[%c649, %c0_16] : memref<656x128xf32, #tpu.memory_space<vmem>>, vector<1x128xf32>
    %35 = arith.truncf %32 : vector<128x32xf32> to vector<128x32xbf16>
    %36 = arith.truncf %33 : vector<32x128xf32> to vector<32x128xbf16>
    %cst_17 = arith.constant dense<0.000000e+00> : vector<128x128xf32>
    %37 = tpu.matmul %35, %36, %cst_17 {dimension_numbers = #tpu.dot_dimension_numbers<[1], [0], [0], [1], [0, 0, 1, 1], [], []>} : vector<128x32xbf16>, vector<32x128xbf16>, vector<128x128xf32> -> vector<128x128xf32>
    %38 = vector.broadcast %34 : vector<1x128xf32> to vector<128x128xf32>
    %39 = arith.addf %37, %38 : vector<128x128xf32>
    %40 = vector.extract_strided_slice %39 {offsets = [0, 0], sizes = [128, 64], strides = [1, 1]} : vector<128x128xf32> to vector<128x64xf32>
    %41 = vector.extract_strided_slice %39 {offsets = [0, 64], sizes = [128, 64], strides = [1, 1]} : vector<128x128xf32> to vector<128x64xf32>
    %cst_18 = arith.constant 0.000000e+00 : f32
    %42 = vector.broadcast %cst_18 : f32 to vector<128x64xf32>
    %43 = arith.subf %42, %41 : vector<128x64xf32>
    %44 = math.exp %43 : vector<128x64xf32>
    %cst_19 = arith.constant 1.000000e+00 : f32
    %45 = vector.broadcast %cst_19 : f32 to vector<128x64xf32>
    %46 = arith.addf %45, %44 : vector<128x64xf32>
    %47 = tpu.reciprocal %46 {approx = true} : vector<128x64xf32> -> vector<128x64xf32>
    %48 = arith.mulf %40, %47 : vector<128x64xf32>
    %c176 = arith.constant 176 : index
    %c0_20 = arith.constant 0 : index
    %49 = vector.load %arg1[%c176, %c0_20] : memref<320x128xf32, #tpu.memory_space<vmem>>, vector<8x128xf32>
    %50 = arith.mulf %48, %48 : vector<128x64xf32>
    %51 = tpu.concatenate %48, %50 in 1 : vector<128x64xf32>, vector<128x64xf32> -> vector<128x128xf32>
    %52 = arith.truncf %49 : vector<8x128xf32> to vector<8x128xbf16>
    %53 = arith.truncf %51 : vector<128x128xf32> to vector<128x128xbf16>
    %cst_21 = arith.constant dense<0.000000e+00> : vector<8x128xf32>
    %54 = tpu.matmul %52, %53, %cst_21 {dimension_numbers = #tpu.dot_dimension_numbers<[1], [0], [0], [1], [0, 0, 1, 1], [], []>} : vector<8x128xbf16>, vector<128x128xbf16>, vector<8x128xf32> -> vector<8x128xf32>
    %55 = vector.extract_strided_slice %54 {offsets = [0, 0], sizes = [8, 64], strides = [1, 1]} : vector<8x128xf32> to vector<8x64xf32>
    %cst_22 = arith.constant dense<0.000000e+00> : vector<8xf32>
    %56 = vector.multi_reduction <add>, %55, %cst_22 [1] : vector<8x64xf32> to vector<8xf32>
    %57 = vector.shape_cast %56 : vector<8xf32> to vector<8x1xf32>
    %58 = vector.extract_strided_slice %54 {offsets = [0, 64], sizes = [8, 64], strides = [1, 1]} : vector<8x128xf32> to vector<8x64xf32>
    %cst_23 = arith.constant dense<0.000000e+00> : vector<8xf32>
    %59 = vector.multi_reduction <add>, %58, %cst_23 [1] : vector<8x64xf32> to vector<8xf32>
    %60 = vector.shape_cast %59 : vector<8xf32> to vector<8x1xf32>
    %61 = arith.mulf %57, %57 : vector<8x1xf32>
    %62 = arith.subf %60, %61 : vector<8x1xf32>
    %cst_24 = arith.constant 9.99999974E-6 : f32
    %63 = vector.broadcast %cst_24 : f32 to vector<8x1xf32>
    %64 = arith.addf %62, %63 : vector<8x1xf32>
    %65 = math.rsqrt %64 : vector<8x1xf32>
    %66 = tpu.iota {dimensions = array<i32: 1>} : vector<1x2xi32>
    %c0_i32 = arith.constant 0 : i32
    %67 = vector.broadcast %c0_i32 : i32 to vector<1x2xi32>
    %68 = arith.cmpi eq, %66, %67 : vector<1x2xi32>
    %cst_25 = arith.constant 0.000000e+00 : f32
    %69 = vector.broadcast %cst_25 : f32 to vector<8x1xf32>
    %70 = arith.subf %69, %57 : vector<8x1xf32>
    %71 = arith.mulf %70, %65 : vector<8x1xf32>
    %72 = vector.shape_cast %68 : vector<1x2xi1> to vector<1x2xi1>
    %73 = vector.broadcast %72 : vector<1x2xi1> to vector<8x2xi1>
    %74 = vector.shape_cast %65 : vector<8x1xf32> to vector<8x1xf32>
    %75 = vector.broadcast %74 : vector<8x1xf32> to vector<8x2xf32>
    %76 = vector.shape_cast %71 : vector<8x1xf32> to vector<8x1xf32>
    %77 = vector.broadcast %76 : vector<8x1xf32> to vector<8x2xf32>
    %78 = arith.select %73, %75, %77 : vector<8x2xi1>, vector<8x2xf32>
    %79 = arith.truncf %2 : vector<128x8xf32> to vector<128x8xbf16>
    %80 = arith.truncf %78 : vector<8x2xf32> to vector<8x2xbf16>
    %cst_26 = arith.constant dense<0.000000e+00> : vector<128x2xf32>
    %81 = tpu.matmul %79, %80, %cst_26 {dimension_numbers = #tpu.dot_dimension_numbers<[1], [0], [0], [1], [0, 0, 1, 1], [], []>} : vector<128x8xbf16>, vector<8x2xbf16>, vector<128x2xf32> -> vector<128x2xf32>
    %82 = vector.extract_strided_slice %81 {offsets = [0, 0], sizes = [128, 1], strides = [1, 1]} : vector<128x2xf32> to vector<128x1xf32>
    %83 = vector.broadcast %82 : vector<128x1xf32> to vector<128x64xf32>
    %84 = arith.mulf %48, %83 : vector<128x64xf32>
    %85 = vector.extract_strided_slice %81 {offsets = [0, 1], sizes = [128, 1], strides = [1, 1]} : vector<128x2xf32> to vector<128x1xf32>
    %86 = vector.broadcast %85 : vector<128x1xf32> to vector<128x64xf32>
    %87 = arith.addf %84, %86 : vector<128x64xf32>
    %c127_i32_27 = arith.constant 127 : i32
    %88 = tpu.dynamic_rotate %87 by %c127_i32_27 dim 0 : vector<128x64xf32>, i32 -> vector<128x64xf32>
    %89 = tpu.concatenate %87, %88 in 1 : vector<128x64xf32>, vector<128x64xf32> -> vector<128x128xf32>
    %c104 = arith.constant 104 : index
    %c0_28 = arith.constant 0 : index
    %90 = vector.load %arg2[%c104, %c0_28] : memref<656x128xf32, #tpu.memory_space<vmem>>, vector<128x128xf32>
    %c650 = arith.constant 650 : index
    %c0_29 = arith.constant 0 : index
    %91 = vector.load %arg2[%c650, %c0_29] : memref<656x128xf32, #tpu.memory_space<vmem>>, vector<1x128xf32>
    %92 = arith.truncf %89 : vector<128x128xf32> to vector<128x128xbf16>
    %93 = arith.truncf %90 : vector<128x128xf32> to vector<128x128xbf16>
    %cst_30 = arith.constant dense<0.000000e+00> : vector<128x128xf32>
    %94 = tpu.matmul %92, %93, %cst_30 {dimension_numbers = #tpu.dot_dimension_numbers<[1], [0], [0], [1], [0, 0, 1, 1], [], []>} : vector<128x128xbf16>, vector<128x128xbf16>, vector<128x128xf32> -> vector<128x128xf32>
    %95 = vector.broadcast %91 : vector<1x128xf32> to vector<128x128xf32>
    %96 = arith.addf %94, %95 : vector<128x128xf32>
    %97 = vector.extract_strided_slice %96 {offsets = [0, 0], sizes = [128, 64], strides = [1, 1]} : vector<128x128xf32> to vector<128x64xf32>
    %98 = vector.extract_strided_slice %96 {offsets = [0, 64], sizes = [128, 64], strides = [1, 1]} : vector<128x128xf32> to vector<128x64xf32>
    %cst_31 = arith.constant 0.000000e+00 : f32
    %99 = vector.broadcast %cst_31 : f32 to vector<128x64xf32>
    %100 = arith.subf %99, %98 : vector<128x64xf32>
    %101 = math.exp %100 : vector<128x64xf32>
    %cst_32 = arith.constant 1.000000e+00 : f32
    %102 = vector.broadcast %cst_32 : f32 to vector<128x64xf32>
    %103 = arith.addf %102, %101 : vector<128x64xf32>
    %104 = tpu.reciprocal %103 {approx = true} : vector<128x64xf32> -> vector<128x64xf32>
    %105 = arith.mulf %97, %104 : vector<128x64xf32>
    %c232 = arith.constant 232 : index
    %c0_33 = arith.constant 0 : index
    %106 = vector.load %arg2[%c232, %c0_33] : memref<656x128xf32, #tpu.memory_space<vmem>>, vector<64x16xf32>
    %107 = arith.truncf %105 : vector<128x64xf32> to vector<128x64xbf16>
    %108 = arith.truncf %106 : vector<64x16xf32> to vector<64x16xbf16>
    %cst_34 = arith.constant dense<0.000000e+00> : vector<128x16xf32>
    %109 = tpu.matmul %107, %108, %cst_34 {dimension_numbers = #tpu.dot_dimension_numbers<[1], [0], [0], [1], [0, 0, 1, 1], [], []>} : vector<128x64xbf16>, vector<64x16xbf16>, vector<128x16xf32> -> vector<128x16xf32>
    %110 = arith.truncf %0 : vector<128x128xf32> to vector<128x128xbf16>
    %111 = arith.truncf %109 : vector<128x16xf32> to vector<128x16xbf16>
    %cst_35 = arith.constant dense<0.000000e+00> : vector<128x16xf32>
    %112 = tpu.matmul %110, %111, %cst_35 {dimension_numbers = #tpu.dot_dimension_numbers<[1], [0], [0], [1], [0, 0, 1, 1], [], []>} : vector<128x128xbf16>, vector<128x16xbf16>, vector<128x16xf32> -> vector<128x16xf32>
    %cst_36 = arith.constant 0.000000e+00 : f32
    %113 = vector.broadcast %cst_36 : f32 to vector<128x16xf32>
    %114 = arith.maximumf %112, %113 : vector<128x16xf32>
    %c127_i32_37 = arith.constant 127 : i32
    %115 = tpu.dynamic_rotate %114 by %c127_i32_37 dim 0 : vector<128x16xf32>, i32 -> vector<128x16xf32>
    %116 = tpu.concatenate %114, %115 in 1 : vector<128x16xf32>, vector<128x16xf32> -> vector<128x32xf32>
    %c296 = arith.constant 296 : index
    %c0_38 = arith.constant 0 : index
    %117 = vector.load %arg2[%c296, %c0_38] : memref<656x128xf32, #tpu.memory_space<vmem>>, vector<32x128xf32>
    %c651 = arith.constant 651 : index
    %c0_39 = arith.constant 0 : index
    %118 = vector.load %arg2[%c651, %c0_39] : memref<656x128xf32, #tpu.memory_space<vmem>>, vector<1x128xf32>
    %119 = arith.truncf %116 : vector<128x32xf32> to vector<128x32xbf16>
    %120 = arith.truncf %117 : vector<32x128xf32> to vector<32x128xbf16>
    %cst_40 = arith.constant dense<0.000000e+00> : vector<128x128xf32>
    %121 = tpu.matmul %119, %120, %cst_40 {dimension_numbers = #tpu.dot_dimension_numbers<[1], [0], [0], [1], [0, 0, 1, 1], [], []>} : vector<128x32xbf16>, vector<32x128xbf16>, vector<128x128xf32> -> vector<128x128xf32>
    %122 = vector.broadcast %118 : vector<1x128xf32> to vector<128x128xf32>
    %123 = arith.addf %121, %122 : vector<128x128xf32>
    %124 = vector.extract_strided_slice %123 {offsets = [0, 0], sizes = [128, 64], strides = [1, 1]} : vector<128x128xf32> to vector<128x64xf32>
    %125 = vector.extract_strided_slice %123 {offsets = [0, 64], sizes = [128, 64], strides = [1, 1]} : vector<128x128xf32> to vector<128x64xf32>
    %cst_41 = arith.constant 0.000000e+00 : f32
    %126 = vector.broadcast %cst_41 : f32 to vector<128x64xf32>
    %127 = arith.subf %126, %125 : vector<128x64xf32>
    %128 = math.exp %127 : vector<128x64xf32>
    %cst_42 = arith.constant 1.000000e+00 : f32
    %129 = vector.broadcast %cst_42 : f32 to vector<128x64xf32>
    %130 = arith.addf %129, %128 : vector<128x64xf32>
    %131 = tpu.reciprocal %130 {approx = true} : vector<128x64xf32> -> vector<128x64xf32>
    %132 = arith.mulf %124, %131 : vector<128x64xf32>
    %c184 = arith.constant 184 : index
    %c0_43 = arith.constant 0 : index
    %133 = vector.load %arg1[%c184, %c0_43] : memref<320x128xf32, #tpu.memory_space<vmem>>, vector<8x128xf32>
    %134 = arith.mulf %132, %132 : vector<128x64xf32>
    %135 = tpu.concatenate %132, %134 in 1 : vector<128x64xf32>, vector<128x64xf32> -> vector<128x128xf32>
    %136 = arith.truncf %133 : vector<8x128xf32> to vector<8x128xbf16>
    %137 = arith.truncf %135 : vector<128x128xf32> to vector<128x128xbf16>
    %cst_44 = arith.constant dense<0.000000e+00> : vector<8x128xf32>
    %138 = tpu.matmul %136, %137, %cst_44 {dimension_numbers = #tpu.dot_dimension_numbers<[1], [0], [0], [1], [0, 0, 1, 1], [], []>} : vector<8x128xbf16>, vector<128x128xbf16>, vector<8x128xf32> -> vector<8x128xf32>
    %139 = vector.extract_strided_slice %138 {offsets = [0, 0], sizes = [8, 64], strides = [1, 1]} : vector<8x128xf32> to vector<8x64xf32>
    %cst_45 = arith.constant dense<0.000000e+00> : vector<8xf32>
    %140 = vector.multi_reduction <add>, %139, %cst_45 [1] : vector<8x64xf32> to vector<8xf32>
    %141 = vector.shape_cast %140 : vector<8xf32> to vector<8x1xf32>
    %142 = vector.extract_strided_slice %138 {offsets = [0, 64], sizes = [8, 64], strides = [1, 1]} : vector<8x128xf32> to vector<8x64xf32>
    %cst_46 = arith.constant dense<0.000000e+00> : vector<8xf32>
    %143 = vector.multi_reduction <add>, %142, %cst_46 [1] : vector<8x64xf32> to vector<8xf32>
    %144 = vector.shape_cast %143 : vector<8xf32> to vector<8x1xf32>
    %145 = arith.mulf %141, %141 : vector<8x1xf32>
    %146 = arith.subf %144, %145 : vector<8x1xf32>
    %cst_47 = arith.constant 9.99999974E-6 : f32
    %147 = vector.broadcast %cst_47 : f32 to vector<8x1xf32>
    %148 = arith.addf %146, %147 : vector<8x1xf32>
    %149 = math.rsqrt %148 : vector<8x1xf32>
    %150 = tpu.iota {dimensions = array<i32: 1>} : vector<1x2xi32>
    %c0_i32_48 = arith.constant 0 : i32
    %151 = vector.broadcast %c0_i32_48 : i32 to vector<1x2xi32>
    %152 = arith.cmpi eq, %150, %151 : vector<1x2xi32>
    %cst_49 = arith.constant 0.000000e+00 : f32
    %153 = vector.broadcast %cst_49 : f32 to vector<8x1xf32>
    %154 = arith.subf %153, %141 : vector<8x1xf32>
    %155 = arith.mulf %154, %149 : vector<8x1xf32>
    %156 = vector.shape_cast %152 : vector<1x2xi1> to vector<1x2xi1>
    %157 = vector.broadcast %156 : vector<1x2xi1> to vector<8x2xi1>
    %158 = vector.shape_cast %149 : vector<8x1xf32> to vector<8x1xf32>
    %159 = vector.broadcast %158 : vector<8x1xf32> to vector<8x2xf32>
    %160 = vector.shape_cast %155 : vector<8x1xf32> to vector<8x1xf32>
    %161 = vector.broadcast %160 : vector<8x1xf32> to vector<8x2xf32>
    %162 = arith.select %157, %159, %161 : vector<8x2xi1>, vector<8x2xf32>
    %163 = arith.truncf %2 : vector<128x8xf32> to vector<128x8xbf16>
    %164 = arith.truncf %162 : vector<8x2xf32> to vector<8x2xbf16>
    %cst_50 = arith.constant dense<0.000000e+00> : vector<128x2xf32>
    %165 = tpu.matmul %163, %164, %cst_50 {dimension_numbers = #tpu.dot_dimension_numbers<[1], [0], [0], [1], [0, 0, 1, 1], [], []>} : vector<128x8xbf16>, vector<8x2xbf16>, vector<128x2xf32> -> vector<128x2xf32>
    %166 = vector.extract_strided_slice %165 {offsets = [0, 0], sizes = [128, 1], strides = [1, 1]} : vector<128x2xf32> to vector<128x1xf32>
    %167 = vector.broadcast %166 : vector<128x1xf32> to vector<128x64xf32>
    %168 = arith.mulf %132, %167 : vector<128x64xf32>
    %169 = vector.extract_strided_slice %165 {offsets = [0, 1], sizes = [128, 1], strides = [1, 1]} : vector<128x2xf32> to vector<128x1xf32>
    %170 = vector.broadcast %169 : vector<128x1xf32> to vector<128x64xf32>
    %171 = arith.addf %168, %170 : vector<128x64xf32>
    %c127_i32_51 = arith.constant 127 : i32
    %172 = tpu.dynamic_rotate %171 by %c127_i32_51 dim 0 : vector<128x64xf32>, i32 -> vector<128x64xf32>
    %173 = tpu.concatenate %171, %172 in 1 : vector<128x64xf32>, vector<128x64xf32> -> vector<128x128xf32>
    %c328 = arith.constant 328 : index
    %c0_52 = arith.constant 0 : index
    %174 = vector.load %arg2[%c328, %c0_52] : memref<656x128xf32, #tpu.memory_space<vmem>>, vector<128x128xf32>
    %c652 = arith.constant 652 : index
    %c0_53 = arith.constant 0 : index
    %175 = vector.load %arg2[%c652, %c0_53] : memref<656x128xf32, #tpu.memory_space<vmem>>, vector<1x128xf32>
    %176 = arith.truncf %173 : vector<128x128xf32> to vector<128x128xbf16>
    %177 = arith.truncf %174 : vector<128x128xf32> to vector<128x128xbf16>
    %cst_54 = arith.constant dense<0.000000e+00> : vector<128x128xf32>
    %178 = tpu.matmul %176, %177, %cst_54 {dimension_numbers = #tpu.dot_dimension_numbers<[1], [0], [0], [1], [0, 0, 1, 1], [], []>} : vector<128x128xbf16>, vector<128x128xbf16>, vector<128x128xf32> -> vector<128x128xf32>
    %179 = vector.broadcast %175 : vector<1x128xf32> to vector<128x128xf32>
    %180 = arith.addf %178, %179 : vector<128x128xf32>
    %181 = vector.extract_strided_slice %180 {offsets = [0, 0], sizes = [128, 64], strides = [1, 1]} : vector<128x128xf32> to vector<128x64xf32>
    %182 = vector.extract_strided_slice %180 {offsets = [0, 64], sizes = [128, 64], strides = [1, 1]} : vector<128x128xf32> to vector<128x64xf32>
    %cst_55 = arith.constant 0.000000e+00 : f32
    %183 = vector.broadcast %cst_55 : f32 to vector<128x64xf32>
    %184 = arith.subf %183, %182 : vector<128x64xf32>
    %185 = math.exp %184 : vector<128x64xf32>
    %cst_56 = arith.constant 1.000000e+00 : f32
    %186 = vector.broadcast %cst_56 : f32 to vector<128x64xf32>
    %187 = arith.addf %186, %185 : vector<128x64xf32>
    %188 = tpu.reciprocal %187 {approx = true} : vector<128x64xf32> -> vector<128x64xf32>
    %189 = arith.mulf %181, %188 : vector<128x64xf32>
    %190 = arith.truncf %1 : vector<48x128xf32> to vector<48x128xbf16>
    %191 = arith.truncf %189 : vector<128x64xf32> to vector<128x64xbf16>
    %cst_57 = arith.constant dense<0.000000e+00> : vector<48x64xf32>
    %192 = tpu.matmul %190, %191, %cst_57 {dimension_numbers = #tpu.dot_dimension_numbers<[1], [0], [0], [1], [0, 0, 1, 1], [], []>} : vector<48x128xbf16>, vector<128x64xbf16>, vector<48x64xf32> -> vector<48x64xf32>
    %cst_58 = arith.constant 0.000000e+00 : f32
    %193 = vector.broadcast %cst_58 : f32 to vector<16x8xf32>
    %194 = vector.extract_strided_slice %192 {offsets = [0, 0], sizes = [16, 64], strides = [1, 1]} : vector<48x64xf32> to vector<16x64xf32>
    %c456 = arith.constant 456 : index
    %c0_59 = arith.constant 0 : index
    %195 = vector.load %arg2[%c456, %c0_59] : memref<656x128xf32, #tpu.memory_space<vmem>>, vector<64x8xf32>
    %196 = arith.truncf %194 : vector<16x64xf32> to vector<16x64xbf16>
    %197 = arith.truncf %195 : vector<64x8xf32> to vector<64x8xbf16>
    %cst_60 = arith.constant dense<0.000000e+00> : vector<16x8xf32>
    %198 = tpu.matmul %196, %197, %cst_60 {dimension_numbers = #tpu.dot_dimension_numbers<[1], [0], [0], [1], [0, 0, 1, 1], [], []>} : vector<16x64xbf16>, vector<64x8xbf16>, vector<16x8xf32> -> vector<16x8xf32>
    %199 = arith.addf %193, %198 : vector<16x8xf32>
    %200 = vector.extract_strided_slice %192 {offsets = [16, 0], sizes = [16, 64], strides = [1, 1]} : vector<48x64xf32> to vector<16x64xf32>
    %c520 = arith.constant 520 : index
    %c0_61 = arith.constant 0 : index
    %201 = vector.load %arg2[%c520, %c0_61] : memref<656x128xf32, #tpu.memory_space<vmem>>, vector<64x8xf32>
    %202 = arith.truncf %200 : vector<16x64xf32> to vector<16x64xbf16>
    %203 = arith.truncf %201 : vector<64x8xf32> to vector<64x8xbf16>
    %cst_62 = arith.constant dense<0.000000e+00> : vector<16x8xf32>
    %204 = tpu.matmul %202, %203, %cst_62 {dimension_numbers = #tpu.dot_dimension_numbers<[1], [0], [0], [1], [0, 0, 1, 1], [], []>} : vector<16x64xbf16>, vector<64x8xbf16>, vector<16x8xf32> -> vector<16x8xf32>
    %205 = arith.addf %199, %204 : vector<16x8xf32>
    %206 = vector.extract_strided_slice %192 {offsets = [32, 0], sizes = [16, 64], strides = [1, 1]} : vector<48x64xf32> to vector<16x64xf32>
    %c584 = arith.constant 584 : index
    %c0_63 = arith.constant 0 : index
    %207 = vector.load %arg2[%c584, %c0_63] : memref<656x128xf32, #tpu.memory_space<vmem>>, vector<64x8xf32>
    %208 = arith.truncf %206 : vector<16x64xf32> to vector<16x64xbf16>
    %209 = arith.truncf %207 : vector<64x8xf32> to vector<64x8xbf16>
    %cst_64 = arith.constant dense<0.000000e+00> : vector<16x8xf32>
    %210 = tpu.matmul %208, %209, %cst_64 {dimension_numbers = #tpu.dot_dimension_numbers<[1], [0], [0], [1], [0, 0, 1, 1], [], []>} : vector<16x64xbf16>, vector<64x8xbf16>, vector<16x8xf32> -> vector<16x8xf32>
    %211 = arith.addf %205, %210 : vector<16x8xf32>
    %c653 = arith.constant 653 : index
    %c0_65 = arith.constant 0 : index
    %212 = vector.load %arg2[%c653, %c0_65] : memref<656x128xf32, #tpu.memory_space<vmem>>, vector<1x8xf32>
    %213 = vector.broadcast %212 : vector<1x8xf32> to vector<16x8xf32>
    %214 = arith.addf %211, %213 : vector<16x8xf32>
    %c0_66 = arith.constant 0 : index
    %c0_67 = arith.constant 0 : index
    %215 = vector.load %arg3[%c0_66, %c0_67] : memref<16x8xf32, #tpu.memory_space<vmem>>, vector<16x8xf32>
    tpu.vector_store %arg3[%c0_66, %c0_67], %214 {strides = array<i32>} : memref<16x8xf32, #tpu.memory_space<vmem>>, vector<16x8xf32>,
    return
  }
}

</mosaic_0001>

<bundles_post_ra>
// kernel: _lambda_.1
= control target key start
LH: loop header
LB: loop body
LE: loop exit
PB: predicated region body
PF: predicated region fallthrough
CT: control target
= control target key end

     0   :  { %v86_v3 = vlaneseq  ;;  %s7238_s0 = inlined_call_operand.vmem [shape: f32[128,4], index: 0, kind: input, shape index: {}]   ;;  %s7239_s1 = inlined_call_operand.vmem [shape: f32[320,128], index: 1, kind: input, shape index: {}]   ;;  %s7240_s2 = inlined_call_operand.vmem [shape: f32[656,128], index: 2, kind: input, shape index: {}]   ;;  %s7241_s3 = inlined_call_operand.hbm [shape: f32[16,8], index: 3, kind: output, shape index: {}]  }
   0x1   :  { %v5177_v0 = vld [vmem:[%s7238_s0] sm:$0xff]  ;;  %v5182_v1 = vld [vmem:[%s7238_s0 + $0x8] sm:$0xff]  ;;  %v5187_v2 = vld [vmem:[%s7238_s0 + $0x10] sm:$0xff] }
   0x2   :  { %v70_v4 = vrot.slane %v5177_v0, 1  ;;  %v71_v5 = vrot.slane %v5182_v1, 1  ;;  %v72_v6 = vrot.slane %v5187_v2, 1  ;;  %v5195_v7 = vld [vmem:[%s7238_s0 + $0x18] sm:$0xff]  ;;  %v5200_v8 = vld [vmem:[%s7238_s0 + $0x20] sm:$0xff]  ;;  %v5205_v9 = vld [vmem:[%s7238_s0 + $0x28] sm:$0xff] }
   0x3   :  { %v5208_v10 = vshrl.u32 %v86_v3, 7  ;;  %v73_v11 = vrot.slane %v5195_v7, 1  ;;  %v74_v12 = vrot.slane %v5200_v8, 1  ;;  %v5215_v13 = vld [vmem:[%s7238_s0 + $0x30] sm:$0xff]  ;;  %v75_v14 = vrot.slane %v5205_v9, 1  ;;  %v5221_v15 = vld [vmem:[%s7238_s0 + $0x38] sm:$0xff] }
   0x4   :  { %v76_v16 = vrot.slane %v5215_v13, 1  ;;  %v5227_v17 = vld [vmem:[%s7238_s0 + $0x40] sm:$0xff]  ;;  %v77_v18 = vrot.slane %v5221_v15, 1  ;;  %v5233_v19 = vld [vmem:[%s7238_s0 + $0x48] sm:$0xff]  ;;  %v5238_v20 = vld [vmem:[%s7238_s0 + $0x50] sm:$0xff] }
   0x5   :  { %vm88_vm0 = vcmp.lt.s32.totalorder %v5208_v10, 7  ;;  %v78_v21 = vrot.slane %v5227_v17, 1  ;;  %v79_v22 = vrot.slane %v5233_v19, 1  ;;  %v80_v23 = vrot.slane %v5238_v20, 1  ;;  %v5257_v28 = vld [vmem:[%s7238_s0 + $0x58] sm:$0xff]  ;;  %v5262_v29 = vld [vmem:[%s7238_s0 + $0x60] sm:$0xff] }
   0x6   :  { %v102_v24 = vsel %vm88_vm0, %v71_v5, %v72_v6  ;;  %v103_v25 = vsel %vm88_vm0, %v70_v4, %v71_v5  ;;  %v100_v26 = vsel %vm88_vm0, %v73_v11, %v74_v12  ;;  %v101_v27 = vsel %vm88_vm0, %v72_v6, %v73_v11  ;;  %v5271_v33 = vld [vmem:[%s7238_s0 + $0x68] sm:$0xff]  ;;  %v5276_v34 = vld [vmem:[%s7238_s0 + $0x70] sm:$0xff] }
   0x7   :  { %v4472_v30 = vpack.i.bf16 %v102_v24, %v103_v25  ;;  %v98_v31 = vsel %vm88_vm0, %v75_v14, %v76_v16  ;;  %v99_v32 = vsel %vm88_vm0, %v74_v12, %v75_v14 }
   0x8   :  { %8 = vsyncpa [#allocation3], 0  ;;  %v4482_v35 = vpack.i.bf16 %v98_v31, %v99_v32  ;;  %v96_v36 = vsel %vm88_vm0, %v77_v18, %v78_v21  ;;  %v97_v37 = vsel %vm88_vm0, %v76_v16, %v77_v18  ;;  %v5285_v38 = vld [vmem:[%s7238_s0 + $0x78] sm:$0xff]  ;;  %v186_v39 = vld [vmem:[%s7240_s2] sm:$0xff]  ;;  %vm226_vm1 = vcmask 1043456   ;;  %s5144_s19 = smov 4  }
   0x9   :  { %4473 = vrot.lane.b32.xlu0 %v4472_v30, %s5144_s19  ;;  %v4477_v40 = vpack.i.bf16 %v100_v26, %v101_v27  ;;  %v94_v41 = vsel %vm88_vm0, %v79_v22, %v80_v23  ;;  %v81_v42 = vrot.slane %v5257_v28, 1  ;;  %v82_v43 = vrot.slane %v5262_v29, 1  ;;  %s5145_s10 = smov 64   ;;  %s5146_s23 = smov 16  }
   0xa   :  { %4483 = vrot.lane.b32.xlu1 %v4482_v35, %s5144_s19  ;;  %v4487_v44 = vpack.i.bf16 %v96_v36, %v97_v37  ;;  %v95_v45 = vsel %vm88_vm0, %v78_v21, %v79_v22  ;;  %v83_v46 = vrot.slane %v5271_v33, 1  ;;  %v84_v47 = vrot.slane %v5276_v34, 1  ;;  %s5151_s29 = smov [#allocation2]  }
   0xb   :  { %v92_v48 = vsel %vm88_vm0, %v81_v42, %v82_v43  ;;  %v93_v49 = vsel %vm88_vm0, %v80_v23, %v81_v42  ;;  %v85_v50 = vrot.slane %v5285_v38, 1  ;;  %v196_v51 = vpack.c.bf16 %v186_v39, %v186_v39 }
   0xc   :  { %v4492_v52 = vpack.i.bf16 %v94_v41, %v95_v45  ;;  %v4497_v54 = vpack.i.bf16 %v92_v48, %v93_v49  ;;  %v90_v55 = vsel %vm88_vm0, %v83_v46, %v84_v47  ;;  %v91_v56 = vsel %vm88_vm0, %v82_v43, %v83_v46 }
   0xd   :  { %4478 = vrot.lane.b32.xlu0 %v4477_v40, %s5144_s19  ;;  %4459 = vmatprep.subr.msk.bf16.mxu0 %vm226_vm1, %v196_v51  ;;  %v228_v53 = vsel %vm226_vm1, %v196_v51, 0  ;;  %v89_v57 = vsel %vm88_vm0, %v84_v47, %v85_v50  ;;  %v104_v58 = vsel %vm88_vm0, %v85_v50, %v70_v4  ;;  %v4502_v59 = vpack.i.bf16 %v90_v55, %v91_v56 }
   0xe   :  { %4488 = vrot.lane.b32.xlu1 %v4487_v44, %s5144_s19  ;;  %4086 = vmatpush3.bf16.msra.mxu0 %v228_v53  ;;  %v4507_v60 = vpack.i.bf16 %v104_v58, %v89_v57  ;;  %vm169_vm2 = vcmask 31744   ;;  %vm201_vm3 = vcmask 64512   ;;  %vm507_vm4 = vcmask 523264  }
   0xf   :  { %vm854_vm5 = vcmask 130048   ;;  %vm890_vm6 = vcmask 261120   ;;  %vm5148_vm7 = vmmov 0  }
  0x11   :  { %4493 = vrot.lane.b32.xlu0 %v4492_v52, %s5144_s19 }
  0x12   :  { %4498 = vrot.lane.b32.xlu1 %v4497_v54, %s5144_s19 }
  0x15   :  { %4503 = vrot.lane.b32.xlu0 %v4502_v59, %s5144_s19 }
  0x16   :  { %4508 = vrot.lane.b32.xlu1 %v4507_v60, %s5144_s19 }
  0x7b   :  { %v4474_v61 = vpop.permute.xlu0 %4473 }
  0x7c   :  { %v4476_v62 = vunpack.i.h.bf16 %v4474_v61  ;;  %v4475_v63 = vunpack.i.l.bf16 %v4474_v61  ;;  %v4484_v5 = vpop.permute.xlu1 %4483 }
  0x7d   :  { %v4486_v6 = vunpack.i.h.bf16 %v4484_v5  ;;  %v4485_v11 = vunpack.i.l.bf16 %v4484_v5 }
  0x7e   :  { %v170_v4 = vsel %vm169_vm2, %v5177_v0, %v4475_v63  ;;  %v171_v12 = vsel %vm169_vm2, %v5182_v1, %v4476_v62 }
  0x7f   :  { %v4479_v14 = vpop.permute.xlu0 %4478  ;;  %v188_v16 = vpack.c.bf16 %v171_v12, %v170_v4  ;;  %v175_v18 = vsel %vm169_vm2, %v5205_v9, %v4486_v6  ;;  %v174_v21 = vsel %vm169_vm2, %v5200_v8, %v4485_v11 }
  0x80   :  { %v4481_v22 = vunpack.i.h.bf16 %v4479_v14  ;;  %v4480_v23 = vunpack.i.l.bf16 %v4479_v14  ;;  %v4489_v24 = vpop.permute.xlu1 %4488  ;;  %v190_v25 = vpack.c.bf16 %v175_v18, %v174_v21 }
  0x81   :  { %4087 = vmatprep.mubr.msk.bf16.mxu0 %vm201_vm3, %v188_v16  ;;  %v4491_v26 = vunpack.i.h.bf16 %v4489_v24  ;;  %v4490_v27 = vunpack.i.l.bf16 %v4489_v24 }
  0x82   :  { %v173_v0 = vsel %vm169_vm2, %v5195_v7, %v4481_v22  ;;  %v172_v1 = vsel %vm169_vm2, %v5187_v2, %v4480_v23 }
  0x83   :  { %v189_v30 = vpack.c.bf16 %v173_v0, %v172_v1  ;;  %v4494_v31 = vpop.permute.xlu0 %4493  ;;  %v177_v8 = vsel %vm169_vm2, %v5221_v15, %v4491_v26  ;;  %v176_v35 = vsel %vm169_vm2, %v5215_v13, %v4490_v27 }
  0x84   :  { %v4496_v9 = vunpack.i.h.bf16 %v4494_v31  ;;  %v4495_v32 = vunpack.i.l.bf16 %v4494_v31  ;;  %v4499_v36 = vpop.permute.xlu1 %4498  ;;  %v191_v39 = vpack.c.bf16 %v177_v8, %v176_v35 }
  0x85   :  { %4088 = vmatmul.mubr.msk.bf16.vlgmr.msra.gmra.mxu0 %vm201_vm3, %v189_v30  ;;  %v4501_v40 = vunpack.i.h.bf16 %v4499_v36  ;;  %v4500_v41 = vunpack.i.l.bf16 %v4499_v36 }
  0x86   :  { %4091 = vmatprep.mubr.msk.bf16.mxu0 %vm201_vm3, %v190_v25  ;;  %v179_v7 = vsel %vm169_vm2, %v5233_v19, %v4496_v9  ;;  %v178_v2 = vsel %vm169_vm2, %v5227_v17, %v4495_v32 }
  0x87   :  { %v4504_v37 = vpop.permute.xlu0 %4503  ;;  %v192_v42 = vpack.c.bf16 %v179_v7, %v178_v2  ;;  %v181_v13 = vsel %vm169_vm2, %v5257_v28, %v4501_v40  ;;  %v180_v15 = vsel %vm169_vm2, %v5238_v20, %v4500_v41 }
  0x88   :  { %v4506_v43 = vunpack.i.h.bf16 %v4504_v37  ;;  %v4505_v44 = vunpack.i.l.bf16 %v4504_v37  ;;  %v4509_v45 = vpop.permute.xlu1 %4508  ;;  %v193_v46 = vpack.c.bf16 %v181_v13, %v180_v15 }
  0x89   :  { %v4511_v47 = vunpack.i.h.bf16 %v4509_v45  ;;  %v4510_v48 = vunpack.i.l.bf16 %v4509_v45 }
  0x8a   :  { %v183_v17 = vsel %vm169_vm2, %v5271_v33, %v4506_v43  ;;  %v182_v19 = vsel %vm169_vm2, %v5262_v29, %v4505_v44  ;;  %v493_v29 = vld [vmem:[%s7240_s2 + $0x38] sm:$0xff]  ;;  %v494_v33 = vld [vmem:[%s7240_s2 + $0x40] sm:$0xff] }
  0x8b   :  { %v194_v49 = vpack.c.bf16 %v183_v17, %v182_v19  ;;  %v185_v28 = vsel %vm169_vm2, %v5285_v38, %v4511_v47  ;;  %v184_v20 = vsel %vm169_vm2, %v5276_v34, %v4510_v48  ;;  %v506_v51 = vpack.c.bf16 %v494_v33, %v493_v29  ;;  %v5372_v34 = vld [vmem:[%s7240_s2 + $0x288] ss:$0 sm:$0xff]  ;;  %v492_v47 = vld [vmem:[%s7240_s2 + $0x30] sm:$0xff] }
  0x8c   :  { %v195_v50 = vpack.c.bf16 %v185_v28, %v184_v20 }
  0x8d   :  { %4092 = vmatmul.mubr.msk.bf16.gmra.mxu0 %vm201_vm3, %v191_v39  ;;  %4103 = vmatprep.subr.bf16.mxu1 %v506_v51 }
  0x8e   :  { %4095 = vmatprep.mubr.msk.bf16.mxu0 %vm201_vm3, %v192_v42  ;;  %4104 = vmatpush3.bf16.msra.mxu1 %v506_v51 }
  0x95   :  { %4096 = vmatmul.mubr.msk.bf16.gmra.mxu0 %vm201_vm3, %v193_v46  ;;  %v491_v46 = vld [vmem:[%s7240_s2 + $0x28] sm:$0xff] }
  0x96   :  { %4099 = vmatprep.mubr.msk.bf16.mxu0 %vm201_vm3, %v194_v49  ;;  %v505_v33 = vpack.c.bf16 %v492_v47, %v491_v46 }
  0x98   :  { %4105 = vmatprep.subr.bf16.mxu1 %v505_v33 }
  0x99   :  { %4106 = vmatpush3.bf16.msra.mxu1 %v505_v33 }
  0x9d   :  { %4100 = vmatmul.mubr.msk.bf16.gmra.mxu0 %vm201_vm3, %v195_v50 }
 0x145   :  { %v4089_v38 = vpop.f32.mrf.mxu0 }
 0x146   :  { %v5375_v52 = vadd.f32 %v4089_v38, %v5372_v34 }
 0x147   :  { %v264_v53 = vpop.f32.mrf.mxu0 }
 0x148   :  { %v329_v54 = vsub.f32 0.0, %v5375_v52  ;;  %v5379_v55 = vadd.f32 %v5372_v34, %v264_v53 }
 0x149   :  { %v4090_v56 = vpop.f32.mrf.mxu0 }
 0x14a   :  { %v347_v57 = vmul.f32 1.442695, %v329_v54  ;;  %v327_v58 = vsub.f32 0.0, %v5379_v55  ;;  %v5383_v59 = vadd.f32 %v4090_v56, %v5372_v34 }
 0x14b   :  { %v267_v60 = vpop.f32.mrf.mxu0 }
 0x14c   :  { %4798 = vpow2.f32 %v347_v57  ;;  %v343_v61 = vmul.f32 1.442695, %v327_v58  ;;  %v330_v62 = vsub.f32 0.0, %v5383_v59  ;;  %v5387_v63 = vadd.f32 %v5372_v34, %v267_v60  ;;  %v489_v58 = vld [vmem:[%s7240_s2 + $0x18] sm:$0xff]  ;;  %v490_v60 = vld [vmem:[%s7240_s2 + $0x20] sm:$0xff] }
 0x14d   :  { %v4093_v5 = vpop.f32.mrf.mxu0 }
 0x14e   :  { %4800 = vpow2.f32 %v343_v61  ;;  %v349_v6 = vmul.f32 1.442695, %v330_v62  ;;  %v328_v11 = vsub.f32 0.0, %v5387_v63  ;;  %v5391_v4 = vadd.f32 %v4093_v5, %v5372_v34 }
 0x14f   :  { %v280_v12 = vpop.f32.mrf.mxu0 }
 0x150   :  { %4802 = vpow2.f32 %v349_v6  ;;  %v345_v14 = vmul.f32 1.442695, %v328_v11  ;;  %v333_v16 = vsub.f32 0.0, %v5391_v4  ;;  %v5395_v18 = vadd.f32 %v5372_v34, %v280_v12 }
 0x151   :  { %v4094_v21 = vpop.f32.mrf.mxu0  ;;  %v504_v12 = vpack.c.bf16 %v490_v60, %v489_v58 }
 0x152   :  { %4804 = vpow2.f32 %v345_v14  ;;  %v355_v22 = vmul.f32 1.442695, %v333_v16  ;;  %v331_v23 = vsub.f32 0.0, %v5395_v18  ;;  %v5399_v24 = vadd.f32 %v4094_v21, %v5372_v34 }
 0x153   :  { %v283_v25 = vpop.f32.mrf.mxu0  ;;  %4107 = vmatprep.subr.bf16.mxu1 %v504_v12 }
 0x154   :  { %4806 = vpow2.f32 %v355_v22  ;;  %v351_v0 = vmul.f32 1.442695, %v331_v23  ;;  %v334_v1 = vsub.f32 0.0, %v5399_v24  ;;  %v5403_v26 = vadd.f32 %v5372_v34, %v283_v25  ;;  %v487_v25 = vld [vmem:[%s7240_s2 + $0x8] sm:$0xff]  ;;  %4108 = vmatpush3.bf16.msra.mxu1 %v504_v12 }
 0x155   :  { %v4097_v27 = vpop.f32.mrf.mxu0 }
 0x156   :  { %4808 = vpow2.f32 %v351_v0  ;;  %v357_v30 = vmul.f32 1.442695, %v334_v1  ;;  %v332_v31 = vsub.f32 0.0, %v5403_v26  ;;  %v5407_v9 = vadd.f32 %v4097_v27, %v5372_v34  ;;  %v488_v0 = vld [vmem:[%s7240_s2 + $0x10] sm:$0xff] }
 0x157   :  { %v296_v32 = vpop.f32.mrf.mxu0 }
 0x158   :  { %v353_v8 = vmul.f32 1.442695, %v332_v31  ;;  %v337_v35 = vsub.f32 0.0, %v5407_v9  ;;  %v5411_v7 = vadd.f32 %v5372_v34, %v296_v32  ;;  %4810 = vpow2.f32 %v357_v30 }
 0x159   :  { %v4799_v2 = vpop.eup %4798  ;;  %v4098_v36 = vpop.f32.mrf.mxu0 }
 0x15a   :  { %v377_v37 = vadd.f32 1.0, %v4799_v2  ;;  %4812 = vpow2.f32 %v353_v8  ;;  %v363_v39 = vmul.f32 1.442695, %v337_v35  ;;  %v335_v40 = vsub.f32 0.0, %v5411_v7 }
 0x15b   :  { %v4801_v41 = vpop.eup %4800  ;;  %v5415_v42 = vadd.f32 %v4098_v36, %v5372_v34  ;;  %v299_v43 = vpop.f32.mrf.mxu0 }
 0x15c   :  { %4814 = vrcp.f32 %v377_v37  ;;  %v375_v44 = vadd.f32 1.0, %v4801_v41  ;;  %v359_v13 = vmul.f32 1.442695, %v335_v40  ;;  %v5418_v15 = vadd.f32 %v5372_v34, %v299_v43 }
 0x15d   :  { %v4803_v17 = vpop.eup %4802  ;;  %4816 = vpow2.f32 %v363_v39  ;;  %v338_v19 = vsub.f32 0.0, %v5415_v42  ;;  %v4101_v45 = vpop.f32.mrf.mxu0 }
 0x15e   :  { %4818 = vrcp.f32 %v375_v44  ;;  %v378_v48 = vadd.f32 1.0, %v4803_v17  ;;  %v336_v49 = vsub.f32 0.0, %v5418_v15  ;;  %v5429_v28 = vadd.f32 %v4101_v45, %v5372_v34 }
 0x15f   :  { %v4805_v20 = vpop.eup %4804  ;;  %4820 = vpow2.f32 %v359_v13  ;;  %v365_v50 = vmul.f32 1.442695, %v338_v19  ;;  %v312_v29 = vpop.f32.mrf.mxu0 }
 0x160   :  { %4822 = vrcp.f32 %v378_v48  ;;  %v376_v51 = vadd.f32 1.0, %v4805_v20  ;;  %v361_v38 = vmul.f32 1.442695, %v336_v49  ;;  %v341_v53 = vsub.f32 0.0, %v5429_v28 }
 0x161   :  { %v4807_v54 = vpop.eup %4806  ;;  %4824 = vpow2.f32 %v365_v50  ;;  %v5433_v56 = vadd.f32 %v5372_v34, %v312_v29  ;;  %v4102_v57 = vpop.f32.mrf.mxu0 }
 0x162   :  { %4826 = vrcp.f32 %v376_v51  ;;  %v371_v61 = vmul.f32 1.442695, %v341_v53  ;;  %v5442_v62 = vadd.f32 %v4102_v57, %v5372_v34  ;;  %v381_v14 = vadd.f32 1.0, %v4807_v54 }
 0x163   :  { %v4809_v5 = vpop.eup %4808  ;;  %4828 = vpow2.f32 %v361_v38  ;;  %v339_v6 = vsub.f32 0.0, %v5433_v56  ;;  %v315_v11 = vpop.f32.mrf.mxu0 }
 0x164   :  { %v379_v16 = vadd.f32 1.0, %v4809_v5  ;;  %v342_v21 = vsub.f32 0.0, %v5442_v62  ;;  %v5447_v22 = vadd.f32 %v5372_v34, %v315_v11  ;;  %4830 = vpow2.f32 %v371_v61 }
 0x165   :  { %v367_v23 = vmul.f32 1.442695, %v339_v6  ;;  %v4811_v1 = vpop.eup %4810  ;;  %v503_v34 = vpack.c.bf16 %v488_v0, %v487_v25 }
 0x166   :  { %4832 = vrcp.f32 %v379_v16  ;;  %v373_v27 = vmul.f32 1.442695, %v342_v21  ;;  %v340_v30 = vsub.f32 0.0, %v5447_v22  ;;  %v382_v36 = vadd.f32 1.0, %v4811_v1 }
 0x167   :  { %v4813_v31 = vpop.eup %4812  ;;  %4834 = vpow2.f32 %v367_v23  ;;  %4109 = vmatprep.subr.bf16.mxu1 %v503_v34 }
 0x168   :  { %4836 = vrcp.f32 %v381_v14  ;;  %v380_v32 = vadd.f32 1.0, %v4813_v31  ;;  %v369_v8 = vmul.f32 1.442695, %v340_v30  ;;  %4110 = vmatpush3.bf16.msra.mxu1 %v503_v34 }
 0x169   :  { %v4815_v35 = vpop.eup %4814  ;;  %4838 = vpow2.f32 %v373_v27 }
 0x16a   :  { %v4817_v2 = vpop.eup %4816  ;;  %4840 = vrcp.f32 %v380_v32 }
 0x16b   :  { %v4819_v37 = vpop.eup %4818  ;;  %4842 = vpow2.f32 %v369_v8  ;;  %v385_v44 = vadd.f32 1.0, %v4817_v2 }
 0x16c   :  { %v4821_v39 = vpop.eup %4820  ;;  %423 = vrot.lane.b32.xlu0 %v4819_v37, %s5145_s10  ;;  %4844 = vrcp.f32 %v382_v36 }
 0x16d   :  { %v4823_v40 = vpop.eup %4822  ;;  %v383_v41 = vadd.f32 1.0, %v4821_v39 }
 0x16e   :  { %v4825_v43 = vpop.eup %4824 }
 0x16f   :  { %v4827_v13 = vpop.eup %4826  ;;  %4846 = vrcp.f32 %v383_v41  ;;  %v386_v46 = vadd.f32 1.0, %v4825_v43 }
 0x170   :  { %v4829_v17 = vpop.eup %4828  ;;  %425 = vrot.lane.b32.xlu1 %v4827_v13, %s5145_s10  ;;  %427 = vrot.lane.b32.xlu0 %v4815_v35, %s5145_s10  ;;  %4848 = vrcp.f32 %v385_v44 }
 0x171   :  { %v384_v19 = vadd.f32 1.0, %v4829_v17  ;;  %v4831_v45 = vpop.eup %4830 }
 0x172   :  { %v389_v29 = vadd.f32 1.0, %v4831_v45 }
 0x173   :  { %v4833_v47 = vpop.eup %4832  ;;  %4850 = vrcp.f32 %v384_v19 }
 0x174   :  { %v4835_v48 = vpop.eup %4834  ;;  %429 = vrot.lane.b32.xlu1 %v4823_v40, %s5145_s10  ;;  %431 = vrot.lane.b32.xlu0 %v4833_v47, %s5145_s10  ;;  %4852 = vrcp.f32 %v386_v46 }
 0x175   :  { %v4837_v49 = vpop.eup %4836  ;;  %v387_v20 = vadd.f32 1.0, %v4835_v48 }
 0x176   :  { %v4839_v50 = vpop.eup %4838 }
 0x177   :  { %v4841_v33 = vpop.eup %4840  ;;  %4854 = vrcp.f32 %v387_v20  ;;  %v390_v54 = vadd.f32 1.0, %v4839_v50 }
 0x178   :  { %v4843_v51 = vpop.eup %4842  ;;  %433 = vrot.lane.b32.xlu1 %v4841_v33, %s5145_s10  ;;  %435 = vrot.lane.b32.xlu0 %v4837_v49, %s5145_s10  ;;  %4856 = vrcp.f32 %v389_v29 }
 0x179   :  { %v388_v38 = vadd.f32 1.0, %v4843_v51  ;;  %v4845_v53 = vpop.eup %4844 }
 0x17b   :  { %4858 = vrcp.f32 %v388_v38 }
 0x17c   :  { %v4847_v57 = vpop.eup %4846  ;;  %437 = vrot.lane.b32.xlu1 %v4845_v53, %s5145_s10  ;;  %4860 = vrcp.f32 %v390_v54 }
 0x17d   :  { %439 = vrot.lane.b32.xlu0 %v4847_v57, %s5145_s10  ;;  %v4849_v58 = vpop.eup %4848 }
 0x180   :  { %v4851_v60 = vpop.eup %4850 }
 0x181   :  { %441 = vrot.lane.b32.xlu1 %v4851_v60, %s5145_s10  ;;  %443 = vrot.lane.b32.xlu0 %v4849_v58, %s5145_s10  ;;  %v4853_v61 = vpop.eup %4852 }
 0x184   :  { %v4855_v5 = vpop.eup %4854 }
 0x185   :  { %445 = vrot.lane.b32.xlu1 %v4853_v61, %s5145_s10  ;;  %447 = vrot.lane.b32.xlu0 %v4855_v5, %s5145_s10  ;;  %v4857_v6 = vpop.eup %4856 }
 0x188   :  { %v4859_v11 = vpop.eup %4858 }
 0x189   :  { %449 = vrot.lane.b32.xlu1 %v4859_v11, %s5145_s10  ;;  %451 = vrot.lane.b32.xlu0 %v4857_v6, %s5145_s10  ;;  %v4861_v12 = vpop.eup %4860 }
 0x18d   :  { %453 = vrot.lane.b32.xlu1 %v4861_v12, %s5145_s10 }
 0x1de   :  { %v424_v14 = vpop.permute.xlu0 %423 }
 0x1df   :  { %v471_v23 = vmul.f32 %v424_v14, %v5379_v55 }
 0x1e2   :  { %v426_v16 = vpop.permute.xlu1 %425  ;;  %v428_v21 = vpop.permute.xlu0 %427 }
 0x1e3   :  { %v472_v25 = vmul.f32 %v426_v16, %v5387_v63  ;;  %v473_v30 = vmul.f32 %v428_v21, %v5375_v52 }
 0x1e5   :  { %v495_v0 = vpack.c.bf16 %v472_v25, %v471_v23 }
 0x1e6   :  { %v430_v1 = vpop.permute.xlu1 %429  ;;  %v432_v27 = vpop.permute.xlu0 %431 }
 0x1e7   :  { %v474_v31 = vmul.f32 %v430_v1, %v5383_v59  ;;  %4111 = vmatprep.mubr.msk.bf16.mxu1 %vm507_vm4, %v495_v0  ;;  %v475_v35 = vmul.f32 %v432_v27, %v5395_v18  ;;  %v18_v0 = vld [vmem:[%s7239_s1 + $0x10] sm:$0xff]  ;;  %v19_v1 = vld [vmem:[%s7239_s1 + $0x18] sm:$0xff]  ;;  %v20_v27 = vld [vmem:[%s7239_s1 + $0x20] sm:$0xff] }
 0x1e9   :  { %v496_v34 = vpack.c.bf16 %v474_v31, %v473_v30  ;;  %v21_v30 = vld [vmem:[%s7239_s1 + $0x28] sm:$0xff]  ;;  %v5517_v31 = vpack.c.bf16 %v19_v1, %v18_v0 }
 0x1ea   :  { %v434_v32 = vpop.permute.xlu1 %433  ;;  %v436_v8 = vpop.permute.xlu0 %435 }
 0x1eb   :  { %v476_v2 = vmul.f32 %v434_v32, %v5403_v26  ;;  %4112 = vmatmul.mubr.msk.bf16.vlgmr.msra.gmra.mxu1 %vm507_vm4, %v496_v34  ;;  %v477_v36 = vmul.f32 %v436_v8, %v5391_v4  ;;  %v5519_v34 = vpack.c.bf16 %v21_v30, %v20_v27  ;;  %v22_v32 = vld [vmem:[%s7239_s1 + $0x30] sm:$0xff]  ;;  %v23_v8 = vld [vmem:[%s7239_s1 + $0x38] sm:$0xff] }
 0x1ed   :  { %v497_v55 = vpack.c.bf16 %v476_v2, %v475_v35  ;;  %v24_v35 = vld [vmem:[%s7239_s1 + $0x40] sm:$0xff]  ;;  %v25_v2 = vld [vmem:[%s7239_s1 + $0x48] sm:$0xff] }
 0x1ee   :  { %v438_v63 = vpop.permute.xlu1 %437 }
 0x1ef   :  { %v478_v37 = vmul.f32 %v438_v63, %v5399_v24  ;;  %v440_v52 = vpop.permute.xlu0 %439  ;;  %4115 = vmatprep.mubr.msk.bf16.mxu1 %vm507_vm4, %v497_v55  ;;  %v5535_v55 = vpack.c.bf16 %v23_v8, %v22_v32  ;;  %v5537_v63 = vpack.c.bf16 %v25_v2, %v24_v35 }
 0x1f0   :  { %v479_v18 = vmul.f32 %v440_v52, %v5411_v7  ;;  %v28_v52 = vld [vmem:[%s7239_s1 + $0x60] sm:$0xff] }
 0x1f1   :  { %v498_v59 = vpack.c.bf16 %v478_v37, %v477_v36  ;;  %v26_v36 = vld [vmem:[%s7239_s1 + $0x50] sm:$0xff]  ;;  %v27_v37 = vld [vmem:[%s7239_s1 + $0x58] sm:$0xff] }
 0x1f3   :  { %v442_v39 = vpop.permute.xlu1 %441  ;;  %v444_v40 = vpop.permute.xlu0 %443  ;;  %4116 = vmatmul.mubr.msk.bf16.gmra.mxu1 %vm507_vm4, %v498_v59  ;;  %v29_v59 = vld [vmem:[%s7239_s1 + $0x68] sm:$0xff] }
 0x1f4   :  { %v480_v26 = vmul.f32 %v442_v39, %v5418_v15  ;;  %v481_v13 = vmul.f32 %v444_v40, %v5407_v9  ;;  %v5553_v39 = vpack.c.bf16 %v27_v37, %v26_v36  ;;  %v5555_v40 = vpack.c.bf16 %v29_v59, %v28_v52 }
 0x1f6   :  { %v499_v41 = vpack.c.bf16 %v480_v26, %v479_v18  ;;  %v30_v18 = vld [vmem:[%s7239_s1 + $0x70] sm:$0xff]  ;;  %v31_v26 = vld [vmem:[%s7239_s1 + $0x78] sm:$0xff] }
 0x1f7   :  { %v446_v43 = vpop.permute.xlu1 %445  ;;  %v448_v44 = vpop.permute.xlu0 %447 }
 0x1f8   :  { %v482_v4 = vmul.f32 %v446_v43, %v5415_v42  ;;  %4119 = vmatprep.mubr.msk.bf16.mxu1 %vm507_vm4, %v499_v41  ;;  %v483_v19 = vmul.f32 %v448_v44, %v5433_v56  ;;  %v16_v42 = vld [vmem:[%s7239_s1] sm:$0xff]  ;;  %v17_v56 = vld [vmem:[%s7239_s1 + $0x8] sm:$0xff]  ;;  %v5565_v41 = vpack.c.bf16 %v31_v26, %v30_v18  ;;  %v873_v43 = vld [vmem:[%s7240_s2 + $0x58] sm:$0xff] }
 0x1f9   :  { %v874_v44 = vld [vmem:[%s7240_s2 + $0x60] sm:$0xff] }
 0x1fa   :  { %v500_v24 = vpack.c.bf16 %v482_v4, %v481_v13  ;;  %v871_v13 = vld [vmem:[%s7240_s2 + $0x48] sm:$0xff]  ;;  %v885_v4 = vpack.c.bf16 %v874_v44, %v873_v43 }
 0x1fb   :  { %v450_v17 = vpop.permute.xlu1 %449  ;;  %v452_v7 = vpop.permute.xlu0 %451 }
 0x1fc   :  { %v484_v45 = vmul.f32 %v450_v17, %v5447_v22  ;;  %4120 = vmatmul.mubr.msk.bf16.gmra.mxu1 %vm507_vm4, %v500_v24  ;;  %v485_v47 = vmul.f32 %v452_v7, %v5429_v28  ;;  %v5502_v22 = vpack.c.bf16 %v17_v56, %v16_v42  ;;  %v872_v24 = vld [vmem:[%s7240_s2 + $0x50] sm:$0xff]  ;;  %4159 = vmatprep.subr.bf16.mxu1 %v885_v4 }
 0x1fd   :  { %v884_v17 = vpack.c.bf16 %v872_v24, %v871_v13  ;;  %4160 = vmatpush3.bf16.msra.mxu1 %v885_v4 }
 0x1fe   :  { %v501_v46 = vpack.c.bf16 %v484_v45, %v483_v19  ;;  %4143 = vmatprep.mubr.bf16.mxu0 %v5502_v22 }
 0x1ff   :  { %v454_v15 = vpop.permute.xlu1 %453  ;;  %4161 = vmatprep.subr.bf16.mxu1 %v884_v17 }
 0x200   :  { %v486_v48 = vmul.f32 %v454_v15, %v5442_v62  ;;  %4123 = vmatprep.mubr.msk.bf16.mxu1 %vm507_vm4, %v501_v46 }
 0x201   :  { %4162 = vmatpush3.bf16.msra.mxu1 %v884_v17 }
 0x202   :  { %v502_v9 = vpack.c.bf16 %v486_v48, %v485_v47 }
 0x204   :  { %4124 = vmatmul.mubr.msk.bf16.gmra.mxu1 %vm507_vm4, %v502_v9 }
 0x2ab   :  { %v4113_v28 = vpop.f32.mrf.mxu1 }
 0x2ad   :  { %v566_v49 = vpop.f32.mrf.mxu1 }
 0x2af   :  { %v4114_v62 = vpop.f32.mrf.mxu1 }
 0x2b0   :  { %v638_v23 = vpack.c.bf16 %v4114_v62, %v4113_v28 }
 0x2b1   :  { %v569_v20 = vpop.f32.mrf.mxu1 }
 0x2b2   :  { %v637_v25 = vpack.c.bf16 %v569_v20, %v566_v49 }
 0x2b3   :  { %v4117_v50 = vpop.f32.mrf.mxu1 }
 0x2b5   :  { %v582_v29 = vpop.f32.mrf.mxu1 }
 0x2b7   :  { %v4118_v33 = vpop.f32.mrf.mxu1 }
 0x2b8   :  { %v640_v16 = vpack.c.bf16 %v4118_v33, %v4117_v50 }
 0x2b9   :  { %v585_v51 = vpop.f32.mrf.mxu1 }
 0x2ba   :  { %v639_v21 = vpack.c.bf16 %v585_v51, %v582_v29 }
 0x2bc   :  { %v4121_v38 = vpop.f32.mrf.mxu1 }
 0x2be   :  { %v598_v53 = vpop.f32.mrf.mxu1 }
 0x2c0   :  { %v4122_v54 = vpop.f32.mrf.mxu1 }
 0x2c1   :  { %v642_v12 = vpack.c.bf16 %v4122_v54, %v4121_v38 }
 0x2c2   :  { %v601_v57 = vpop.f32.mrf.mxu1 }
 0x2c3   :  { %v641_v14 = vpack.c.bf16 %v601_v57, %v598_v53 }
 0x2c4   :  { %v4125_v58 = vpop.f32.mrf.mxu1 }
 0x2c6   :  { %v614_v60 = vpop.f32.mrf.mxu1 }
 0x2c8   :  { %v4126_v61 = vpop.f32.mrf.mxu1 }
 0x2c9   :  { %v644_v5 = vpack.c.bf16 %v4126_v61, %v4125_v58 }
 0x2ca   :  { %v617_v6 = vpop.f32.mrf.mxu1 }
 0x2cb   :  { %v643_v11 = vpack.c.bf16 %v617_v6, %v614_v60  ;;  %4127 = vmatprep.subr.bf16.mxu0 %v644_v5 }
 0x2cc   :  { %4128 = vmatpush3.bf16.msra.mxu0 %v644_v5 }
 0x2cd   :  { %4129 = vmatprep.subr.bf16.mxu0 %v643_v11 }
 0x2d0   :  { %4130 = vmatpush3.bf16.msra.mxu0 %v643_v11 }
 0x2d1   :  { %4131 = vmatprep.subr.bf16.mxu0 %v642_v12 }
 0x2d4   :  { %4132 = vmatpush3.bf16.msra.mxu0 %v642_v12 }
 0x2d5   :  { %4133 = vmatprep.subr.bf16.mxu0 %v641_v14 }
 0x2d8   :  { %4134 = vmatpush3.bf16.msra.mxu0 %v641_v14 }
 0x2d9   :  { %4135 = vmatprep.subr.bf16.mxu0 %v640_v16 }
 0x2dc   :  { %4136 = vmatpush3.bf16.msra.mxu0 %v640_v16 }
 0x2dd   :  { %4137 = vmatprep.subr.bf16.mxu0 %v639_v21 }
 0x2e0   :  { %4138 = vmatpush3.bf16.msra.mxu0 %v639_v21 }
 0x2e1   :  { %4139 = vmatprep.subr.bf16.mxu0 %v638_v23 }
 0x2e4   :  { %4140 = vmatpush3.bf16.msra.mxu0 %v638_v23 }
 0x2e5   :  { %4141 = vmatprep.subr.bf16.mxu0 %v637_v25 }
 0x2e8   :  { %4142 = vmatpush3.bf16.msra.mxu0 %v637_v25 }
 0x2eb   :  { %4144 = vmatmul.mubr.bf16.vlgmr.msra.gmra.mxu0 %v5517_v31 }
 0x2ec   :  { %4147 = vmatprep.mubr.bf16.mxu0 %v5519_v34 }
 0x2f3   :  { %4148 = vmatmul.mubr.bf16.gmra.mxu0 %v5535_v55 }
 0x2f4   :  { %4151 = vmatprep.mubr.bf16.mxu0 %v5537_v63 }
 0x2fb   :  { %4152 = vmatmul.mubr.bf16.gmra.mxu0 %v5553_v39 }
 0x2fc   :  { %4155 = vmatprep.mubr.bf16.mxu0 %v5555_v40 }
 0x303   :  { %4156 = vmatmul.mubr.bf16.gmra.mxu0 %v5565_v41 }
 0x3ab   :  { %v5580_v19 = vpop.f32.mrf.mxu0 }
 0x3ac   :  { %v744_v46 = vmax.f32 %v5580_v19, 0.0 }
 0x3ad   :  { %v5582_v45 = vpop.f32.mrf.mxu0 }
 0x3ae   :  { %v742_v15 = vmax.f32 %v5582_v45, 0.0  ;;  %v760_v56 = vrot.slane %v744_v46, 1 }
 0x3af   :  { %v5584_v7 = vpop.f32.mrf.mxu0 }
 0x3b0   :  { %v745_v48 = vmax.f32 %v5584_v7, 0.0  ;;  %v5598_v28 = vrot.slane %v742_v15, 1 }
 0x3b1   :  { %v5588_v47 = vpop.f32.mrf.mxu0 }
 0x3b2   :  { %v743_v9 = vmax.f32 %v5588_v47, 0.0  ;;  %v761_v20 = vrot.slane %v745_v48, 1 }
 0x3b3   :  { %v5592_v42 = vpop.f32.mrf.mxu0 }
 0x3b4   :  { %v759_v49 = vrot.slane %v743_v9, 1  ;;  %v748_v53 = vmax.f32 %v5592_v42, 0.0  ;;  %v786_v5 = vsel %vm88_vm0, %v760_v56, %v761_v20 }
 0x3b5   :  { %v5602_v62 = vpop.f32.mrf.mxu0 }
 0x3b6   :  { %v746_v50 = vmax.f32 %v5602_v62, 0.0  ;;  %v787_v29 = vsel %vm88_vm0, %v759_v49, %v760_v56  ;;  %v788_v33 = vsel %vm88_vm0, %v5598_v28, %v759_v49  ;;  %v764_v12 = vrot.slane %v748_v53, 1 }
 0x3b7   :  { %v5612_v51 = vpop.f32.mrf.mxu0  ;;  %v4512_v38 = vpack.i.bf16 %v787_v29, %v788_v33 }
 0x3b8   :  { %v762_v54 = vrot.slane %v746_v50, 1  ;;  %v749_v58 = vmax.f32 %v5612_v51, 0.0 }
 0x3b9   :  { %4513 = vrot.lane.b32.xlu0 %v4512_v38, %s5146_s23  ;;  %v5618_v57 = vpop.f32.mrf.mxu0 }
 0x3ba   :  { %v747_v60 = vmax.f32 %v5618_v57, 0.0  ;;  %v785_v61 = vsel %vm88_vm0, %v761_v20, %v762_v54  ;;  %v765_v21 = vrot.slane %v749_v58, 1 }
 0x3bb   :  { %v5626_v6 = vpop.f32.mrf.mxu0  ;;  %v4517_v11 = vpack.i.bf16 %v785_v61, %v786_v5 }
 0x3bc   :  { %v763_v14 = vrot.slane %v747_v60, 1  ;;  %v752_v30 = vmax.f32 %v5626_v6, 0.0  ;;  %v782_v37 = vsel %vm88_vm0, %v764_v12, %v765_v21 }
 0x3bd   :  { %4518 = vrot.lane.b32.xlu1 %v4517_v11, %s5146_s23  ;;  %v5633_v16 = vpop.f32.mrf.mxu0 }
 0x3be   :  { %v750_v23 = vmax.f32 %v5633_v16, 0.0  ;;  %v783_v25 = vsel %vm88_vm0, %v763_v14, %v764_v12  ;;  %v784_v0 = vsel %vm88_vm0, %v762_v54, %v763_v14  ;;  %v768_v18 = vrot.slane %v752_v30, 1 }
 0x3bf   :  { %v5642_v1 = vpop.f32.mrf.mxu0  ;;  %v4522_v27 = vpack.i.bf16 %v783_v25, %v784_v0 }
 0x3c0   :  { %v766_v32 = vrot.slane %v750_v23, 1  ;;  %v753_v8 = vmax.f32 %v5642_v1, 0.0 }
 0x3c1   :  { %4523 = vrot.lane.b32.xlu0 %v4522_v27, %s5146_s23  ;;  %v5649_v35 = vpop.f32.mrf.mxu0 }
 0x3c2   :  { %v751_v2 = vmax.f32 %v5649_v35, 0.0  ;;  %v781_v36 = vsel %vm88_vm0, %v765_v21, %v766_v32  ;;  %v769_v43 = vrot.slane %v753_v8, 1 }
 0x3c3   :  { %v5656_v52 = vpop.f32.mrf.mxu0  ;;  %v4527_v59 = vpack.i.bf16 %v781_v36, %v782_v37 }
 0x3c4   :  { %v767_v26 = vrot.slane %v751_v2, 1  ;;  %v756_v13 = vmax.f32 %v5656_v52, 0.0  ;;  %v778_v38 = vsel %vm88_vm0, %v768_v18, %v769_v43  ;;  %v3858_v52 = vld [vmem:[%s7240_s2 + $0x289] ss:$0 sm:$0xff] }
 0x3c5   :  { %4528 = vrot.lane.b32.xlu1 %v4527_v59, %s5146_s23  ;;  %v5665_v44 = vpop.f32.mrf.mxu0 }
 0x3c6   :  { %v754_v4 = vmax.f32 %v5665_v44, 0.0  ;;  %v779_v24 = vsel %vm88_vm0, %v767_v26, %v768_v18  ;;  %v780_v17 = vsel %vm88_vm0, %v766_v32, %v767_v26  ;;  %v772_v54 = vrot.slane %v756_v13, 1 }
 0x3c7   :  { %v5673_v56 = vpop.f32.mrf.mxu0  ;;  %v4532_v49 = vpack.i.bf16 %v779_v24, %v780_v17 }
 0x3c8   :  { %v770_v20 = vrot.slane %v754_v4, 1  ;;  %v757_v29 = vmax.f32 %v5673_v56, 0.0 }
 0x3c9   :  { %4533 = vrot.lane.b32.xlu0 %v4532_v49, %s5146_s23  ;;  %v5679_v33 = vpop.f32.mrf.mxu0 }
 0x3ca   :  { %v773_v61 = vrot.slane %v757_v29, 1  ;;  %v755_v5 = vmax.f32 %v5679_v33, 0.0  ;;  %v777_v11 = vsel %vm88_vm0, %v769_v43, %v770_v20 }
 0x3cb   :  { %v4537_v12 = vpack.i.bf16 %v777_v11, %v778_v38 }
 0x3cc   :  { %v771_v14 = vrot.slane %v755_v5, 1  ;;  %v774_v21 = vsel %vm88_vm0, %v772_v54, %v773_v61  ;;  %v789_v25 = vsel %vm88_vm0, %v773_v61, %v5598_v28 }
 0x3cd   :  { %4538 = vrot.lane.b32.xlu1 %v4537_v12, %s5146_s23  ;;  %v4547_v32 = vpack.i.bf16 %v789_v25, %v774_v21 }
 0x3ce   :  { %v775_v0 = vsel %vm88_vm0, %v771_v14, %v772_v54  ;;  %v776_v27 = vsel %vm88_vm0, %v770_v20, %v771_v14 }
 0x3cf   :  { %v4542_v36 = vpack.i.bf16 %v775_v0, %v776_v27 }
 0x3d1   :  { %4548 = vrot.lane.b32.xlu1 %v4547_v32, %s5146_s23  ;;  %4543 = vrot.lane.b32.xlu0 %v4542_v36, %s5146_s23 }
 0x42b   :  { %v4514_v37 = vpop.permute.xlu0 %4513 }
 0x42c   :  { %v4516_v59 = vunpack.i.h.bf16 %v4514_v37  ;;  %v4515_v18 = vunpack.i.l.bf16 %v4514_v37 }
 0x42e   :  { %v856_v28 = vsel %vm854_vm5, %v743_v9, %v4516_v59  ;;  %v855_v26 = vsel %vm854_vm5, %v742_v15, %v4515_v18 }
 0x42f   :  { %v4519_v43 = vpop.permute.xlu1 %4518  ;;  %v876_v24 = vpack.c.bf16 %v856_v28, %v855_v26 }
 0x430   :  { %v4521_v17 = vunpack.i.h.bf16 %v4519_v43  ;;  %v4520_v49 = vunpack.i.l.bf16 %v4519_v43 }
 0x431   :  { %4163 = vmatprep.mubr.msk.bf16.mxu1 %vm890_vm6, %v876_v24 }
 0x432   :  { %v858_v20 = vsel %vm854_vm5, %v745_v48, %v4521_v17  ;;  %v857_v47 = vsel %vm854_vm5, %v744_v46, %v4520_v49 }
 0x433   :  { %v877_v9 = vpack.c.bf16 %v858_v20, %v857_v47  ;;  %v4524_v38 = vpop.permute.xlu0 %4523 }
 0x434   :  { %v4526_v45 = vunpack.i.h.bf16 %v4524_v38  ;;  %v4525_v54 = vunpack.i.l.bf16 %v4524_v38 }
 0x435   :  { %4164 = vmatmul.mubr.msk.bf16.vlgmr.msra.gmra.mxu1 %vm890_vm6, %v877_v9 }
 0x436   :  { %v860_v15 = vsel %vm854_vm5, %v747_v60, %v4526_v45  ;;  %v859_v7 = vsel %vm854_vm5, %v746_v50, %v4525_v54 }
 0x437   :  { %v4529_v61 = vpop.permute.xlu1 %4528  ;;  %v878_v48 = vpack.c.bf16 %v860_v15, %v859_v7 }
 0x438   :  { %v4531_v11 = vunpack.i.h.bf16 %v4529_v61  ;;  %v4530_v19 = vunpack.i.l.bf16 %v4529_v61 }
 0x439   :  { %4167 = vmatprep.mubr.msk.bf16.mxu1 %vm890_vm6, %v878_v48 }
 0x43a   :  { %v862_v46 = vsel %vm854_vm5, %v749_v58, %v4531_v11  ;;  %v861_v57 = vsel %vm854_vm5, %v748_v53, %v4530_v19 }
 0x43b   :  { %v4534_v12 = vpop.permute.xlu0 %4533  ;;  %v879_v60 = vpack.c.bf16 %v862_v46, %v861_v57 }
 0x43c   :  { %v4536_v14 = vunpack.i.h.bf16 %v4534_v12  ;;  %v4535_v62 = vunpack.i.l.bf16 %v4534_v12 }
 0x43d   :  { %4168 = vmatmul.mubr.msk.bf16.gmra.mxu1 %vm890_vm6, %v879_v60 }
 0x43e   :  { %v864_v50 = vsel %vm854_vm5, %v751_v2, %v4536_v14  ;;  %v863_v51 = vsel %vm854_vm5, %v750_v23, %v4535_v62 }
 0x43f   :  { %v4539_v21 = vpop.permute.xlu1 %4538  ;;  %v880_v58 = vpack.c.bf16 %v864_v50, %v863_v51 }
 0x440   :  { %v4541_v25 = vunpack.i.h.bf16 %v4539_v21  ;;  %v4540_v42 = vunpack.i.l.bf16 %v4539_v21 }
 0x441   :  { %4171 = vmatprep.mubr.msk.bf16.mxu1 %vm890_vm6, %v880_v58 }
 0x442   :  { %v866_v53 = vsel %vm854_vm5, %v753_v8, %v4541_v25  ;;  %v865_v35 = vsel %vm854_vm5, %v752_v30, %v4540_v42 }
 0x443   :  { %v4549_v0 = vpop.permute.xlu1 %4548  ;;  %v4544_v2 = vpop.permute.xlu0 %4543  ;;  %v881_v27 = vpack.c.bf16 %v866_v53, %v865_v35 }
 0x444   :  { %v4551_v16 = vunpack.i.h.bf16 %v4549_v0  ;;  %v4550_v32 = vunpack.i.l.bf16 %v4549_v0  ;;  %v4546_v23 = vunpack.i.h.bf16 %v4544_v2  ;;  %v4545_v36 = vunpack.i.l.bf16 %v4544_v2 }
 0x445   :  { %4172 = vmatmul.mubr.msk.bf16.gmra.mxu1 %vm890_vm6, %v881_v27 }
 0x446   :  { %v868_v37 = vsel %vm854_vm5, %v755_v5, %v4546_v23  ;;  %v867_v1 = vsel %vm854_vm5, %v754_v4, %v4545_v36  ;;  %v870_v30 = vsel %vm854_vm5, %v757_v29, %v4551_v16  ;;  %v869_v8 = vsel %vm854_vm5, %v756_v13, %v4550_v32 }
 0x447   :  { %v882_v6 = vpack.c.bf16 %v868_v37, %v867_v1  ;;  %v883_v59 = vpack.c.bf16 %v870_v30, %v869_v8 }
 0x449   :  { %4175 = vmatprep.mubr.msk.bf16.mxu1 %vm890_vm6, %v882_v6 }
 0x44d   :  { %4176 = vmatmul.mubr.msk.bf16.gmra.mxu1 %vm890_vm6, %v883_v59 }
 0x4f5   :  { %v4165_v33 = vpop.f32.mrf.mxu1 }
 0x4f6   :  { %v5796_v16 = vadd.f32 %v4165_v33, %v3858_v52 }
 0x4f7   :  { %v949_v5 = vpop.f32.mrf.mxu1 }
 0x4f8   :  { %v1014_v6 = vsub.f32 0.0, %v5796_v16  ;;  %v5803_v30 = vadd.f32 %v3858_v52, %v949_v5 }
 0x4f9   :  { %v4166_v18 = vpop.f32.mrf.mxu1 }
 0x4fa   :  { %v5805_v8 = vadd.f32 %v4166_v18, %v3858_v52 }
 0x4fb   :  { %v5760_v44 = vpop.f32.mrf.mxu1 }
 0x4fd   :  { %v4169_v4 = vpop.f32.mrf.mxu1 }
 0x4fe   :  { %v5779_v11 = vadd.f32 %v4169_v4, %v3858_v52 }
 0x4ff   :  { %v965_v28 = vpop.f32.mrf.mxu1 }
 0x500   :  { %v1018_v25 = vsub.f32 0.0, %v5779_v11  ;;  %v5791_v42 = vadd.f32 %v3858_v52, %v965_v28 }
 0x501   :  { %v4170_v26 = vpop.f32.mrf.mxu1 }
 0x502   :  { %v5793_v53 = vadd.f32 %v4170_v26, %v3858_v52  ;;  %v1016_v32 = vsub.f32 0.0, %v5791_v42  ;;  %v1040_v36 = vmul.f32 1.442695, %v1018_v25  ;;  %v1032_v26 = vmul.f32 1.442695, %v1014_v6 }
 0x503   :  { %v968_v56 = vpop.f32.mrf.mxu1 }
 0x504   :  { %v5799_v23 = vadd.f32 %v3858_v52, %v968_v56  ;;  %v1019_v37 = vsub.f32 0.0, %v5793_v53  ;;  %v1036_v59 = vmul.f32 1.442695, %v1016_v32  ;;  %v1012_v56 = vsub.f32 0.0, %v5803_v30 }
 0x505   :  { %v4173_v43 = vpop.f32.mrf.mxu1 }
 0x506   :  { %v5765_v17 = vadd.f32 %v4173_v43, %v3858_v52  ;;  %v1017_v33 = vsub.f32 0.0, %v5799_v23  ;;  %v1042_v4 = vmul.f32 1.442695, %v1019_v37  ;;  %v1015_v43 = vsub.f32 0.0, %v5805_v8 }
 0x507   :  { %v981_v29 = vpop.f32.mrf.mxu1 }
 0x508   :  { %v1022_v9 = vsub.f32 0.0, %v5765_v17  ;;  %v5770_v38 = vadd.f32 %v3858_v52, %v981_v29  ;;  %v5811_v29 = vadd.f32 %v3858_v52, %v5760_v44  ;;  %v1038_v5 = vmul.f32 1.442695, %v1017_v33 }
 0x509   :  { %v4174_v24 = vpop.f32.mrf.mxu1 }
 0x50a   :  { %v5773_v54 = vadd.f32 %v4174_v24, %v3858_v52  ;;  %v1048_v57 = vmul.f32 1.442695, %v1022_v9  ;;  %v1020_v12 = vsub.f32 0.0, %v5770_v38  ;;  %v1028_v9 = vmul.f32 1.442695, %v1012_v56 }
 0x50b   :  { %v984_v13 = vpop.f32.mrf.mxu1 }
 0x50c   :  { %v1023_v62 = vsub.f32 0.0, %v5773_v54  ;;  %v5787_v50 = vadd.f32 %v3858_v52, %v984_v13  ;;  %v1044_v35 = vmul.f32 1.442695, %v1020_v12 }
 0x50d   :  { %v4177_v49 = vpop.f32.mrf.mxu1 }
 0x50e   :  { %v5767_v20 = vadd.f32 %v4177_v49, %v3858_v52  ;;  %v1050_v2 = vmul.f32 1.442695, %v1023_v62  ;;  %v1021_v27 = vsub.f32 0.0, %v5787_v50 }
 0x50f   :  { %v997_v47 = vpop.f32.mrf.mxu1 }
 0x510   :  { %v1026_v45 = vsub.f32 0.0, %v5767_v20  ;;  %v5775_v15 = vadd.f32 %v3858_v52, %v997_v47  ;;  %v1046_v1 = vmul.f32 1.442695, %v1021_v27 }
 0x511   :  { %v4178_v7 = vpop.f32.mrf.mxu1 }
 0x512   :  { %v1056_v61 = vmul.f32 1.442695, %v1026_v45  ;;  %v5777_v48 = vadd.f32 %v4178_v7, %v3858_v52  ;;  %v1024_v19 = vsub.f32 0.0, %v5775_v15  ;;  %v1034_v45 = vmul.f32 1.442695, %v1015_v43 }
 0x513   :  { %v1000_v46 = vpop.f32.mrf.mxu1  ;;  %v1013_v7 = vsub.f32 0.0, %v5811_v29 }
 0x514   :  { %v1027_v60 = vsub.f32 0.0, %v5777_v48  ;;  %v5784_v14 = vadd.f32 %v3858_v52, %v1000_v46  ;;  %4862 = vpow2.f32 %v1056_v61  ;;  %v1052_v51 = vmul.f32 1.442695, %v1024_v19 }
 0x515   :  { %v1030_v12 = vmul.f32 1.442695, %v1013_v7 }
 0x516   :  { %v1058_v21 = vmul.f32 1.442695, %v1027_v60  ;;  %v1025_v58 = vsub.f32 0.0, %v5784_v14  ;;  %4864 = vpow2.f32 %v1052_v51 }
 0x517   :  { %4866 = vpow2.f32 %v1048_v57 }
 0x518   :  { %v1054_v0 = vmul.f32 1.442695, %v1025_v58  ;;  %4868 = vpow2.f32 %v1058_v21 }
 0x51a   :  { %4870 = vpow2.f32 %v1054_v0 }
 0x51b   :  { %4872 = vpow2.f32 %v1044_v35 }
 0x51c   :  { %4874 = vpow2.f32 %v1050_v2 }
 0x51d   :  { %4876 = vpow2.f32 %v1040_v36 }
 0x51e   :  { %4878 = vpow2.f32 %v1046_v1 }
 0x51f   :  { %4880 = vpow2.f32 %v1036_v59 }
 0x520   :  { %4882 = vpow2.f32 %v1042_v4 }
 0x521   :  { %v4863_v28 = vpop.eup %4862 }
 0x522   :  { %v1074_v24 = vadd.f32 1.0, %v4863_v28 }
 0x523   :  { %v4865_v18 = vpop.eup %4864 }
 0x524   :  { %v4867_v13 = vpop.eup %4866  ;;  %4884 = vrcp.f32 %v1074_v24  ;;  %v1072_v49 = vadd.f32 1.0, %v4865_v18 }
 0x525   :  { %v4869_v47 = vpop.eup %4868  ;;  %4886 = vpow2.f32 %v1032_v26  ;;  %v1070_v46 = vadd.f32 1.0, %v4867_v13 }
 0x526   :  { %4888 = vpow2.f32 %v1038_v5  ;;  %v1075_v61 = vadd.f32 1.0, %v4869_v47 }
 0x527   :  { %v4871_v19 = vpop.eup %4870  ;;  %4890 = vrcp.f32 %v1072_v49 }
 0x528   :  { %v4873_v44 = vpop.eup %4872  ;;  %4892 = vrcp.f32 %v1075_v61  ;;  %v1073_v52 = vadd.f32 1.0, %v4871_v19 }
 0x529   :  { %v4875_v57 = vpop.eup %4874  ;;  %4894 = vpow2.f32 %v1028_v9  ;;  %v1068_v60 = vadd.f32 1.0, %v4873_v44 }
 0x52a   :  { %4896 = vpow2.f32 %v1034_v45  ;;  %v4877_v62 = vpop.eup %4876  ;;  %v1071_v51 = vadd.f32 1.0, %v4875_v57 }
 0x52b   :  { %4898 = vrcp.f32 %v1070_v46  ;;  %v4879_v21 = vpop.eup %4878  ;;  %v1066_v25 = vadd.f32 1.0, %v4877_v62 }
 0x52c   :  { %4900 = vrcp.f32 %v1073_v52  ;;  %v4881_v58 = vpop.eup %4880  ;;  %v1069_v0 = vadd.f32 1.0, %v4879_v21 }
 0x52d   :  { %4902 = vpow2.f32 %v1030_v12  ;;  %v4883_v35 = vpop.eup %4882  ;;  %v1064_v36 = vadd.f32 1.0, %v4881_v58  ;;  %v5147_v12 = vmov 0.0  }
 0x52e   :  { %4904 = vrcp.f32 %v1068_v60  ;;  %v1067_v1 = vadd.f32 1.0, %v4883_v35  ;;  %4179 = vmatprep.subr.bf16.mxu0 %v5147_v12  ;;  %4195 = vmatprep.mubr.msk.bf16.mxu0 %vm5148_vm7, %v5147_v12 }
 0x52f   :  { %4906 = vrcp.f32 %v1071_v51 }
 0x530   :  { %4908 = vrcp.f32 %v1066_v25 }
 0x531   :  { %v4885_v2 = vpop.eup %4884  ;;  %4910 = vrcp.f32 %v1069_v0 }
 0x532   :  { %v4887_v27 = vpop.eup %4886  ;;  %1136 = vrot.lane.b32.xlu0 %v4885_v2, %s5145_s10  ;;  %4912 = vrcp.f32 %v1064_v36 }
 0x533   :  { %v4889_v32 = vpop.eup %4888  ;;  %v1062_v4 = vadd.f32 1.0, %v4887_v27  ;;  %4914 = vrcp.f32 %v1067_v1 }
 0x534   :  { %v4891_v37 = vpop.eup %4890  ;;  %v1065_v26 = vadd.f32 1.0, %v4889_v32 }
 0x535   :  { %v4893_v6 = vpop.eup %4892  ;;  %4916 = vrcp.f32 %v1062_v4 }
 0x536   :  { %v4895_v59 = vpop.eup %4894  ;;  %1138 = vrot.lane.b32.xlu1 %v4893_v6, %s5145_s10  ;;  %1132 = vrot.lane.b32.xlu0 %v4891_v37, %s5145_s10  ;;  %4918 = vrcp.f32 %v1065_v26 }
 0x537   :  { %v4897_v33 = vpop.eup %4896  ;;  %v1060_v5 = vadd.f32 1.0, %v4895_v59 }
 0x538   :  { %v4899_v28 = vpop.eup %4898  ;;  %v1063_v18 = vadd.f32 1.0, %v4897_v33 }
 0x539   :  { %v4901_v56 = vpop.eup %4900  ;;  %4920 = vrcp.f32 %v1060_v5 }
 0x53a   :  { %1134 = vrot.lane.b32.xlu1 %v4901_v56, %s5145_s10  ;;  %1128 = vrot.lane.b32.xlu0 %v4899_v28, %s5145_s10  ;;  %v4903_v43 = vpop.eup %4902  ;;  %4922 = vrcp.f32 %v1063_v18 }
 0x53b   :  { %v4905_v24 = vpop.eup %4904  ;;  %v1061_v47 = vadd.f32 1.0, %v4903_v43 }
 0x53c   :  { %v4907_v13 = vpop.eup %4906 }
 0x53d   :  { %v4909_v49 = vpop.eup %4908  ;;  %4924 = vrcp.f32 %v1061_v47 }
 0x53e   :  { %1130 = vrot.lane.b32.xlu1 %v4907_v13, %s5145_s10  ;;  %1124 = vrot.lane.b32.xlu0 %v4905_v24, %s5145_s10  ;;  %v4911_v9 = vpop.eup %4910 }
 0x53f   :  { %v4913_v45 = vpop.eup %4912 }
 0x540   :  { %v4915_v7 = vpop.eup %4914 }
 0x542   :  { %1126 = vrot.lane.b32.xlu1 %v4911_v9, %s5145_s10  ;;  %1120 = vrot.lane.b32.xlu0 %v4909_v49, %s5145_s10  ;;  %v4917_v61 = vpop.eup %4916 }
 0x543   :  { %v4919_v19 = vpop.eup %4918 }
 0x546   :  { %1122 = vrot.lane.b32.xlu1 %v4915_v7, %s5145_s10  ;;  %1116 = vrot.lane.b32.xlu0 %v4913_v45, %s5145_s10  ;;  %v4921_v46 = vpop.eup %4920 }
 0x547   :  { %v4923_v44 = vpop.eup %4922 }
 0x54a   :  { %1118 = vrot.lane.b32.xlu1 %v4919_v19, %s5145_s10  ;;  %1112 = vrot.lane.b32.xlu0 %v4917_v61, %s5145_s10  ;;  %v4925_v52 = vpop.eup %4924 }
 0x54e   :  { %1114 = vrot.lane.b32.xlu1 %v4923_v44, %s5145_s10  ;;  %1108 = vrot.lane.b32.xlu0 %v4921_v46, %s5145_s10 }
 0x552   :  { %1110 = vrot.lane.b32.xlu1 %v4925_v52, %s5145_s10 }
 0x5a4   :  { %v1137_v57 = vpop.permute.xlu0 %1136 }
 0x5a5   :  { %v5832_v60 = vmul.f32 %v1137_v57, %v5767_v20 }
 0x5a7   :  { %v1187_v25 = vmul.f32 %v5832_v60, %v5832_v60 }
 0x5a8   :  { %v1139_v62 = vpop.permute.xlu1 %1138  ;;  %v1133_v51 = vpop.permute.xlu0 %1132 }
 0x5a9   :  { %v5835_v21 = vmul.f32 %v1139_v62, %v5777_v48  ;;  %v5838_v58 = vmul.f32 %v1133_v51, %v5775_v15 }
 0x5ab   :  { %v1188_v35 = vmul.f32 %v5835_v21, %v5835_v21  ;;  %v1185_v15 = vmul.f32 %v5838_v58, %v5838_v58 }
 0x5ac   :  { %v1135_v0 = vpop.permute.xlu1 %1134  ;;  %v1129_v2 = vpop.permute.xlu0 %1128 }
 0x5ad   :  { %v5845_v27 = vmul.f32 %v1135_v0, %v5784_v14  ;;  %v4552_v20 = vpack.i.bf16 %v1188_v35, %v1187_v25  ;;  %v5848_v32 = vmul.f32 %v1129_v2, %v5765_v17 }
 0x5af   :  { %4553 = vrot.lane.b32.xlu0 %v4552_v20, %s5145_s10  ;;  %v1186_v48 = vmul.f32 %v5845_v27, %v5845_v27  ;;  %v1183_v17 = vmul.f32 %v5848_v32, %v5848_v32 }
 0x5b0   :  { %v1131_v36 = vpop.permute.xlu1 %1130  ;;  %v1125_v37 = vpop.permute.xlu0 %1124 }
 0x5b1   :  { %v5856_v1 = vmul.f32 %v1131_v36, %v5773_v54  ;;  %v4557_v6 = vpack.i.bf16 %v1186_v48, %v1185_v15  ;;  %v5859_v14 = vmul.f32 %v1125_v37, %v5770_v38 }
 0x5b3   :  { %4558 = vrot.lane.b32.xlu1 %v4557_v6, %s5145_s10  ;;  %v1184_v59 = vmul.f32 %v5856_v1, %v5856_v1  ;;  %v1181_v38 = vmul.f32 %v5859_v14, %v5859_v14 }
 0x5b4   :  { %v1127_v33 = vpop.permute.xlu1 %1126  ;;  %v1121_v4 = vpop.permute.xlu0 %1120 }
 0x5b5   :  { %v5867_v28 = vmul.f32 %v1127_v33, %v5787_v50  ;;  %v4562_v26 = vpack.i.bf16 %v1184_v59, %v1183_v17  ;;  %v5870_v54 = vmul.f32 %v1121_v4, %v5779_v11 }
 0x5b7   :  { %4563 = vrot.lane.b32.xlu0 %v4562_v26, %s5145_s10  ;;  %v1182_v56 = vmul.f32 %v5867_v28, %v5867_v28  ;;  %v1179_v11 = vmul.f32 %v5870_v54, %v5870_v54 }
 0x5b8   :  { %v1123_v43 = vpop.permute.xlu1 %1122  ;;  %v1117_v5 = vpop.permute.xlu0 %1116 }
 0x5b9   :  { %v5878_v24 = vmul.f32 %v1123_v43, %v5793_v53  ;;  %v4567_v18 = vpack.i.bf16 %v1182_v56, %v1181_v38  ;;  %v5881_v50 = vmul.f32 %v1117_v5, %v5791_v42 }
 0x5bb   :  { %4568 = vrot.lane.b32.xlu1 %v4567_v18, %s5145_s10  ;;  %v1180_v13 = vmul.f32 %v5878_v24, %v5878_v24  ;;  %v1177_v42 = vmul.f32 %v5881_v50, %v5881_v50 }
 0x5bc   :  { %v1119_v49 = vpop.permute.xlu1 %1118  ;;  %v1113_v47 = vpop.permute.xlu0 %1112 }
 0x5bd   :  { %v5889_v9 = vmul.f32 %v1119_v49, %v5799_v23  ;;  %v4572_v45 = vpack.i.bf16 %v1180_v13, %v1179_v11  ;;  %v5892_v53 = vmul.f32 %v1113_v47, %v5796_v16 }
 0x5bf   :  { %4573 = vrot.lane.b32.xlu0 %v4572_v45, %s5145_s10  ;;  %v1178_v7 = vmul.f32 %v5889_v9, %v5889_v9  ;;  %v1175_v16 = vmul.f32 %v5892_v53, %v5892_v53 }
 0x5c0   :  { %v1115_v61 = vpop.permute.xlu1 %1114  ;;  %v1109_v19 = vpop.permute.xlu0 %1108 }
 0x5c1   :  { %v5900_v46 = vmul.f32 %v1115_v61, %v5805_v8  ;;  %v4577_v44 = vpack.i.bf16 %v1178_v7, %v1177_v42  ;;  %v5903_v23 = vmul.f32 %v1109_v19, %v5803_v30 }
 0x5c3   :  { %4578 = vrot.lane.b32.xlu1 %v4577_v44, %s5145_s10  ;;  %v1176_v52 = vmul.f32 %v5900_v46, %v5900_v46  ;;  %v1173_v30 = vmul.f32 %v5903_v23, %v5903_v23 }
 0x5c4   :  { %v1111_v57 = vpop.permute.xlu1 %1110 }
 0x5c5   :  { %v5913_v8 = vmul.f32 %v1111_v57, %v5811_v29  ;;  %v4582_v62 = vpack.i.bf16 %v1176_v52, %v1175_v16 }
 0x5c7   :  { %4583 = vrot.lane.b32.xlu0 %v4582_v62, %s5145_s10  ;;  %v1174_v51 = vmul.f32 %v5913_v8, %v5913_v8 }
 0x5c9   :  { %v4587_v25 = vpack.i.bf16 %v1174_v51, %v1173_v30 }
 0x5cb   :  { %4588 = vrot.lane.b32.xlu1 %v4587_v25, %s5145_s10 }
 0x621   :  { %v4554_v35 = vpop.permute.xlu0 %4553 }
 0x622   :  { %v4556_v0 = vunpack.i.h.bf16 %v4554_v35  ;;  %v4555_v2 = vunpack.i.l.bf16 %v4554_v35 }
 0x624   :  { %v1268_v20 = vsel %vm507_vm4, %v5835_v21, %v4556_v0  ;;  %v1267_v29 = vsel %vm507_vm4, %v5832_v60, %v4555_v2 }
 0x625   :  { %v4559_v15 = vpop.permute.xlu1 %4558  ;;  %v1277_v48 = vpack.c.bf16 %v1268_v20, %v1267_v29 }
 0x626   :  { %v4561_v36 = vunpack.i.h.bf16 %v4559_v15  ;;  %v4560_v37 = vunpack.i.l.bf16 %v4559_v15 }
 0x627   :  { %4180 = vmatpush3.bf16.msra.mxu0 %v1277_v48 }
 0x628   :  { %v1266_v6 = vsel %vm507_vm4, %v5845_v27, %v4561_v36  ;;  %v1265_v17 = vsel %vm507_vm4, %v5838_v58, %v4560_v37  ;;  %4181 = vmatprep.subr.bf16.mxu0 %v5147_v12  ;;  %v1172_v37 = vld [vmem:[%s7239_s1 + $0xb0] sm:$0xff] }
 0x629   :  { %v4564_v59 = vpop.permute.xlu0 %4563  ;;  %v1276_v33 = vpack.c.bf16 %v1266_v6, %v1265_v17 }
 0x62a   :  { %v4566_v4 = vunpack.i.h.bf16 %v4564_v59  ;;  %v4565_v26 = vunpack.i.l.bf16 %v4564_v59 }
 0x62b   :  { %4182 = vmatpush3.bf16.msra.mxu0 %v1276_v33  ;;  %v1269_v33 = vpack.c.bf16 %v1172_v37, %v1172_v37 }
 0x62c   :  { %v1264_v38 = vsel %vm507_vm4, %v5856_v1, %v4566_v4  ;;  %v1263_v56 = vsel %vm507_vm4, %v5848_v32, %v4565_v26  ;;  %4183 = vmatprep.subr.bf16.mxu0 %v5147_v12 }
 0x62d   :  { %v4569_v43 = vpop.permute.xlu1 %4568  ;;  %v1275_v5 = vpack.c.bf16 %v1264_v38, %v1263_v56 }
 0x62e   :  { %v4571_v18 = vunpack.i.h.bf16 %v4569_v43  ;;  %v4570_v11 = vunpack.i.l.bf16 %v4569_v43 }
 0x62f   :  { %4184 = vmatpush3.bf16.msra.mxu0 %v1275_v5 }
 0x630   :  { %v1262_v13 = vsel %vm507_vm4, %v5867_v28, %v4571_v18  ;;  %v1261_v49 = vsel %vm507_vm4, %v5859_v14, %v4570_v11  ;;  %4185 = vmatprep.subr.bf16.mxu0 %v5147_v12  ;;  %v38_v11 = vld [vmem:[%s7239_s1 + $0xc0] sm:$0xff] }
 0x631   :  { %v4574_v47 = vpop.permute.xlu0 %4573  ;;  %v1274_v45 = vpack.c.bf16 %v1262_v13, %v1261_v49  ;;  %v39_v13 = vld [vmem:[%s7239_s1 + $0xc8] sm:$0xff] }
 0x632   :  { %v4576_v42 = vunpack.i.h.bf16 %v4574_v47  ;;  %v4575_v7 = vunpack.i.l.bf16 %v4574_v47  ;;  %v5972_v49 = vpack.c.bf16 %v39_v13, %v38_v11  ;;  %v5149_v47 = vmov 0  }
 0x633   :  { %4186 = vmatpush3.bf16.msra.mxu0 %v1274_v45  ;;  %4592 = vset.pattern.permute.xlu1 %v5149_v47 }
 0x634   :  { %v1260_v61 = vsel %vm507_vm4, %v5878_v24, %v4576_v42  ;;  %v1259_v19 = vsel %vm507_vm4, %v5870_v54, %v4575_v7  ;;  %4187 = vmatprep.subr.bf16.mxu0 %v5147_v12  ;;  %4594 = vset.pattern.permute.xlu0 %v5149_v47 }
 0x635   :  { %v4579_v44 = vpop.permute.xlu1 %4578  ;;  %v1273_v16 = vpack.c.bf16 %v1260_v61, %v1259_v19 }
 0x636   :  { %v4581_v52 = vunpack.i.h.bf16 %v4579_v44  ;;  %v4580_v57 = vunpack.i.l.bf16 %v4579_v44  ;;  %v5979_v44 = vand.u32 127, %v86_v3  ;;  %v42_v3 = vld [vmem:[%s7239_s1 + $0xe0] sm:$0xff] }
 0x637   :  { %4188 = vmatpush3.bf16.msra.mxu0 %v1273_v16 }
 0x638   :  { %v1258_v62 = vsel %vm507_vm4, %v5889_v9, %v4581_v52  ;;  %v1257_v30 = vsel %vm507_vm4, %v5881_v50, %v4580_v57  ;;  %4189 = vmatprep.subr.bf16.mxu0 %v5147_v12  ;;  %vm1334_vm8 = vcmp.eq.s32.totalorder %v5979_v44, 0 }
 0x639   :  { %v4584_v51 = vpop.permute.xlu0 %4583  ;;  %v1272_v25 = vpack.c.bf16 %v1258_v62, %v1257_v30  ;;  %v40_v30 = vld [vmem:[%s7239_s1 + $0xd0] sm:$0xff] }
 0x63a   :  { %v4586_v35 = vunpack.i.h.bf16 %v4584_v51  ;;  %v4585_v0 = vunpack.i.l.bf16 %v4584_v51  ;;  %v41_v51 = vld [vmem:[%s7239_s1 + $0xd8] sm:$0xff] }
 0x63b   :  { %4190 = vmatpush3.bf16.msra.mxu0 %v1272_v25 }
 0x63c   :  { %v1256_v2 = vsel %vm507_vm4, %v5900_v46, %v4586_v35  ;;  %v1255_v20 = vsel %vm507_vm4, %v5892_v53, %v4585_v0  ;;  %4191 = vmatprep.subr.bf16.mxu0 %v5147_v12  ;;  %v43_v35 = vld [vmem:[%s7239_s1 + $0xe8] sm:$0xff] }
 0x63d   :  { %v4589_v29 = vpop.permute.xlu1 %4588  ;;  %v1271_v15 = vpack.c.bf16 %v1256_v2, %v1255_v20  ;;  %v5998_v2 = vpack.c.bf16 %v41_v51, %v40_v30  ;;  %v6000_v20 = vpack.c.bf16 %v43_v35, %v42_v3 }
 0x63e   :  { %v4591_v48 = vunpack.i.h.bf16 %v4589_v29  ;;  %v4590_v36 = vunpack.i.l.bf16 %v4589_v29  ;;  %v44_v29 = vld [vmem:[%s7239_s1 + $0xf0] sm:$0xff] }
 0x63f   :  { %4192 = vmatpush3.bf16.msra.mxu0 %v1271_v15  ;;  %v45_v15 = vld [vmem:[%s7239_s1 + $0xf8] sm:$0xff] }
 0x640   :  { %v1254_v6 = vsel %vm507_vm4, %v5913_v8, %v4591_v48  ;;  %v1253_v17 = vsel %vm507_vm4, %v5903_v23, %v4590_v36  ;;  %4193 = vmatprep.subr.bf16.mxu0 %v5147_v12  ;;  %v46_v48 = vld [vmem:[%s7239_s1 + $0x100] sm:$0xff]  ;;  %v47_v36 = vld [vmem:[%s7239_s1 + $0x108] sm:$0xff]  ;;  %v6018_v37 = vpack.c.bf16 %v45_v15, %v44_v29 }
 0x641   :  { %v1270_v59 = vpack.c.bf16 %v1254_v6, %v1253_v17  ;;  %v6020_v6 = vpack.c.bf16 %v47_v36, %v46_v48  ;;  %v48_v17 = vld [vmem:[%s7239_s1 + $0x110] sm:$0xff]  ;;  %v1776_v29 = vld [vmem:[%s7240_s2 + $0xe0] sm:$0xff]  ;;  %v1773_v15 = vld [vmem:[%s7240_s2 + $0xc8] sm:$0xff] }
 0x642   :  { %v1774_v36 = vld [vmem:[%s7240_s2 + $0xd0] sm:$0xff] }
 0x643   :  { %4194 = vmatpush3.bf16.msra.mxu0 %v1270_v59  ;;  %v49_v59 = vld [vmem:[%s7239_s1 + $0x118] sm:$0xff] }
 0x646   :  { %4196 = vmatmul.mubr.bf16.vlgmr.msra.gmra.mxu0 %v1269_v33  ;;  %v50_v33 = vld [vmem:[%s7239_s1 + $0x120] sm:$0xff] }
 0x647   :  { %4201 = vmatprep.mubr.msk.bf16.mxu0 %vm201_vm3, %v5972_v49 }
 0x706   :  { %v1312_v4 = vpop.f32.mrf.mxu0 }
 0x707   :  { %1322 = vrot.lane.b32.xlu0 %v1312_v4, %s5145_s10  ;;  %v1318_v26 = vsel %vm507_vm4, %v1312_v4, 0.0  ;;  %v51_v4 = vld [vmem:[%s7239_s1 + $0x128] sm:$0xff] }
 0x708   :  { %1319 = vadd.xlane.f32.xlu1 %v1318_v26  ;;  %v4197_v38 = vpop.f32.mrf.mxu0  ;;  %v6038_v26 = vpack.c.bf16 %v49_v59, %v48_v17  ;;  %v1792_v17 = vpack.c.bf16 %v1774_v36, %v1773_v15  ;;  %v1771_v59 = vld [vmem:[%s7240_s2 + $0xb8] sm:$0xff] }
 0x709   :  { %v6040_v38 = vpack.c.bf16 %v51_v4, %v50_v33  ;;  %v1772_v33 = vld [vmem:[%s7240_s2 + $0xc0] sm:$0xff]  ;;  %v1763_v36 = vld [vmem:[%s7240_s2 + $0x78] sm:$0xff] }
 0x70a   :  { %v1315_v56 = vpop.f32.mrf.mxu0  ;;  %v1791_v4 = vpack.c.bf16 %v1772_v33, %v1771_v59 }
 0x70b   :  { %v52_v56 = vld [vmem:[%s7239_s1 + $0x130] sm:$0xff] }
 0x70c   :  { %v4198_v43 = vpop.f32.mrf.mxu0 }
 0x70d   :  { %v53_v43 = vld [vmem:[%s7239_s1 + $0x138] sm:$0xff] }
 0x779   :  { %v1323_v5 = vpop.permute.xlu0 %1322 }
 0x77a   :  { %v1325_v18 = vsel %vm507_vm4, %v1323_v5, 0.0  ;;  %v6052_v5 = vpack.c.bf16 %v53_v43, %v52_v56  ;;  %v1769_v56 = vld [vmem:[%s7240_s2 + $0xa8] sm:$0xff]  ;;  %v1770_v43 = vld [vmem:[%s7240_s2 + $0xb0] sm:$0xff] }
 0x77b   :  { %1326 = vadd.xlane.f32.xlu0 %v1325_v18 }
 0x791   :  { %v1320_v45 = vpop.xlane.xlu1 %1319 }
 0x792   :  { %v1328_v42 = vmul.f32 %v1320_v45, %v1320_v45  ;;  %v1335_v16 = vsub.f32 0.0, %v1320_v45  ;;  %v5150_v45 = vmov 1  }
 0x804   :  { %v1327_v7 = vpop.xlane.xlu0 %1326 }
 0x805   :  { %v1329_v61 = vsub.f32 %v1327_v7, %v1328_v42 }
 0x807   :  { %v1330_v19 = vadd.f32 1e-05, %v1329_v61 }
 0x809   :  { %4926 = vrsqrt.f32 %v1330_v19 }
 0x816   :  { %v4927_v52 = vpop.eup %4926 }
 0x817   :  { %v1336_v57 = vmul.f32 %v4927_v52, %v1335_v16 }
 0x819   :  { %v1339_v62 = vsel %vm1334_vm8, %v4927_v52, %v1336_v57 }
 0x81a   :  { %v1348_v25 = vpack.c.bf16 %v1339_v62, %v1339_v62 }
 0x81c   :  { %4460 = vmatprep.subr.msk.bf16.mxu0 %vm226_vm1, %v1348_v25  ;;  %v1374_v0 = vsel %vm226_vm1, %v1348_v25, 0 }
 0x81d   :  { %4200 = vmatpush3.bf16.msra.mxu0 %v1374_v0  ;;  %v1775_v0 = vld [vmem:[%s7240_s2 + $0xd8] sm:$0xff] }
 0x81e   :  { %v1793_v48 = vpack.c.bf16 %v1776_v29, %v1775_v0 }
 0x820   :  { %4202 = vmatmul.mubr.msk.bf16.vlgmr.msra.gmra.mxu0 %vm201_vm3, %v5998_v2  ;;  %4217 = vmatprep.subr.bf16.mxu1 %v1793_v48 }
 0x821   :  { %4205 = vmatprep.mubr.msk.bf16.mxu0 %vm201_vm3, %v6000_v20  ;;  %4218 = vmatpush3.bf16.msra.mxu1 %v1793_v48 }
 0x822   :  { %4219 = vmatprep.subr.bf16.mxu1 %v1792_v17 }
 0x825   :  { %4220 = vmatpush3.bf16.msra.mxu1 %v1792_v17  ;;  %v1764_v17 = vld [vmem:[%s7240_s2 + $0x80] sm:$0xff] }
 0x826   :  { %4221 = vmatprep.subr.bf16.mxu1 %v1791_v4 }
 0x828   :  { %4206 = vmatmul.mubr.msk.bf16.gmra.mxu0 %vm201_vm3, %v6018_v37 }
 0x829   :  { %4209 = vmatprep.mubr.msk.bf16.mxu0 %vm201_vm3, %v6020_v6  ;;  %4222 = vmatpush3.bf16.msra.mxu1 %v1791_v4 }
 0x830   :  { %4210 = vmatmul.mubr.msk.bf16.gmra.mxu0 %vm201_vm3, %v6038_v26 }
 0x831   :  { %4213 = vmatprep.mubr.msk.bf16.mxu0 %vm201_vm3, %v6040_v38 }
 0x838   :  { %4214 = vmatmul.mubr.msk.bf16.gmra.mxu0 %vm201_vm3, %v6052_v5 }
 0x8e0   :  { %v4203_v18 = vpop.f32.mrf.mxu0 }
 0x8e1   :  { %1485 = vperm.xlu1 %4592, %v4203_v18  }
 0x8e2   :  { %v1410_v11 = vpop.f32.mrf.mxu0 }
 0x8e3   :  { %1475 = vperm.xlu0 %4594, %v1410_v11  }
 0x8e4   :  { %v4204_v13 = vpop.f32.mrf.mxu0 }
 0x8e5   :  { %4593 = vset.pattern.permute.xlu1 %v5150_v45 }
 0x8e6   :  { %1578 = vperm.xlu1 %4593, %v4203_v18   ;;  %v1413_v42 = vpop.f32.mrf.mxu0  ;;  %v1790_v18 = vpack.c.bf16 %v1770_v43, %v1769_v56  ;;  %v1762_v56 = vld [vmem:[%s7240_s2 + $0x70] sm:$0xff] }
 0x8e7   :  { %4600 = vset.pattern.permute.xlu0 %v5150_v45 }
 0x8e8   :  { %v4207_v7 = vpop.f32.mrf.mxu0  ;;  %4223 = vmatprep.subr.bf16.mxu1 %v1790_v18 }
 0x8e9   :  { %1594 = vperm.xlu0 %4600, %v4207_v7   ;;  %4224 = vmatpush3.bf16.msra.mxu1 %v1790_v18 }
 0x8ea   :  { %1570 = vperm.xlu1 %4593, %v1410_v11   ;;  %v1426_v61 = vpop.f32.mrf.mxu0 }
 0x8ec   :  { %v4208_v19 = vpop.f32.mrf.mxu0 }
 0x8ed   :  { %1586 = vperm.xlu0 %4600, %v1426_v61  }
 0x8ee   :  { %4595 = vset.pattern.permute.xlu1 %v5149_v47  ;;  %v1429_v16 = vpop.f32.mrf.mxu0 }
 0x8ef   :  { %1490 = vperm.xlu1 %4595, %v4204_v13  }
 0x8f0   :  { %v4211_v52 = vpop.f32.mrf.mxu0 }
 0x8f1   :  { %4601 = vset.pattern.permute.xlu0 %v5149_v47 }
 0x8f2   :  { %1510 = vperm.xlu0 %4601, %v4208_v19   ;;  %v1442_v57 = vpop.f32.mrf.mxu0 }
 0x8f3   :  { %4596 = vset.pattern.permute.xlu1 %v5150_v45 }
 0x8f4   :  { %1582 = vperm.xlu1 %4596, %v4204_v13   ;;  %v4212_v62 = vpop.f32.mrf.mxu0 }
 0x8f6   :  { %4606 = vset.pattern.permute.xlu0 %v5150_v45  ;;  %v1445_v30 = vpop.f32.mrf.mxu0 }
 0x8f7   :  { %1610 = vperm.xlu0 %4606, %v4211_v52  }
 0x8f8   :  { %4597 = vset.pattern.permute.xlu1 %v5149_v47  ;;  %v4215_v51 = vpop.f32.mrf.mxu0 }
 0x8f9   :  { %1480 = vperm.xlu1 %4597, %v1413_v42  }
 0x8fa   :  { %v1458_v25 = vpop.f32.mrf.mxu0 }
 0x8fb   :  { %4610 = vset.pattern.permute.xlu0 %v5149_v47 }
 0x8fc   :  { %1520 = vperm.xlu0 %4610, %v1445_v30   ;;  %v4216_v3 = vpop.f32.mrf.mxu0 }
 0x8fd   :  { %4598 = vset.pattern.permute.xlu1 %v5150_v45 }
 0x8fe   :  { %1574 = vperm.xlu1 %4598, %v1413_v42   ;;  %v1461_v35 = vpop.f32.mrf.mxu0 }
 0x900   :  { %1535 = vperm.xlu0 %4610, %v1458_v25  }
 0x902   :  { %4599 = vset.pattern.permute.xlu1 %v5149_v47 }
 0x903   :  { %1505 = vperm.xlu1 %4599, %v4207_v7  }
 0x904   :  { %1540 = vperm.xlu0 %4610, %v1461_v35  }
 0x907   :  { %1495 = vperm.xlu1 %4599, %v1426_v61  }
 0x908   :  { %4614 = vset.pattern.permute.xlu0 %v5150_v45 }
 0x909   :  { %1622 = vperm.xlu0 %4614, %v1461_v35  }
 0x90b   :  { %4602 = vset.pattern.permute.xlu1 %v5150_v45 }
 0x90c   :  { %1598 = vperm.xlu1 %4602, %v4208_v19   ;;  %v1767_v19 = vld [vmem:[%s7240_s2 + $0x98] sm:$0xff] }
 0x90d   :  { %4738 = vset.pattern.permute.xlu0 %v5149_v47 }
 0x910   :  { %4603 = vset.pattern.permute.xlu1 %v5149_v47 }
 0x911   :  { %1500 = vperm.xlu1 %4603, %v1429_v16  }
 0x915   :  { %4604 = vset.pattern.permute.xlu1 %v5150_v45 }
 0x916   :  { %1590 = vperm.xlu1 %4604, %v1429_v16   ;;  %v1768_v16 = vld [vmem:[%s7240_s2 + $0xa0] sm:$0xff] }
 0x91a   :  { %4605 = vset.pattern.permute.xlu1 %v5149_v47 }
 0x91b   :  { %1525 = vperm.xlu1 %4605, %v4211_v52   ;;  %v1789_v52 = vpack.c.bf16 %v1768_v16, %v1767_v19 }
 0x91d   :  { %4225 = vmatprep.subr.bf16.mxu1 %v1789_v52 }
 0x91e   :  { %4226 = vmatpush3.bf16.msra.mxu1 %v1789_v52 }
 0x91f   :  { %1515 = vperm.xlu1 %4605, %v1442_v57  }
 0x923   :  { %4607 = vset.pattern.permute.xlu1 %v5150_v45 }
 0x924   :  { %1602 = vperm.xlu1 %4607, %v1442_v57  }
 0x928   :  { %4608 = vset.pattern.permute.xlu1 %v5149_v47 }
 0x929   :  { %1530 = vperm.xlu1 %4608, %v4212_v62  }
 0x92d   :  { %4609 = vset.pattern.permute.xlu1 %v5150_v45 }
 0x92e   :  { %1614 = vperm.xlu1 %4609, %v4212_v62  }
 0x932   :  { %1606 = vperm.xlu1 %4609, %v1445_v30   ;;  %v1765_v30 = vld [vmem:[%s7240_s2 + $0x88] sm:$0xff] }
 0x936   :  { %4611 = vset.pattern.permute.xlu1 %v5149_v47 }
 0x937   :  { %1545 = vperm.xlu1 %4611, %v4215_v51  }
 0x93b   :  { %4612 = vset.pattern.permute.xlu1 %v5150_v45 }
 0x93c   :  { %1618 = vperm.xlu1 %4612, %v1458_v25  }
 0x940   :  { %4613 = vset.pattern.permute.xlu1 %v5149_v47 }
 0x941   :  { %1550 = vperm.xlu1 %4613, %v4216_v3  }
 0x945   :  { %4615 = vset.pattern.permute.xlu1 %v5150_v45 }
 0x946   :  { %1626 = vperm.xlu1 %4615, %v4215_v51   ;;  %v1766_v51 = vld [vmem:[%s7240_s2 + $0x90] sm:$0xff] }
 0x947   :  { %v1788_v25 = vpack.c.bf16 %v1766_v51, %v1765_v30 }
 0x949   :  { %4227 = vmatprep.subr.bf16.mxu1 %v1788_v25 }
 0x94a   :  { %1630 = vperm.xlu1 %4615, %v4216_v3   ;;  %4228 = vmatpush3.bf16.msra.mxu1 %v1788_v25 }
 0x94e   :  { %4736 = vset.pattern.permute.xlu1 %v5149_v47 }
 0x95c   :  { %v1486_v11 = vpop.permute.xlu1 %1485 }
 0x95d   :  { %v1555_v3 = vmul.f32 %v1486_v11, %v5892_v53 }
 0x95e   :  { %v1476_v57 = vpop.permute.xlu0 %1475 }
 0x95f   :  { %v1553_v35 = vmul.f32 %v1476_v57, %v5903_v23  ;;  %v1787_v23 = vpack.c.bf16 %v1764_v17, %v1763_v36 }
 0x961   :  { %v1579_v13 = vpop.permute.xlu1 %1578  ;;  %4229 = vmatprep.subr.bf16.mxu1 %v1787_v23 }
 0x962   :  { %v6118_v0 = vadd.f32 %v1579_v13, %v1555_v3  ;;  %4230 = vmatpush3.bf16.msra.mxu1 %v1787_v23 }
 0x964   :  { %v1651_v59 = vrot.slane %v6118_v0, 1  ;;  %v1595_v43 = vpop.permute.xlu0 %1594 }
 0x965   :  { %v1571_v42 = vpop.permute.xlu1 %1570 }
 0x966   :  { %v6120_v29 = vadd.f32 %v1571_v42, %v1553_v35 }
 0x968   :  { %v1649_v33 = vrot.slane %v6120_v29, 1  ;;  %v1587_v30 = vpop.permute.xlu0 %1586 }
 0x96a   :  { %v1491_v7 = vpop.permute.xlu1 %1490 }
 0x96b   :  { %v1556_v19 = vmul.f32 %v1491_v7, %v5900_v46 }
 0x96f   :  { %v1583_v61 = vpop.permute.xlu1 %1582 }
 0x970   :  { %v6147_v52 = vadd.f32 %v1583_v61, %v1556_v19 }
 0x972   :  { %v1652_v51 = vrot.slane %v6147_v52, 1 }
 0x974   :  { %v1481_v62 = vpop.permute.xlu1 %1480  ;;  %v1677_v46 = vsel %vm88_vm0, %v1651_v59, %v1652_v51 }
 0x975   :  { %v1554_v15 = vmul.f32 %v1481_v62, %v5913_v8  ;;  %v1761_v8 = vld [vmem:[%s7240_s2 + $0x68] sm:$0xff] }
 0x976   :  { %v1786_v42 = vpack.c.bf16 %v1762_v56, %v1761_v8 }
 0x978   :  { %4231 = vmatprep.subr.bf16.mxu1 %v1786_v42 }
 0x979   :  { %v1575_v48 = vpop.permute.xlu1 %1574  ;;  %4232 = vmatpush3.bf16.msra.mxu1 %v1786_v42 }
 0x97a   :  { %v6129_v53 = vadd.f32 %v1575_v48, %v1554_v15 }
 0x97c   :  { %v1650_v4 = vrot.slane %v6129_v53, 1 }
 0x97e   :  { %v1506_v18 = vpop.permute.xlu1 %1505  ;;  %v1678_v11 = vsel %vm88_vm0, %v1650_v4, %v1651_v59  ;;  %v1679_v13 = vsel %vm88_vm0, %v1649_v33, %v1650_v4 }
 0x97f   :  { %v4616_v16 = vpack.i.bf16 %v1678_v11, %v1679_v13  ;;  %v1559_v15 = vmul.f32 %v1506_v18, %v5870_v54  ;;  %v1511_v18 = vpop.permute.xlu0 %1510 }
 0x981   :  { %4617 = vrot.lane.b32.xlu0 %v4616_v16, %s5145_s10 }
 0x982   :  { %v1496_v57 = vpop.permute.xlu1 %1495 }
 0x983   :  { %v1557_v62 = vmul.f32 %v1496_v57, %v5881_v50  ;;  %v6161_v50 = vadd.f32 %v1595_v43, %v1559_v15 }
 0x985   :  { %v6152_v25 = vadd.f32 %v1587_v30, %v1557_v62  ;;  %v1655_v4 = vrot.slane %v6161_v50, 1  ;;  %v1611_v30 = vpop.permute.xlu0 %1610 }
 0x987   :  { %v1653_v3 = vrot.slane %v6152_v25, 1  ;;  %v1599_v35 = vpop.permute.xlu1 %1598 }
 0x989   :  { %v1676_v7 = vsel %vm88_vm0, %v1652_v51, %v1653_v3 }
 0x98a   :  { %v4621_v61 = vpack.i.bf16 %v1676_v7, %v1677_v46 }
 0x98c   :  { %v1501_v48 = vpop.permute.xlu1 %1500  ;;  %4622 = vrot.lane.b32.xlu1 %v4621_v61, %s5145_s10 }
 0x98d   :  { %v1558_v36 = vmul.f32 %v1501_v48, %v5889_v9  ;;  %v1560_v9 = vmul.f32 %v1511_v18, %v5878_v24 }
 0x98f   :  { %v6174_v13 = vadd.f32 %v1599_v35, %v1560_v9  ;;  %v1521_v35 = vpop.permute.xlu0 %1520 }
 0x990   :  { %v1562_v61 = vmul.f32 %v1521_v35, %v5867_v28 }
 0x991   :  { %v1591_v17 = vpop.permute.xlu1 %1590  ;;  %v1656_v16 = vrot.slane %v6174_v13, 1 }
 0x992   :  { %v6164_v23 = vadd.f32 %v1591_v17, %v1558_v36 }
 0x993   :  { %v1673_v51 = vsel %vm88_vm0, %v1655_v4, %v1656_v16 }
 0x994   :  { %v1654_v59 = vrot.slane %v6164_v23, 1 }
 0x996   :  { %v1526_v8 = vpop.permute.xlu1 %1525  ;;  %v1674_v56 = vsel %vm88_vm0, %v1654_v59, %v1655_v4  ;;  %v1675_v54 = vsel %vm88_vm0, %v1653_v3, %v1654_v59  ;;  %v1536_v59 = vpop.permute.xlu0 %1535 }
 0x997   :  { %v4626_v11 = vpack.i.bf16 %v1674_v56, %v1675_v54 }
 0x999   :  { %4627 = vrot.lane.b32.xlu0 %v4626_v11, %s5145_s10  ;;  %v1565_v11 = vmul.f32 %v1536_v59, %v5838_v58 }
 0x99a   :  { %v1516_v43 = vpop.permute.xlu1 %1515  ;;  %v1541_v9 = vpop.permute.xlu0 %1540 }
 0x99b   :  { %v1561_v42 = vmul.f32 %v1516_v43, %v5859_v14  ;;  %v1563_v14 = vmul.f32 %v1526_v8, %v5848_v32 }
 0x99d   :  { %v6188_v15 = vadd.f32 %v1611_v30, %v1563_v14 }
 0x99f   :  { %v1603_v19 = vpop.permute.xlu1 %1602  ;;  %v1659_v17 = vrot.slane %v6188_v15, 1 }
 0x9a0   :  { %v6178_v57 = vadd.f32 %v1603_v19, %v1561_v42 }
 0x9a2   :  { %v1657_v62 = vrot.slane %v6178_v57, 1 }
 0x9a4   :  { %v1672_v3 = vsel %vm88_vm0, %v1656_v16, %v1657_v62  ;;  %v1531_v24 = vpop.permute.xlu1 %1530 }
 0x9a5   :  { %v4631_v46 = vpack.i.bf16 %v1672_v3, %v1673_v51  ;;  %v1564_v56 = vmul.f32 %v1531_v24, %v5856_v1  ;;  %v1623_v51 = vpop.permute.xlu0 %1622  ;;  %v1566_v24 = vmul.f32 %v1541_v9, %v5845_v27 }
 0x9a7   :  { %4632 = vrot.lane.b32.xlu1 %v4631_v46, %s5145_s10  ;;  %v6213_v58 = vadd.f32 %v1623_v51, %v1566_v24 }
 0x9a9   :  { %v1615_v7 = vpop.permute.xlu1 %1614 }
 0x9aa   :  { %v6199_v18 = vadd.f32 %v1615_v7, %v1564_v56  ;;  %v1662_v7 = vrot.slane %v6213_v58, 1 }
 0x9ac   :  { %v1660_v42 = vrot.slane %v6199_v18, 1 }
 0x9ad   :  { %v1607_v48 = vpop.permute.xlu1 %1606 }
 0x9ae   :  { %v6190_v36 = vadd.f32 %v1607_v48, %v1562_v61  ;;  %v1669_v16 = vsel %vm88_vm0, %v1659_v17, %v1660_v42 }
 0x9b0   :  { %v1658_v4 = vrot.slane %v6190_v36, 1 }
 0x9b2   :  { %v1546_v54 = vpop.permute.xlu1 %1545  ;;  %v1670_v32 = vsel %vm88_vm0, %v1658_v4, %v1659_v17  ;;  %v1671_v8 = vsel %vm88_vm0, %v1657_v62, %v1658_v4 }
 0x9b3   :  { %v4636_v28 = vpack.i.bf16 %v1670_v32, %v1671_v8  ;;  %v1567_v46 = vmul.f32 %v1546_v54, %v5832_v60 }
 0x9b5   :  { %4637 = vrot.lane.b32.xlu0 %v4636_v28, %s5145_s10 }
 0x9b7   :  { %v1619_v43 = vpop.permute.xlu1 %1618 }
 0x9b8   :  { %v6204_v19 = vadd.f32 %v1619_v43, %v1565_v11 }
 0x9ba   :  { %v1661_v1 = vrot.slane %v6204_v19, 1 }
 0x9bc   :  { %v1668_v62 = vsel %vm88_vm0, %v1660_v42, %v1661_v1  ;;  %v1551_v30 = vpop.permute.xlu1 %1550  ;;  %v1667_v59 = vsel %vm88_vm0, %v1661_v1, %v1662_v7 }
 0x9bd   :  { %v4641_v3 = vpack.i.bf16 %v1668_v62, %v1669_v16  ;;  %v1568_v61 = vmul.f32 %v1551_v30, %v5835_v21 }
 0x9bf   :  { %4642 = vrot.lane.b32.xlu1 %v4641_v3, %s5145_s10 }
 0x9c1   :  { %v1627_v14 = vpop.permute.xlu1 %1626 }
 0x9c2   :  { %v6216_v35 = vadd.f32 %v1627_v14, %v1567_v46 }
 0x9c4   :  { %v1663_v48 = vrot.slane %v6216_v35, 1 }
 0x9c5   :  { %v1631_v17 = vpop.permute.xlu1 %1630 }
 0x9c6   :  { %v6221_v4 = vadd.f32 %v1631_v17, %v1568_v61  ;;  %v1666_v27 = vsel %vm88_vm0, %v1662_v7, %v1663_v48 }
 0x9c7   :  { %v4646_v56 = vpack.i.bf16 %v1666_v27, %v1667_v59 }
 0x9c8   :  { %v1664_v60 = vrot.slane %v6221_v4, 1 }
 0x9c9   :  { %4647 = vrot.lane.b32.xlu0 %v4646_v56, %s5145_s10 }
 0x9ca   :  { %v1665_v54 = vsel %vm88_vm0, %v1663_v48, %v1664_v60  ;;  %v1680_v21 = vsel %vm88_vm0, %v1664_v60, %v1649_v33 }
 0x9cb   :  { %v4651_v32 = vpack.i.bf16 %v1680_v21, %v1665_v54 }
 0x9cd   :  { %4652 = vrot.lane.b32.xlu1 %v4651_v32, %s5145_s10 }
 0x9f3   :  { %v4618_v8 = vpop.permute.xlu0 %4617 }
 0x9f4   :  { %v4620_v28 = vunpack.i.h.bf16 %v4618_v8  ;;  %v4619_v11 = vunpack.i.l.bf16 %v4618_v8 }
 0x9f6   :  { %v1745_v9 = vsel %vm507_vm4, %v6120_v29, %v4619_v11  ;;  %v1746_v43 = vsel %vm507_vm4, %v6129_v53, %v4620_v28 }
 0x9f7   :  { %v1778_v42 = vpack.c.bf16 %v1746_v43, %v1745_v9 }
 0x9f9   :  { %4233 = vmatprep.mubr.bf16.mxu1 %v1778_v42 }
 0x9fe   :  { %v4623_v1 = vpop.permute.xlu1 %4622 }
 0x9ff   :  { %v4625_v16 = vunpack.i.h.bf16 %v4623_v1  ;;  %v4624_v62 = vunpack.i.l.bf16 %v4623_v1 }
 0xa01   :  { %v1748_v33 = vsel %vm507_vm4, %v6147_v52, %v4625_v16  ;;  %v1747_v30 = vsel %vm507_vm4, %v6118_v0, %v4624_v62 }
 0xa02   :  { %v1779_v51 = vpack.c.bf16 %v1748_v33, %v1747_v30 }
 0xa04   :  { %4234 = vmatmul.mubr.bf16.vlgmr.msra.gmra.mxu1 %v1779_v51 }
 0xa0b   :  { %v4628_v3 = vpop.permute.xlu0 %4627 }
 0xa0c   :  { %v4630_v24 = vunpack.i.h.bf16 %v4628_v3  ;;  %v4629_v46 = vunpack.i.l.bf16 %v4628_v3 }
 0xa0e   :  { %v1749_v29 = vsel %vm507_vm4, %v6152_v25, %v4629_v46  ;;  %v1750_v53 = vsel %vm507_vm4, %v6164_v23, %v4630_v24 }
 0xa0f   :  { %v1780_v14 = vpack.c.bf16 %v1750_v53, %v1749_v29 }
 0xa11   :  { %4237 = vmatprep.mubr.bf16.mxu1 %v1780_v14 }
 0xa19   :  { %v4633_v7 = vpop.permute.xlu1 %4632 }
 0xa1a   :  { %v4635_v61 = vunpack.i.h.bf16 %v4633_v7  ;;  %v4634_v48 = vunpack.i.l.bf16 %v4633_v7 }
 0xa1c   :  { %v1751_v52 = vsel %vm507_vm4, %v6161_v50, %v4634_v48  ;;  %v1752_v0 = vsel %vm507_vm4, %v6174_v13, %v4635_v61 }
 0xa1d   :  { %v1781_v17 = vpack.c.bf16 %v1752_v0, %v1751_v52 }
 0xa1f   :  { %4238 = vmatmul.mubr.bf16.gmra.mxu1 %v1781_v17 }
 0xa27   :  { %v4638_v27 = vpop.permute.xlu0 %4637 }
 0xa28   :  { %v4640_v59 = vunpack.i.h.bf16 %v4638_v27  ;;  %v4639_v56 = vunpack.i.l.bf16 %v4638_v27 }
 0xa2a   :  { %v1753_v25 = vsel %vm507_vm4, %v6178_v57, %v4639_v56  ;;  %v1754_v23 = vsel %vm507_vm4, %v6190_v36, %v4640_v59 }
 0xa2b   :  { %v1782_v60 = vpack.c.bf16 %v1754_v23, %v1753_v25  ;;  %v2059_v23 = vld [vmem:[%s7240_s2 + $0x108] sm:$0xff] }
 0xa2d   :  { %4241 = vmatprep.mubr.bf16.mxu1 %v1782_v60  ;;  %v2060_v60 = vld [vmem:[%s7240_s2 + $0x110] sm:$0xff] }
 0xa31   :  { %v4643_v54 = vpop.permute.xlu1 %4642 }
 0xa32   :  { %v4645_v21 = vunpack.i.h.bf16 %v4643_v54  ;;  %v4644_v32 = vunpack.i.l.bf16 %v4643_v54 }
 0xa34   :  { %v1755_v50 = vsel %vm507_vm4, %v6188_v15, %v4644_v32  ;;  %v1756_v13 = vsel %vm507_vm4, %v6199_v18, %v4645_v21  ;;  %v2073_v21 = vpack.c.bf16 %v2060_v60, %v2059_v23 }
 0xa35   :  { %v1783_v8 = vpack.c.bf16 %v1756_v13, %v1755_v50 }
 0xa37   :  { %4242 = vmatmul.mubr.bf16.gmra.mxu1 %v1783_v8 }
 0xa3b   :  { %v4648_v28 = vpop.permute.xlu0 %4647 }
 0xa3c   :  { %v4650_v11 = vunpack.i.h.bf16 %v4648_v28  ;;  %v4649_v9 = vunpack.i.l.bf16 %v4648_v28  ;;  %v2057_v28 = vld [vmem:[%s7240_s2 + $0xf8] sm:$0xff] }
 0xa3e   :  { %v1757_v57 = vsel %vm507_vm4, %v6204_v19, %v4649_v9  ;;  %v1758_v36 = vsel %vm507_vm4, %v6213_v58, %v4650_v11  ;;  %v2061_v19 = vld [vmem:[%s7240_s2 + $0x118] sm:$0xff]  ;;  %v2062_v58 = vld [vmem:[%s7240_s2 + $0x120] sm:$0xff] }
 0xa3f   :  { %v4653_v43 = vpop.permute.xlu1 %4652  ;;  %v1784_v42 = vpack.c.bf16 %v1758_v36, %v1757_v57  ;;  %v2074_v33 = vpack.c.bf16 %v2062_v58, %v2061_v19  ;;  %v2058_v11 = vld [vmem:[%s7240_s2 + $0x100] sm:$0xff]  ;;  %v2056_v19 = vld [vmem:[%s7240_s2 + $0xf0] sm:$0xff] }
 0xa40   :  { %v4655_v1 = vunpack.i.h.bf16 %v4653_v43  ;;  %v4654_v16 = vunpack.i.l.bf16 %v4653_v43  ;;  %v2072_v36 = vpack.c.bf16 %v2058_v11, %v2057_v28 }
 0xa41   :  { %4245 = vmatprep.mubr.bf16.mxu1 %v1784_v42  ;;  %4249 = vmatprep.subr.bf16.mxu0 %v2074_v33 }
 0xa42   :  { %v1759_v15 = vsel %vm507_vm4, %v6216_v35, %v4654_v16  ;;  %v1760_v18 = vsel %vm507_vm4, %v6221_v4, %v4655_v1  ;;  %4250 = vmatpush3.bf16.msra.mxu0 %v2074_v33  ;;  %v6278_v35 = vld [vmem:[%s7240_s2 + $0x28a] ss:$0 sm:$0xff] }
 0xa43   :  { %v1785_v62 = vpack.c.bf16 %v1760_v18, %v1759_v15  ;;  %4251 = vmatprep.subr.bf16.mxu0 %v2073_v21 }
 0xa45   :  { %4246 = vmatmul.mubr.bf16.gmra.mxu1 %v1785_v62  ;;  %v2055_v62 = vld [vmem:[%s7240_s2 + $0xe8] sm:$0xff] }
 0xa46   :  { %4289 = vmatprep.mubr.bf16.mxu1 %v5502_v22  ;;  %4252 = vmatpush3.bf16.msra.mxu0 %v2073_v21  ;;  %v2071_v33 = vpack.c.bf16 %v2056_v19, %v2055_v62 }
 0xa47   :  { %4253 = vmatprep.subr.bf16.mxu0 %v2072_v36 }
 0xa4a   :  { %4254 = vmatpush3.bf16.msra.mxu0 %v2072_v36 }
 0xa4b   :  { %4255 = vmatprep.subr.bf16.mxu0 %v2071_v33 }
 0xa4e   :  { %4256 = vmatpush3.bf16.msra.mxu0 %v2071_v33 }
 0xac4   :  { %v4235_v4 = vpop.f32.mrf.mxu1 }
 0xac5   :  { %v6281_v30 = vadd.f32 %v4235_v4, %v6278_v35 }
 0xac6   :  { %v1832_v22 = vpop.f32.mrf.mxu1 }
 0xac7   :  { %v1897_v51 = vsub.f32 0.0, %v6281_v30  ;;  %v6285_v3 = vadd.f32 %v6278_v35, %v1832_v22 }
 0xac8   :  { %v4236_v24 = vpop.f32.mrf.mxu1 }
 0xac9   :  { %v1915_v46 = vmul.f32 1.442695, %v1897_v51  ;;  %v1895_v29 = vsub.f32 0.0, %v6285_v3  ;;  %v6289_v53 = vadd.f32 %v4236_v24, %v6278_v35 }
 0xaca   :  { %v1835_v14 = vpop.f32.mrf.mxu1 }
 0xacb   :  { %v1911_v7 = vmul.f32 1.442695, %v1895_v29  ;;  %v1898_v61 = vsub.f32 0.0, %v6289_v53  ;;  %v6293_v48 = vadd.f32 %v6278_v35, %v1835_v14  ;;  %4928 = vpow2.f32 %v1915_v46 }
 0xacd   :  { %4930 = vpow2.f32 %v1911_v7  ;;  %v1917_v52 = vmul.f32 1.442695, %v1898_v61  ;;  %v1896_v0 = vsub.f32 0.0, %v6293_v48 }
 0xacf   :  { %v1913_v17 = vmul.f32 1.442695, %v1896_v0  ;;  %4932 = vpow2.f32 %v1917_v52 }
 0xad1   :  { %4934 = vpow2.f32 %v1913_v17 }
 0xad8   :  { %v4929_v27 = vpop.eup %4928 }
 0xad9   :  { %v1945_v25 = vadd.f32 1.0, %v4929_v27 }
 0xada   :  { %v4931_v59 = vpop.eup %4930 }
 0xadb   :  { %v1943_v56 = vadd.f32 1.0, %v4931_v59 }
 0xadc   :  { %v4933_v54 = vpop.eup %4932 }
 0xadd   :  { %4936 = vrcp.f32 %v1943_v56  ;;  %v1946_v9 = vadd.f32 1.0, %v4933_v54 }
 0xade   :  { %v4935_v32 = vpop.eup %4934  ;;  %4938 = vrcp.f32 %v1945_v25 }
 0xadf   :  { %v1944_v50 = vadd.f32 1.0, %v4935_v32  ;;  %v4239_v13 = vpop.f32.mrf.mxu1 }
 0xae0   :  { %v6303_v8 = vadd.f32 %v4239_v13, %v6278_v35 }
 0xae1   :  { %4940 = vrcp.f32 %v1944_v50  ;;  %v1848_v57 = vpop.f32.mrf.mxu1 }
 0xae2   :  { %v1901_v43 = vsub.f32 0.0, %v6303_v8  ;;  %v6313_v42 = vadd.f32 %v6278_v35, %v1848_v57  ;;  %4942 = vrcp.f32 %v1946_v9 }
 0xae3   :  { %v4240_v1 = vpop.f32.mrf.mxu1 }
 0xae4   :  { %v1923_v16 = vmul.f32 1.442695, %v1901_v43  ;;  %v1899_v15 = vsub.f32 0.0, %v6313_v42  ;;  %v6317_v18 = vadd.f32 %v4240_v1, %v6278_v35 }
 0xae5   :  { %v1851_v58 = vpop.f32.mrf.mxu1 }
 0xae6   :  { %v1919_v4 = vmul.f32 1.442695, %v1899_v15  ;;  %v1902_v22 = vsub.f32 0.0, %v6317_v18  ;;  %v6327_v51 = vadd.f32 %v6278_v35, %v1851_v58  ;;  %4944 = vpow2.f32 %v1923_v16 }
 0xae8   :  { %4946 = vpow2.f32 %v1919_v4  ;;  %v1925_v24 = vmul.f32 1.442695, %v1902_v22  ;;  %v1900_v46 = vsub.f32 0.0, %v6327_v51 }
 0xaea   :  { %v4937_v29 = vpop.eup %4936  ;;  %v1921_v14 = vmul.f32 1.442695, %v1900_v46  ;;  %4948 = vpow2.f32 %v1925_v24 }
 0xaeb   :  { %1991 = vrot.lane.b32.xlu0 %v4937_v29, %s5145_s10  ;;  %v4939_v7 = vpop.eup %4938 }
 0xaec   :  { %4950 = vpow2.f32 %v1921_v14 }
 0xaee   :  { %v4941_v61 = vpop.eup %4940 }
 0xaef   :  { %1993 = vrot.lane.b32.xlu1 %v4941_v61, %s5145_s10  ;;  %1995 = vrot.lane.b32.xlu0 %v4939_v7, %s5145_s10  ;;  %v4943_v52 = vpop.eup %4942 }
 0xaf3   :  { %1997 = vrot.lane.b32.xlu1 %v4943_v52, %s5145_s10  ;;  %v4945_v0 = vpop.eup %4944 }
 0xaf4   :  { %v1949_v59 = vadd.f32 1.0, %v4945_v0 }
 0xaf5   :  { %v4947_v17 = vpop.eup %4946 }
 0xaf6   :  { %v1947_v27 = vadd.f32 1.0, %v4947_v17 }
 0xaf7   :  { %v4243_v56 = vpop.f32.mrf.mxu1  ;;  %v4949_v25 = vpop.eup %4948 }
 0xaf8   :  { %4952 = vrcp.f32 %v1947_v27  ;;  %v6335_v23 = vadd.f32 %v4243_v56, %v6278_v35  ;;  %v1950_v13 = vadd.f32 1.0, %v4949_v25 }
 0xaf9   :  { %v4951_v60 = vpop.eup %4950  ;;  %v1864_v54 = vpop.f32.mrf.mxu1  ;;  %4954 = vrcp.f32 %v1949_v59 }
 0xafa   :  { %v1948_v21 = vadd.f32 1.0, %v4951_v60  ;;  %v1905_v32 = vsub.f32 0.0, %v6335_v23  ;;  %v6339_v50 = vadd.f32 %v6278_v35, %v1864_v54 }
 0xafb   :  { %v4244_v28 = vpop.f32.mrf.mxu1 }
 0xafc   :  { %4956 = vrcp.f32 %v1948_v21  ;;  %v1931_v11 = vmul.f32 1.442695, %v1905_v32  ;;  %v1903_v9 = vsub.f32 0.0, %v6339_v50  ;;  %v6343_v57 = vadd.f32 %v4244_v28, %v6278_v35 }
 0xafd   :  { %v1867_v36 = vpop.f32.mrf.mxu1 }
 0xafe   :  { %4958 = vpow2.f32 %v1931_v11  ;;  %v1927_v43 = vmul.f32 1.442695, %v1903_v9  ;;  %v1906_v1 = vsub.f32 0.0, %v6343_v57  ;;  %v6347_v16 = vadd.f32 %v6278_v35, %v1867_v36 }
 0xaff   :  { %4960 = vrcp.f32 %v1950_v13 }
 0xb00   :  { %4962 = vpow2.f32 %v1927_v43  ;;  %v1933_v15 = vmul.f32 1.442695, %v1906_v1  ;;  %v1904_v62 = vsub.f32 0.0, %v6347_v16 }
 0xb02   :  { %v1929_v19 = vmul.f32 1.442695, %v1904_v62  ;;  %4964 = vpow2.f32 %v1933_v15 }
 0xb04   :  { %4966 = vpow2.f32 %v1929_v19 }
 0xb05   :  { %v4953_v58 = vpop.eup %4952  ;;  %v4247_v33 = vpop.f32.mrf.mxu1 }
 0xb06   :  { %v6351_v4 = vadd.f32 %v4247_v33, %v6278_v35  ;;  %1999 = vrot.lane.b32.xlu0 %v4953_v58, %s5145_s10  ;;  %v4955_v24 = vpop.eup %4954 }
 0xb07   :  { %v1880_v22 = vpop.f32.mrf.mxu1 }
 0xb08   :  { %v1909_v46 = vsub.f32 0.0, %v6351_v4  ;;  %v6356_v29 = vadd.f32 %v6278_v35, %v1880_v22 }
 0xb09   :  { %v4957_v14 = vpop.eup %4956  ;;  %v4248_v7 = vpop.f32.mrf.mxu1 }
 0xb0a   :  { %v1939_v61 = vmul.f32 1.442695, %v1909_v46  ;;  %v1907_v52 = vsub.f32 0.0, %v6356_v29  ;;  %v6360_v0 = vadd.f32 %v4248_v7, %v6278_v35  ;;  %2001 = vrot.lane.b32.xlu1 %v4957_v14, %s5145_s10  ;;  %2003 = vrot.lane.b32.xlu0 %v4955_v24, %s5145_s10 }
 0xb0b   :  { %v4959_v17 = vpop.eup %4958  ;;  %v1883_v27 = vpop.f32.mrf.mxu1 }
 0xb0c   :  { %v4961_v59 = vpop.eup %4960  ;;  %v1935_v56 = vmul.f32 1.442695, %v1907_v52  ;;  %v1910_v25 = vsub.f32 0.0, %v6360_v0  ;;  %v1953_v54 = vadd.f32 1.0, %v4959_v17  ;;  %v6366_v21 = vadd.f32 %v6278_v35, %v1883_v27 }
 0xb0d   :  { %v4963_v60 = vpop.eup %4962  ;;  %4968 = vpow2.f32 %v1939_v61 }
 0xb0e   :  { %v1951_v32 = vadd.f32 1.0, %v4963_v60  ;;  %v1941_v13 = vmul.f32 1.442695, %v1910_v25  ;;  %2005 = vrot.lane.b32.xlu1 %v4961_v59, %s5145_s10  ;;  %4970 = vpow2.f32 %v1935_v56  ;;  %v1908_v28 = vsub.f32 0.0, %v6366_v21 }
 0xb0f   :  { %v4965_v11 = vpop.eup %4964 }
 0xb10   :  { %4972 = vrcp.f32 %v1951_v32  ;;  %v1937_v36 = vmul.f32 1.442695, %v1908_v28  ;;  %v1954_v1 = vadd.f32 1.0, %v4965_v11 }
 0xb11   :  { %v4967_v9 = vpop.eup %4966  ;;  %4974 = vrcp.f32 %v1953_v54 }
 0xb12   :  { %v1952_v43 = vadd.f32 1.0, %v4967_v9  ;;  %4976 = vpow2.f32 %v1941_v13 }
 0xb13   :  { %4978 = vpow2.f32 %v1937_v36 }
 0xb14   :  { %4980 = vrcp.f32 %v1952_v43 }
 0xb15   :  { %4982 = vrcp.f32 %v1954_v1 }
 0xb1a   :  { %v4969_v35 = vpop.eup %4968 }
 0xb1b   :  { %v4971_v15 = vpop.eup %4970  ;;  %v1957_v33 = vadd.f32 1.0, %v4969_v35 }
 0xb1c   :  { %v1955_v19 = vadd.f32 1.0, %v4971_v15 }
 0xb1d   :  { %v4973_v62 = vpop.eup %4972 }
 0xb1e   :  { %v4975_v58 = vpop.eup %4974  ;;  %2007 = vrot.lane.b32.xlu0 %v4973_v62, %s5145_s10  ;;  %4984 = vrcp.f32 %v1955_v19 }
 0xb1f   :  { %v4977_v22 = vpop.eup %4976  ;;  %4986 = vrcp.f32 %v1957_v33 }
 0xb20   :  { %v4979_v24 = vpop.eup %4978  ;;  %v1958_v7 = vadd.f32 1.0, %v4977_v22 }
 0xb21   :  { %v4981_v46 = vpop.eup %4980  ;;  %v1956_v14 = vadd.f32 1.0, %v4979_v24 }
 0xb22   :  { %2009 = vrot.lane.b32.xlu1 %v4981_v46, %s5145_s10  ;;  %2011 = vrot.lane.b32.xlu0 %v4975_v58, %s5145_s10  ;;  %v4983_v61 = vpop.eup %4982 }
 0xb23   :  { %4988 = vrcp.f32 %v1956_v14 }
 0xb24   :  { %4990 = vrcp.f32 %v1958_v7 }
 0xb26   :  { %2013 = vrot.lane.b32.xlu1 %v4983_v61, %s5145_s10 }
 0xb2b   :  { %v4985_v52 = vpop.eup %4984 }
 0xb2c   :  { %2015 = vrot.lane.b32.xlu0 %v4985_v52, %s5145_s10  ;;  %v4987_v17 = vpop.eup %4986 }
 0xb30   :  { %v4989_v27 = vpop.eup %4988  ;;  %2019 = vrot.lane.b32.xlu0 %v4987_v17, %s5145_s10 }
 0xb31   :  { %2017 = vrot.lane.b32.xlu1 %v4989_v27, %s5145_s10  ;;  %v4991_v59 = vpop.eup %4990 }
 0xb35   :  { %2021 = vrot.lane.b32.xlu1 %v4991_v59, %s5145_s10 }
 0xb5d   :  { %v1992_v56 = vpop.permute.xlu0 %1991 }
 0xb5e   :  { %v2039_v60 = vmul.f32 %v1992_v56, %v6285_v3 }
 0xb61   :  { %v1994_v25 = vpop.permute.xlu1 %1993  ;;  %v1996_v32 = vpop.permute.xlu0 %1995 }
 0xb62   :  { %v2040_v54 = vmul.f32 %v1994_v25, %v6293_v48  ;;  %v2041_v11 = vmul.f32 %v1996_v32, %v6281_v30 }
 0xb64   :  { %v2063_v13 = vpack.c.bf16 %v2040_v54, %v2039_v60 }
 0xb65   :  { %v1998_v28 = vpop.permute.xlu1 %1997 }
 0xb66   :  { %v2042_v9 = vmul.f32 %v1998_v28, %v6289_v53  ;;  %4257 = vmatprep.mubr.msk.bf16.mxu0 %vm507_vm4, %v2063_v13 }
 0xb68   :  { %v2064_v36 = vpack.c.bf16 %v2042_v9, %v2041_v11 }
 0xb6a   :  { %4258 = vmatmul.mubr.msk.bf16.vlgmr.msra.gmra.mxu0 %vm507_vm4, %v2064_v36 }
 0xb78   :  { %v2000_v43 = vpop.permute.xlu0 %1999 }
 0xb79   :  { %v2043_v35 = vmul.f32 %v2000_v43, %v6313_v42 }
 0xb7c   :  { %v2002_v1 = vpop.permute.xlu1 %2001  ;;  %v2004_v15 = vpop.permute.xlu0 %2003 }
 0xb7d   :  { %v2044_v3 = vmul.f32 %v2002_v1, %v6327_v51  ;;  %v2045_v19 = vmul.f32 %v2004_v15, %v6303_v8 }
 0xb7f   :  { %v2065_v48 = vpack.c.bf16 %v2044_v3, %v2043_v35 }
 0xb80   :  { %v2006_v62 = vpop.permute.xlu1 %2005 }
 0xb81   :  { %v2046_v30 = vmul.f32 %v2006_v62, %v6317_v18  ;;  %4261 = vmatprep.mubr.msk.bf16.mxu0 %vm507_vm4, %v2065_v48 }
 0xb83   :  { %v2066_v53 = vpack.c.bf16 %v2046_v30, %v2045_v19 }
 0xb85   :  { %4262 = vmatmul.mubr.msk.bf16.gmra.mxu0 %vm507_vm4, %v2066_v53 }
 0xb90   :  { %v2008_v58 = vpop.permute.xlu0 %2007 }
 0xb91   :  { %v2047_v22 = vmul.f32 %v2008_v58, %v6339_v50  ;;  %v2431_v58 = vld [vmem:[%s7240_s2 + $0x138] sm:$0xff] }
 0xb94   :  { %v2010_v33 = vpop.permute.xlu1 %2009  ;;  %v2012_v24 = vpop.permute.xlu0 %2011 }
 0xb95   :  { %v2048_v42 = vmul.f32 %v2010_v33, %v6347_v16  ;;  %v2049_v14 = vmul.f32 %v2012_v24, %v6335_v23 }
 0xb97   :  { %v2067_v51 = vpack.c.bf16 %v2048_v42, %v2047_v22 }
 0xb98   :  { %v2014_v46 = vpop.permute.xlu1 %2013 }
 0xb99   :  { %v2050_v8 = vmul.f32 %v2014_v46, %v6343_v57  ;;  %4265 = vmatprep.mubr.msk.bf16.mxu0 %vm507_vm4, %v2067_v51 }
 0xb9b   :  { %v2068_v18 = vpack.c.bf16 %v2050_v8, %v2049_v14 }
 0xb9d   :  { %4266 = vmatmul.mubr.msk.bf16.gmra.mxu0 %vm507_vm4, %v2068_v18 }
 0xb9e   :  { %v2016_v7 = vpop.permute.xlu0 %2015 }
 0xb9f   :  { %v2051_v52 = vmul.f32 %v2016_v7, %v6356_v29 }
 0xba2   :  { %v2020_v17 = vpop.permute.xlu0 %2019 }
 0xba3   :  { %v2018_v61 = vpop.permute.xlu1 %2017  ;;  %v2053_v59 = vmul.f32 %v2020_v17, %v6351_v4 }
 0xba4   :  { %v2052_v50 = vmul.f32 %v2018_v61, %v6366_v21 }
 0xba6   :  { %v2069_v16 = vpack.c.bf16 %v2052_v50, %v2051_v52 }
 0xba7   :  { %v2022_v27 = vpop.permute.xlu1 %2021 }
 0xba8   :  { %v2054_v23 = vmul.f32 %v2022_v27, %v6360_v0  ;;  %4269 = vmatprep.mubr.msk.bf16.mxu0 %vm507_vm4, %v2069_v16 }
 0xbaa   :  { %v2070_v57 = vpack.c.bf16 %v2054_v23, %v2053_v59 }
 0xbac   :  { %4270 = vmatmul.mubr.msk.bf16.gmra.mxu0 %vm507_vm4, %v2070_v57 }
 0xc2a   :  { %v4259_v56 = vpop.f32.mrf.mxu0 }
 0xc2c   :  { %v2133_v25 = vpop.f32.mrf.mxu0 }
 0xc2e   :  { %v4260_v60 = vpop.f32.mrf.mxu0 }
 0xc2f   :  { %v2197_v30 = vpack.c.bf16 %v4260_v60, %v4259_v56 }
 0xc30   :  { %v2136_v54 = vpop.f32.mrf.mxu0 }
 0xc31   :  { %v2196_v53 = vpack.c.bf16 %v2136_v54, %v2133_v25 }
 0xc45   :  { %v4263_v32 = vpop.f32.mrf.mxu0 }
 0xc47   :  { %v2149_v29 = vpop.f32.mrf.mxu0 }
 0xc49   :  { %v4264_v13 = vpop.f32.mrf.mxu0 }
 0xc4a   :  { %v2199_v62 = vpack.c.bf16 %v4264_v13, %v4263_v32 }
 0xc4b   :  { %v2152_v21 = vpop.f32.mrf.mxu0 }
 0xc4c   :  { %v2198_v19 = vpack.c.bf16 %v2152_v21, %v2149_v29 }
 0xc5d   :  { %v4267_v28 = vpop.f32.mrf.mxu0 }
 0xc5f   :  { %v2165_v11 = vpop.f32.mrf.mxu0 }
 0xc61   :  { %v4268_v9 = vpop.f32.mrf.mxu0 }
 0xc62   :  { %v2201_v15 = vpack.c.bf16 %v4268_v9, %v4267_v28 }
 0xc63   :  { %v2168_v36 = vpop.f32.mrf.mxu0 }
 0xc64   :  { %v2200_v48 = vpack.c.bf16 %v2168_v36, %v2165_v11 }
 0xc6c   :  { %v4271_v4 = vpop.f32.mrf.mxu0 }
 0xc6e   :  { %v2181_v43 = vpop.f32.mrf.mxu0 }
 0xc70   :  { %v4272_v0 = vpop.f32.mrf.mxu0 }
 0xc71   :  { %v2203_v1 = vpack.c.bf16 %v4272_v0, %v4271_v4 }
 0xc72   :  { %v2184_v35 = vpop.f32.mrf.mxu0 }
 0xc73   :  { %v2202_v3 = vpack.c.bf16 %v2184_v35, %v2181_v43  ;;  %4273 = vmatprep.subr.bf16.mxu1 %v2203_v1 }
 0xc74   :  { %4274 = vmatpush3.bf16.msra.mxu1 %v2203_v1 }
 0xc75   :  { %4275 = vmatprep.subr.bf16.mxu1 %v2202_v3 }
 0xc78   :  { %4276 = vmatpush3.bf16.msra.mxu1 %v2202_v3 }
 0xc79   :  { %4277 = vmatprep.subr.bf16.mxu1 %v2201_v15 }
 0xc7c   :  { %4278 = vmatpush3.bf16.msra.mxu1 %v2201_v15 }
 0xc7d   :  { %4279 = vmatprep.subr.bf16.mxu1 %v2200_v48 }
 0xc80   :  { %4280 = vmatpush3.bf16.msra.mxu1 %v2200_v48 }
 0xc81   :  { %4281 = vmatprep.subr.bf16.mxu1 %v2199_v62 }
 0xc84   :  { %4282 = vmatpush3.bf16.msra.mxu1 %v2199_v62 }
 0xc85   :  { %4283 = vmatprep.subr.bf16.mxu1 %v2198_v19 }
 0xc88   :  { %4284 = vmatpush3.bf16.msra.mxu1 %v2198_v19 }
 0xc89   :  { %4285 = vmatprep.subr.bf16.mxu1 %v2197_v30 }
 0xc8c   :  { %4286 = vmatpush3.bf16.msra.mxu1 %v2197_v30 }
 0xc8d   :  { %4287 = vmatprep.subr.bf16.mxu1 %v2196_v53 }
 0xc90   :  { %4288 = vmatpush3.bf16.msra.mxu1 %v2196_v53 }
 0xc91   :  { %4325 = vmatprep.subr.bf16.mxu1 %v5147_v12 }
 0xc93   :  { %4290 = vmatmul.mubr.bf16.vlgmr.msra.gmra.mxu1 %v5517_v31  ;;  %v2432_v31 = vld [vmem:[%s7240_s2 + $0x140] sm:$0xff] }
 0xc94   :  { %4293 = vmatprep.mubr.bf16.mxu1 %v5519_v34  ;;  %v2429_v34 = vld [vmem:[%s7240_s2 + $0x128] sm:$0xff] }
 0xc9b   :  { %4294 = vmatmul.mubr.bf16.gmra.mxu1 %v5535_v55  ;;  %v2443_v55 = vpack.c.bf16 %v2432_v31, %v2431_v58 }
 0xc9c   :  { %4297 = vmatprep.mubr.bf16.mxu1 %v5537_v63  ;;  %v2430_v63 = vld [vmem:[%s7240_s2 + $0x130] sm:$0xff] }
 0xc9d   :  { %4305 = vmatprep.subr.bf16.mxu0 %v2443_v55 }
 0xc9e   :  { %4306 = vmatpush3.bf16.msra.mxu0 %v2443_v55 }
 0xca3   :  { %4298 = vmatmul.mubr.bf16.gmra.mxu1 %v5553_v39  ;;  %v2442_v39 = vpack.c.bf16 %v2430_v63, %v2429_v34 }
 0xca4   :  { %4301 = vmatprep.mubr.bf16.mxu1 %v5555_v40 }
 0xca5   :  { %4307 = vmatprep.subr.bf16.mxu0 %v2442_v39 }
 0xca6   :  { %4308 = vmatpush3.bf16.msra.mxu0 %v2442_v39 }
 0xcab   :  { %4302 = vmatmul.mubr.bf16.gmra.mxu1 %v5565_v41 }
 0xcac   :  { %4341 = vmatprep.mubr.msk.bf16.mxu1 %vm5148_vm7, %v5147_v12 }
 0xd53   :  { %v6424_v40 = vpop.f32.mrf.mxu1 }
 0xd54   :  { %v2303_v22 = vmax.f32 %v6424_v40, 0.0 }
 0xd55   :  { %v6426_v41 = vpop.f32.mrf.mxu1 }
 0xd56   :  { %v2301_v42 = vmax.f32 %v6426_v41, 0.0  ;;  %v2319_v8 = vrot.slane %v2303_v22, 1 }
 0xd57   :  { %v6428_v33 = vpop.f32.mrf.mxu1 }
 0xd58   :  { %v2304_v51 = vmax.f32 %v6428_v33, 0.0  ;;  %v2317_v18 = vrot.slane %v2301_v42, 1 }
 0xd59   :  { %v6432_v24 = vpop.f32.mrf.mxu1 }
 0xd5a   :  { %v2302_v46 = vmax.f32 %v6432_v24, 0.0  ;;  %v2320_v52 = vrot.slane %v2304_v51, 1 }
 0xd5b   :  { %v6436_v14 = vpop.f32.mrf.mxu1 }
 0xd5c   :  { %v2318_v7 = vrot.slane %v2302_v46, 1  ;;  %v2307_v23 = vmax.f32 %v6436_v14, 0.0  ;;  %v2345_v25 = vsel %vm88_vm0, %v2319_v8, %v2320_v52 }
 0xd5d   :  { %v6444_v61 = vpop.f32.mrf.mxu1 }
 0xd5e   :  { %v2346_v50 = vsel %vm88_vm0, %v2318_v7, %v2319_v8  ;;  %v2347_v17 = vsel %vm88_vm0, %v2317_v18, %v2318_v7  ;;  %v2305_v16 = vmax.f32 %v6444_v61, 0.0  ;;  %v2323_v21 = vrot.slane %v2307_v23, 1 }
 0xd5f   :  { %v6453_v27 = vpop.f32.mrf.mxu1  ;;  %v4656_v59 = vpack.i.bf16 %v2346_v50, %v2347_v17 }
 0xd60   :  { %v2321_v57 = vrot.slane %v2305_v16, 1  ;;  %v2308_v54 = vmax.f32 %v6453_v27, 0.0 }
 0xd61   :  { %4657 = vrot.lane.b32.xlu0 %v4656_v59, %s5146_s23  ;;  %v6459_v56 = vpop.f32.mrf.mxu1 }
 0xd62   :  { %v2344_v60 = vsel %vm88_vm0, %v2320_v52, %v2321_v57  ;;  %v2306_v32 = vmax.f32 %v6459_v56, 0.0  ;;  %v2324_v9 = vrot.slane %v2308_v54, 1 }
 0xd63   :  { %v6467_v29 = vpop.f32.mrf.mxu1  ;;  %v4661_v13 = vpack.i.bf16 %v2344_v60, %v2345_v25 }
 0xd64   :  { %v2322_v28 = vrot.slane %v2306_v32, 1  ;;  %v2311_v35 = vmax.f32 %v6467_v29, 0.0  ;;  %v2341_v62 = vsel %vm88_vm0, %v2323_v21, %v2324_v9 }
 0xd65   :  { %4662 = vrot.lane.b32.xlu1 %v4661_v13, %s5146_s23  ;;  %v6474_v11 = vpop.f32.mrf.mxu1 }
 0xd66   :  { %v2342_v36 = vsel %vm88_vm0, %v2322_v28, %v2323_v21  ;;  %v2343_v4 = vsel %vm88_vm0, %v2321_v57, %v2322_v28  ;;  %v2309_v43 = vmax.f32 %v6474_v11, 0.0  ;;  %v2327_v31 = vrot.slane %v2311_v35, 1 }
 0xd67   :  { %v6483_v0 = vpop.f32.mrf.mxu1  ;;  %v4666_v1 = vpack.i.bf16 %v2342_v36, %v2343_v4 }
 0xd68   :  { %v2325_v3 = vrot.slane %v2309_v43, 1  ;;  %v2312_v15 = vmax.f32 %v6483_v0, 0.0 }
 0xd69   :  { %4667 = vrot.lane.b32.xlu0 %v4666_v1, %s5146_s23  ;;  %v6490_v48 = vpop.f32.mrf.mxu1 }
 0xd6a   :  { %v2340_v19 = vsel %vm88_vm0, %v2324_v9, %v2325_v3  ;;  %v2310_v30 = vmax.f32 %v6490_v48, 0.0  ;;  %v2328_v55 = vrot.slane %v2312_v15, 1 }
 0xd6b   :  { %v6497_v53 = vpop.f32.mrf.mxu1  ;;  %v4671_v58 = vpack.i.bf16 %v2340_v19, %v2341_v62 }
 0xd6c   :  { %v2326_v34 = vrot.slane %v2310_v30, 1  ;;  %v2315_v7 = vmax.f32 %v6497_v53, 0.0  ;;  %v2337_v25 = vsel %vm88_vm0, %v2327_v31, %v2328_v55  ;;  %v3884_v53 = vld [vmem:[%s7240_s2 + $0x28b] ss:$0 sm:$0xff] }
 0xd6d   :  { %4672 = vrot.lane.b32.xlu1 %v4671_v58, %s5146_s23  ;;  %v6506_v63 = vpop.f32.mrf.mxu1 }
 0xd6e   :  { %v2338_v39 = vsel %vm88_vm0, %v2326_v34, %v2327_v31  ;;  %v2339_v8 = vsel %vm88_vm0, %v2325_v3, %v2326_v34  ;;  %v2313_v52 = vmax.f32 %v6506_v63, 0.0  ;;  %v2331_v13 = vrot.slane %v2315_v7, 1 }
 0xd6f   :  { %v6514_v50 = vpop.f32.mrf.mxu1  ;;  %v4676_v17 = vpack.i.bf16 %v2338_v39, %v2339_v8 }
 0xd70   :  { %v2329_v59 = vrot.slane %v2313_v52, 1  ;;  %v2316_v57 = vmax.f32 %v6514_v50, 0.0 }
 0xd71   :  { %4677 = vrot.lane.b32.xlu0 %v4676_v17, %s5146_s23  ;;  %v6522_v60 = vpop.f32.mrf.mxu1 }
 0xd72   :  { %v2336_v21 = vsel %vm88_vm0, %v2328_v55, %v2329_v59  ;;  %v2332_v28 = vrot.slane %v2316_v57, 1  ;;  %v2314_v9 = vmax.f32 %v6522_v60, 0.0 }
 0xd73   :  { %v4681_v36 = vpack.i.bf16 %v2336_v21, %v2337_v25 }
 0xd74   :  { %v2333_v4 = vsel %vm88_vm0, %v2331_v13, %v2332_v28  ;;  %v2348_v1 = vsel %vm88_vm0, %v2332_v28, %v2317_v18  ;;  %v2330_v3 = vrot.slane %v2314_v9, 1 }
 0xd75   :  { %4682 = vrot.lane.b32.xlu1 %v4681_v36, %s5146_s23  ;;  %v4691_v58 = vpack.i.bf16 %v2348_v1, %v2333_v4 }
 0xd76   :  { %v2334_v62 = vsel %vm88_vm0, %v2330_v3, %v2331_v13  ;;  %v2335_v19 = vsel %vm88_vm0, %v2329_v59, %v2330_v3 }
 0xd77   :  { %v4686_v31 = vpack.i.bf16 %v2334_v62, %v2335_v19 }
 0xd79   :  { %4692 = vrot.lane.b32.xlu1 %v4691_v58, %s5146_s23  ;;  %4687 = vrot.lane.b32.xlu0 %v4686_v31, %s5146_s23 }
 0xdd3   :  { %v4658_v34 = vpop.permute.xlu0 %4657 }
 0xdd4   :  { %v4660_v55 = vunpack.i.h.bf16 %v4658_v34  ;;  %v4659_v39 = vunpack.i.l.bf16 %v4658_v34 }
 0xdd6   :  { %v2414_v18 = vsel %vm854_vm5, %v2302_v46, %v4660_v55  ;;  %v2413_v8 = vsel %vm854_vm5, %v2301_v42, %v4659_v39 }
 0xdd7   :  { %v2434_v17 = vpack.c.bf16 %v2414_v18, %v2413_v8  ;;  %v4663_v25 = vpop.permute.xlu1 %4662 }
 0xdd8   :  { %v4665_v59 = vunpack.i.h.bf16 %v4663_v25  ;;  %v4664_v60 = vunpack.i.l.bf16 %v4663_v25 }
 0xdd9   :  { %4309 = vmatprep.mubr.msk.bf16.mxu0 %vm890_vm6, %v2434_v17 }
 0xdda   :  { %v2416_v13 = vsel %vm854_vm5, %v2304_v51, %v4665_v59  ;;  %v2415_v24 = vsel %vm854_vm5, %v2303_v22, %v4664_v60 }
 0xddb   :  { %v2435_v21 = vpack.c.bf16 %v2416_v13, %v2415_v24  ;;  %v4668_v46 = vpop.permute.xlu0 %4667 }
 0xddc   :  { %v4670_v28 = vunpack.i.h.bf16 %v4668_v46  ;;  %v4669_v41 = vunpack.i.l.bf16 %v4668_v46 }
 0xddd   :  { %4310 = vmatmul.mubr.msk.bf16.vlgmr.msra.gmra.mxu0 %vm890_vm6, %v2435_v21 }
 0xdde   :  { %v2418_v42 = vsel %vm854_vm5, %v2306_v32, %v4670_v28  ;;  %v2417_v33 = vsel %vm854_vm5, %v2305_v16, %v4669_v41 }
 0xddf   :  { %v2436_v36 = vpack.c.bf16 %v2418_v42, %v2417_v33  ;;  %v4673_v51 = vpop.permute.xlu1 %4672 }
 0xde0   :  { %v4675_v4 = vunpack.i.h.bf16 %v4673_v51  ;;  %v4674_v40 = vunpack.i.l.bf16 %v4673_v51 }
 0xde1   :  { %4313 = vmatprep.mubr.msk.bf16.mxu0 %vm890_vm6, %v2436_v36 }
 0xde2   :  { %v2420_v22 = vsel %vm854_vm5, %v2308_v54, %v4675_v4  ;;  %v2419_v56 = vsel %vm854_vm5, %v2307_v23, %v4674_v40 }
 0xde3   :  { %v4678_v1 = vpop.permute.xlu0 %4677  ;;  %v2437_v32 = vpack.c.bf16 %v2420_v22, %v2419_v56 }
 0xde4   :  { %v4680_v3 = vunpack.i.h.bf16 %v4678_v1  ;;  %v4679_v61 = vunpack.i.l.bf16 %v4678_v1 }
 0xde5   :  { %4314 = vmatmul.mubr.msk.bf16.gmra.mxu0 %vm890_vm6, %v2437_v32 }
 0xde6   :  { %v2422_v16 = vsel %vm854_vm5, %v2310_v30, %v4680_v3  ;;  %v2421_v27 = vsel %vm854_vm5, %v2309_v43, %v4679_v61 }
 0xde7   :  { %v2438_v62 = vpack.c.bf16 %v2422_v16, %v2421_v27  ;;  %v4683_v54 = vpop.permute.xlu1 %4682 }
 0xde8   :  { %v4685_v19 = vunpack.i.h.bf16 %v4683_v54  ;;  %v4684_v14 = vunpack.i.l.bf16 %v4683_v54 }
 0xde9   :  { %4317 = vmatprep.mubr.msk.bf16.mxu0 %vm890_vm6, %v2438_v62 }
 0xdea   :  { %v2424_v23 = vsel %vm854_vm5, %v2312_v15, %v4685_v19  ;;  %v2423_v48 = vsel %vm854_vm5, %v2311_v35, %v4684_v14 }
 0xdeb   :  { %v2439_v58 = vpack.c.bf16 %v2424_v23, %v2423_v48  ;;  %v4693_v30 = vpop.permute.xlu1 %4692  ;;  %v4688_v31 = vpop.permute.xlu0 %4687 }
 0xdec   :  { %v4695_v11 = vunpack.i.h.bf16 %v4693_v30  ;;  %v4694_v34 = vunpack.i.l.bf16 %v4693_v30  ;;  %v4690_v43 = vunpack.i.h.bf16 %v4688_v31  ;;  %v4689_v55 = vunpack.i.l.bf16 %v4688_v31 }
 0xded   :  { %4318 = vmatmul.mubr.msk.bf16.gmra.mxu0 %vm890_vm6, %v2439_v58 }
 0xdee   :  { %v2426_v39 = vsel %vm854_vm5, %v2314_v9, %v4690_v43  ;;  %v2425_v0 = vsel %vm854_vm5, %v2313_v52, %v4689_v55  ;;  %v2428_v29 = vsel %vm854_vm5, %v2316_v57, %v4695_v11  ;;  %v2427_v35 = vsel %vm854_vm5, %v2315_v7, %v4694_v34 }
 0xdef   :  { %v2440_v15 = vpack.c.bf16 %v2426_v39, %v2425_v0  ;;  %v2441_v18 = vpack.c.bf16 %v2428_v29, %v2427_v35 }
 0xdf1   :  { %4321 = vmatprep.mubr.msk.bf16.mxu0 %vm890_vm6, %v2440_v15 }
 0xdf5   :  { %4322 = vmatmul.mubr.msk.bf16.gmra.mxu0 %vm890_vm6, %v2441_v18 }
 0xe9d   :  { %v4311_v8 = vpop.f32.mrf.mxu0 }
 0xe9e   :  { %v6632_v55 = vadd.f32 %v4311_v8, %v3884_v53 }
 0xe9f   :  { %v2506_v9 = vpop.f32.mrf.mxu0 }
 0xea0   :  { %v2571_v18 = vsub.f32 0.0, %v6632_v55 }
 0xea1   :  { %v4312_v17 = vpop.f32.mrf.mxu0 }
 0xea3   :  { %v6596_v63 = vpop.f32.mrf.mxu0 }
 0xea5   :  { %v4315_v52 = vpop.f32.mrf.mxu0 }
 0xea6   :  { %v6615_v56 = vadd.f32 %v4315_v52, %v3884_v53  ;;  %v6639_v52 = vadd.f32 %v3884_v53, %v2506_v9 }
 0xea7   :  { %v2522_v25 = vpop.f32.mrf.mxu0 }
 0xea8   :  { %v2575_v48 = vsub.f32 0.0, %v6615_v56  ;;  %v6627_v58 = vadd.f32 %v3884_v53, %v2522_v25  ;;  %v6641_v25 = vadd.f32 %v4312_v17, %v3884_v53 }
 0xea9   :  { %v4316_v59 = vpop.f32.mrf.mxu0 }
 0xeaa   :  { %v6629_v30 = vadd.f32 %v4316_v59, %v3884_v53  ;;  %v2573_v39 = vsub.f32 0.0, %v6627_v58  ;;  %v2597_v15 = vmul.f32 1.442695, %v2575_v48 }
 0xeab   :  { %v2525_v50 = vpop.f32.mrf.mxu0 }
 0xeac   :  { %v6635_v0 = vadd.f32 %v3884_v53, %v2525_v50  ;;  %v2576_v29 = vsub.f32 0.0, %v6629_v30  ;;  %v2593_v59 = vmul.f32 1.442695, %v2573_v39 }
 0xead   :  { %v4319_v60 = vpop.f32.mrf.mxu0 }
 0xeae   :  { %v6601_v24 = vadd.f32 %v4319_v60, %v3884_v53  ;;  %v2574_v8 = vsub.f32 0.0, %v6635_v0  ;;  %v2599_v60 = vmul.f32 1.442695, %v2576_v29 }
 0xeaf   :  { %v2538_v57 = vpop.f32.mrf.mxu0 }
 0xeb0   :  { %v2579_v41 = vsub.f32 0.0, %v6601_v24  ;;  %v6606_v42 = vadd.f32 %v3884_v53, %v2538_v57  ;;  %v2589_v57 = vmul.f32 1.442695, %v2571_v18  ;;  %v2595_v9 = vmul.f32 1.442695, %v2574_v8 }
 0xeb1   :  { %v4320_v13 = vpop.f32.mrf.mxu0 }
 0xeb2   :  { %v6609_v36 = vadd.f32 %v4320_v13, %v3884_v53  ;;  %v2605_v3 = vmul.f32 1.442695, %v2579_v41  ;;  %v2577_v61 = vsub.f32 0.0, %v6606_v42  ;;  %v2569_v13 = vsub.f32 0.0, %v6639_v52 }
 0xeb3   :  { %v2541_v7 = vpop.f32.mrf.mxu0 }
 0xeb4   :  { %v2580_v62 = vsub.f32 0.0, %v6609_v36  ;;  %v6623_v54 = vadd.f32 %v3884_v53, %v2541_v7  ;;  %v2601_v31 = vmul.f32 1.442695, %v2577_v61  ;;  %v2572_v7 = vsub.f32 0.0, %v6641_v25 }
 0xeb5   :  { %v4323_v21 = vpop.f32.mrf.mxu0 }
 0xeb6   :  { %v6603_v46 = vadd.f32 %v4323_v21, %v3884_v53  ;;  %v2607_v34 = vmul.f32 1.442695, %v2580_v62  ;;  %v2578_v43 = vsub.f32 0.0, %v6623_v54  ;;  %v6647_v21 = vadd.f32 %v3884_v53, %v6596_v63 }
 0xeb7   :  { %v2554_v28 = vpop.f32.mrf.mxu0 }
 0xeb8   :  { %v2583_v33 = vsub.f32 0.0, %v6603_v46  ;;  %v6611_v51 = vadd.f32 %v3884_v53, %v2554_v28  ;;  %v2603_v35 = vmul.f32 1.442695, %v2578_v43 }
 0xeb9   :  { %v4324_v4 = vpop.f32.mrf.mxu0 }
 0xeba   :  { %v2613_v40 = vmul.f32 1.442695, %v2583_v33  ;;  %v6613_v22 = vadd.f32 %v4324_v4, %v3884_v53  ;;  %v2581_v1 = vsub.f32 0.0, %v6611_v51 }
 0xebb   :  { %v2557_v32 = vpop.f32.mrf.mxu0 }
 0xebc   :  { %v2584_v16 = vsub.f32 0.0, %v6613_v22  ;;  %v6620_v27 = vadd.f32 %v3884_v53, %v2557_v32  ;;  %4992 = vpow2.f32 %v2613_v40  ;;  %v2609_v19 = vmul.f32 1.442695, %v2581_v1 }
 0xebd   :  { %v2585_v40 = vmul.f32 1.442695, %v2569_v13  ;;  %v2591_v1 = vmul.f32 1.442695, %v2572_v7  ;;  %v2570_v32 = vsub.f32 0.0, %v6647_v21 }
 0xebe   :  { %v2615_v14 = vmul.f32 1.442695, %v2584_v16  ;;  %v2582_v23 = vsub.f32 0.0, %v6620_v27  ;;  %4994 = vpow2.f32 %v2609_v19 }
 0xebf   :  { %4996 = vpow2.f32 %v2605_v3  ;;  %v2587_v19 = vmul.f32 1.442695, %v2570_v32 }
 0xec0   :  { %v2611_v11 = vmul.f32 1.442695, %v2582_v23  ;;  %4998 = vpow2.f32 %v2615_v14 }
 0xec2   :  { %5000 = vpow2.f32 %v2611_v11 }
 0xec3   :  { %5002 = vpow2.f32 %v2601_v31 }
 0xec4   :  { %5004 = vpow2.f32 %v2607_v34 }
 0xec5   :  { %5006 = vpow2.f32 %v2597_v15 }
 0xec6   :  { %5008 = vpow2.f32 %v2603_v35 }
 0xec7   :  { %5010 = vpow2.f32 %v2593_v59 }
 0xec8   :  { %5012 = vpow2.f32 %v2599_v60 }
 0xec9   :  { %v4993_v50 = vpop.eup %4992 }
 0xeca   :  { %v2631_v28 = vadd.f32 1.0, %v4993_v50 }
 0xecb   :  { %v4995_v17 = vpop.eup %4994 }
 0xecc   :  { %v4997_v41 = vpop.eup %4996  ;;  %5014 = vrcp.f32 %v2631_v28  ;;  %v2629_v33 = vadd.f32 1.0, %v4995_v17 }
 0xecd   :  { %v4999_v4 = vpop.eup %4998  ;;  %5016 = vpow2.f32 %v2589_v57  ;;  %v2627_v16 = vadd.f32 1.0, %v4997_v41 }
 0xece   :  { %5018 = vpow2.f32 %v2595_v9  ;;  %v2632_v3 = vadd.f32 1.0, %v4999_v4 }
 0xecf   :  { %v5001_v61 = vpop.eup %5000  ;;  %5020 = vrcp.f32 %v2629_v33 }
 0xed0   :  { %v5003_v63 = vpop.eup %5002  ;;  %5022 = vrcp.f32 %v2632_v3  ;;  %v2630_v53 = vadd.f32 1.0, %v5001_v61 }
 0xed1   :  { %v5005_v62 = vpop.eup %5004  ;;  %5024 = vpow2.f32 %v2585_v40  ;;  %v2625_v14 = vadd.f32 1.0, %v5003_v63 }
 0xed2   :  { %5026 = vpow2.f32 %v2591_v1  ;;  %v5007_v23 = vpop.eup %5006  ;;  %v2628_v48 = vadd.f32 1.0, %v5005_v62 }
 0xed3   :  { %5028 = vrcp.f32 %v2627_v16  ;;  %v5009_v31 = vpop.eup %5008  ;;  %v2623_v34 = vadd.f32 1.0, %v5007_v23 }
 0xed4   :  { %5030 = vrcp.f32 %v2630_v53  ;;  %v5011_v11 = vpop.eup %5010  ;;  %v2626_v39 = vadd.f32 1.0, %v5009_v31 }
 0xed5   :  { %5032 = vpow2.f32 %v2587_v19  ;;  %v5013_v43 = vpop.eup %5012  ;;  %v2621_v18 = vadd.f32 1.0, %v5011_v11 }
 0xed6   :  { %5034 = vrcp.f32 %v2625_v14  ;;  %v2624_v8 = vadd.f32 1.0, %v5013_v43 }
 0xed7   :  { %5036 = vrcp.f32 %v2628_v48 }
 0xed8   :  { %5038 = vrcp.f32 %v2623_v34 }
 0xed9   :  { %v5015_v15 = vpop.eup %5014  ;;  %5040 = vrcp.f32 %v2626_v39 }
 0xeda   :  { %v5017_v29 = vpop.eup %5016  ;;  %2693 = vrot.lane.b32.xlu0 %v5015_v15, %s5145_s10  ;;  %5042 = vrcp.f32 %v2621_v18 }
 0xedb   :  { %v5019_v35 = vpop.eup %5018  ;;  %v2619_v13 = vadd.f32 1.0, %v5017_v29  ;;  %5044 = vrcp.f32 %v2624_v8 }
 0xedc   :  { %v5021_v59 = vpop.eup %5020  ;;  %v2622_v9 = vadd.f32 1.0, %v5019_v35 }
 0xedd   :  { %v5023_v60 = vpop.eup %5022  ;;  %5046 = vrcp.f32 %v2619_v13 }
 0xede   :  { %v5025_v50 = vpop.eup %5024  ;;  %2695 = vrot.lane.b32.xlu1 %v5023_v60, %s5145_s10  ;;  %2689 = vrot.lane.b32.xlu0 %v5021_v59, %s5145_s10  ;;  %5048 = vrcp.f32 %v2622_v9 }
 0xedf   :  { %v5027_v57 = vpop.eup %5026  ;;  %v2617_v41 = vadd.f32 1.0, %v5025_v50 }
 0xee0   :  { %v5029_v7 = vpop.eup %5028  ;;  %v2620_v4 = vadd.f32 1.0, %v5027_v57 }
 0xee1   :  { %v5031_v28 = vpop.eup %5030  ;;  %5050 = vrcp.f32 %v2617_v41 }
 0xee2   :  { %2691 = vrot.lane.b32.xlu1 %v5031_v28, %s5145_s10  ;;  %2685 = vrot.lane.b32.xlu0 %v5029_v7, %s5145_s10  ;;  %v5033_v17 = vpop.eup %5032  ;;  %5052 = vrcp.f32 %v2620_v4 }
 0xee3   :  { %v5035_v33 = vpop.eup %5034  ;;  %v2618_v32 = vadd.f32 1.0, %v5033_v17 }
 0xee4   :  { %v5037_v40 = vpop.eup %5036 }
 0xee5   :  { %v5039_v1 = vpop.eup %5038  ;;  %5054 = vrcp.f32 %v2618_v32 }
 0xee6   :  { %2687 = vrot.lane.b32.xlu1 %v5037_v40, %s5145_s10  ;;  %2681 = vrot.lane.b32.xlu0 %v5035_v33, %s5145_s10  ;;  %v5041_v3 = vpop.eup %5040 }
 0xee7   :  { %v5043_v61 = vpop.eup %5042 }
 0xee8   :  { %v5045_v16 = vpop.eup %5044 }
 0xeea   :  { %2683 = vrot.lane.b32.xlu1 %v5041_v3, %s5145_s10  ;;  %2677 = vrot.lane.b32.xlu0 %v5039_v1, %s5145_s10  ;;  %v5047_v63 = vpop.eup %5046 }
 0xeeb   :  { %v5049_v53 = vpop.eup %5048 }
 0xeee   :  { %2679 = vrot.lane.b32.xlu1 %v5045_v16, %s5145_s10  ;;  %2673 = vrot.lane.b32.xlu0 %v5043_v61, %s5145_s10  ;;  %v5051_v62 = vpop.eup %5050 }
 0xeef   :  { %v5053_v19 = vpop.eup %5052 }
 0xef2   :  { %2675 = vrot.lane.b32.xlu1 %v5049_v53, %s5145_s10  ;;  %2669 = vrot.lane.b32.xlu0 %v5047_v63, %s5145_s10  ;;  %v5055_v14 = vpop.eup %5054 }
 0xef6   :  { %2671 = vrot.lane.b32.xlu1 %v5053_v19, %s5145_s10  ;;  %2665 = vrot.lane.b32.xlu0 %v5051_v62, %s5145_s10 }
 0xefa   :  { %2667 = vrot.lane.b32.xlu1 %v5055_v14, %s5145_s10 }
 0xf4c   :  { %v2694_v23 = vpop.permute.xlu0 %2693 }
 0xf4d   :  { %v6667_v48 = vmul.f32 %v2694_v23, %v6603_v46 }
 0xf4f   :  { %v2744_v43 = vmul.f32 %v6667_v48, %v6667_v48 }
 0xf50   :  { %v2696_v31 = vpop.permute.xlu1 %2695  ;;  %v2690_v11 = vpop.permute.xlu0 %2689 }
 0xf51   :  { %v6670_v34 = vmul.f32 %v2696_v31, %v6613_v22  ;;  %v6677_v15 = vmul.f32 %v2690_v11, %v6611_v51 }
 0xf53   :  { %v2745_v39 = vmul.f32 %v6670_v34, %v6670_v34  ;;  %v2742_v59 = vmul.f32 %v6677_v15, %v6677_v15 }
 0xf54   :  { %v2692_v29 = vpop.permute.xlu1 %2691  ;;  %v2686_v35 = vpop.permute.xlu0 %2685 }
 0xf55   :  { %v4696_v18 = vpack.i.bf16 %v2745_v39, %v2744_v43  ;;  %v6680_v46 = vmul.f32 %v2692_v29, %v6620_v27  ;;  %v6687_v8 = vmul.f32 %v2686_v35, %v6601_v24 }
 0xf57   :  { %v2743_v22 = vmul.f32 %v6680_v46, %v6680_v46  ;;  %4697 = vrot.lane.b32.xlu0 %v4696_v18, %s5145_s10  ;;  %v2740_v27 = vmul.f32 %v6687_v8, %v6687_v8 }
 0xf58   :  { %v2688_v60 = vpop.permute.xlu1 %2687  ;;  %v2682_v51 = vpop.permute.xlu0 %2681 }
 0xf59   :  { %v4701_v50 = vpack.i.bf16 %v2743_v22, %v2742_v59  ;;  %v6691_v57 = vmul.f32 %v2688_v60, %v6609_v36  ;;  %v6698_v7 = vmul.f32 %v2682_v51, %v6606_v42 }
 0xf5b   :  { %v2741_v13 = vmul.f32 %v6691_v57, %v6691_v57  ;;  %4702 = vrot.lane.b32.xlu1 %v4701_v50, %s5145_s10  ;;  %v2738_v36 = vmul.f32 %v6698_v7, %v6698_v7 }
 0xf5c   :  { %v2684_v24 = vpop.permute.xlu1 %2683  ;;  %v2678_v9 = vpop.permute.xlu0 %2677 }
 0xf5d   :  { %v4706_v28 = vpack.i.bf16 %v2741_v13, %v2740_v27  ;;  %v6702_v17 = vmul.f32 %v2684_v24, %v6623_v54  ;;  %v6709_v33 = vmul.f32 %v2678_v9, %v6615_v56 }
 0xf5f   :  { %v2739_v41 = vmul.f32 %v6702_v17, %v6702_v17  ;;  %4707 = vrot.lane.b32.xlu0 %v4706_v28, %s5145_s10  ;;  %v2736_v54 = vmul.f32 %v6709_v33, %v6709_v33 }
 0xf60   :  { %v2680_v42 = vpop.permute.xlu1 %2679  ;;  %v2674_v4 = vpop.permute.xlu0 %2673 }
 0xf61   :  { %v4711_v40 = vpack.i.bf16 %v2739_v41, %v2738_v36  ;;  %v6713_v1 = vmul.f32 %v2680_v42, %v6629_v30  ;;  %v6720_v3 = vmul.f32 %v2674_v4, %v6627_v58 }
 0xf63   :  { %v2737_v32 = vmul.f32 %v6713_v1, %v6713_v1  ;;  %4712 = vrot.lane.b32.xlu1 %v4711_v40, %s5145_s10  ;;  %v2734_v30 = vmul.f32 %v6720_v3, %v6720_v3 }
 0xf64   :  { %v2676_v56 = vpop.permute.xlu1 %2675  ;;  %v2670_v61 = vpop.permute.xlu0 %2669 }
 0xf65   :  { %v4716_v16 = vpack.i.bf16 %v2737_v32, %v2736_v54  ;;  %v6724_v63 = vmul.f32 %v2676_v56, %v6635_v0  ;;  %v6731_v62 = vmul.f32 %v2670_v61, %v6632_v55 }
 0xf67   :  { %v2735_v53 = vmul.f32 %v6724_v63, %v6724_v63  ;;  %4717 = vrot.lane.b32.xlu0 %v4716_v16, %s5145_s10  ;;  %v2732_v0 = vmul.f32 %v6731_v62, %v6731_v62 }
 0xf68   :  { %v2672_v58 = vpop.permute.xlu1 %2671  ;;  %v2666_v19 = vpop.permute.xlu0 %2665 }
 0xf69   :  { %v4721_v14 = vpack.i.bf16 %v2735_v53, %v2734_v30  ;;  %v6735_v23 = vmul.f32 %v2672_v58, %v6641_v25  ;;  %v6742_v11 = vmul.f32 %v2666_v19, %v6639_v52 }
 0xf6b   :  { %v2733_v31 = vmul.f32 %v6735_v23, %v6735_v23  ;;  %4722 = vrot.lane.b32.xlu1 %v4721_v14, %s5145_s10  ;;  %v2730_v25 = vmul.f32 %v6742_v11, %v6742_v11 }
 0xf6c   :  { %v2668_v55 = vpop.permute.xlu1 %2667 }
 0xf6d   :  { %v4726_v43 = vpack.i.bf16 %v2733_v31, %v2732_v0  ;;  %v6746_v39 = vmul.f32 %v2668_v55, %v6647_v21 }
 0xf6f   :  { %v2731_v29 = vmul.f32 %v6746_v39, %v6746_v39  ;;  %4727 = vrot.lane.b32.xlu0 %v4726_v43, %s5145_s10 }
 0xf71   :  { %v4731_v35 = vpack.i.bf16 %v2731_v29, %v2730_v25 }
 0xf73   :  { %4732 = vrot.lane.b32.xlu1 %v4731_v35, %s5145_s10 }
 0xfc9   :  { %v4698_v52 = vpop.permute.xlu0 %4697 }
 0xfca   :  { %v4700_v18 = vunpack.i.h.bf16 %v4698_v52  ;;  %v4699_v59 = vunpack.i.l.bf16 %v4698_v52 }
 0xfcc   :  { %v2825_v22 = vsel %vm507_vm4, %v6670_v34, %v4700_v18  ;;  %v2824_v21 = vsel %vm507_vm4, %v6667_v48, %v4699_v59 }
 0xfcd   :  { %v2834_v60 = vpack.c.bf16 %v2825_v22, %v2824_v21  ;;  %v4703_v51 = vpop.permute.xlu1 %4702 }
 0xfce   :  { %v4705_v50 = vunpack.i.h.bf16 %v4703_v51  ;;  %v4704_v27 = vunpack.i.l.bf16 %v4703_v51 }
 0xfcf   :  { %4326 = vmatpush3.bf16.msra.mxu1 %v2834_v60 }
 0xfd0   :  { %v2823_v13 = vsel %vm507_vm4, %v6680_v46, %v4705_v50  ;;  %v2822_v24 = vsel %vm507_vm4, %v6677_v15, %v4704_v27  ;;  %4327 = vmatprep.subr.bf16.mxu1 %v5147_v12 }
 0xfd1   :  { %v2833_v9 = vpack.c.bf16 %v2823_v13, %v2822_v24  ;;  %v4708_v28 = vpop.permute.xlu0 %4707  ;;  %v2729_v24 = vld [vmem:[%s7239_s1 + $0xb8] sm:$0xff] }
 0xfd2   :  { %v4710_v36 = vunpack.i.h.bf16 %v4708_v28  ;;  %v4709_v41 = vunpack.i.l.bf16 %v4708_v28 }
 0xfd3   :  { %4328 = vmatpush3.bf16.msra.mxu1 %v2833_v9 }
 0xfd4   :  { %v2821_v42 = vsel %vm507_vm4, %v6691_v57, %v4710_v36  ;;  %v2820_v4 = vsel %vm507_vm4, %v6687_v8, %v4709_v41  ;;  %4329 = vmatprep.subr.bf16.mxu1 %v5147_v12  ;;  %v2826_v41 = vpack.c.bf16 %v2729_v24, %v2729_v24  ;;  %v3292_v24 = vld [vmem:[%s7240_s2 + $0x1a0] sm:$0xff] }
 0xfd5   :  { %v2832_v40 = vpack.c.bf16 %v2821_v42, %v2820_v4  ;;  %v4713_v54 = vpop.permute.xlu1 %4712 }
 0xfd6   :  { %v4715_v32 = vunpack.i.h.bf16 %v4713_v54  ;;  %v4714_v56 = vunpack.i.l.bf16 %v4713_v54 }
 0xfd7   :  { %4330 = vmatpush3.bf16.msra.mxu1 %v2832_v40 }
 0xfd8   :  { %v2819_v61 = vsel %vm507_vm4, %v6702_v17, %v4715_v32  ;;  %v2818_v16 = vsel %vm507_vm4, %v6698_v7, %v4714_v56  ;;  %4331 = vmatprep.subr.bf16.mxu1 %v5147_v12 }
 0xfd9   :  { %v2831_v30 = vpack.c.bf16 %v2819_v61, %v2818_v16  ;;  %v4718_v53 = vpop.permute.xlu0 %4717 }
 0xfda   :  { %v4720_v58 = vunpack.i.h.bf16 %v4718_v53  ;;  %v4719_v19 = vunpack.i.l.bf16 %v4718_v53 }
 0xfdb   :  { %4332 = vmatpush3.bf16.msra.mxu1 %v2831_v30 }
 0xfdc   :  { %v2817_v14 = vsel %vm507_vm4, %v6713_v1, %v4720_v58  ;;  %v2816_v0 = vsel %vm507_vm4, %v6709_v33, %v4719_v19  ;;  %4333 = vmatprep.subr.bf16.mxu1 %v5147_v12 }
 0xfdd   :  { %v2830_v31 = vpack.c.bf16 %v2817_v14, %v2816_v0  ;;  %v4723_v55 = vpop.permute.xlu1 %4722 }
 0xfde   :  { %v4725_v43 = vunpack.i.h.bf16 %v4723_v55  ;;  %v4724_v25 = vunpack.i.l.bf16 %v4723_v55 }
 0xfdf   :  { %4334 = vmatpush3.bf16.msra.mxu1 %v2830_v31 }
 0xfe0   :  { %v2815_v29 = vsel %vm507_vm4, %v6724_v63, %v4725_v43  ;;  %v2814_v35 = vsel %vm507_vm4, %v6720_v3, %v4724_v25  ;;  %4335 = vmatprep.subr.bf16.mxu1 %v5147_v12 }
 0xfe1   :  { %v2829_v52 = vpack.c.bf16 %v2815_v29, %v2814_v35  ;;  %v4728_v18 = vpop.permute.xlu0 %4727 }
 0xfe2   :  { %v4730_v59 = vunpack.i.h.bf16 %v4728_v18  ;;  %v4729_v22 = vunpack.i.l.bf16 %v4728_v18 }
 0xfe3   :  { %4336 = vmatpush3.bf16.msra.mxu1 %v2829_v52 }
 0xfe4   :  { %v2813_v21 = vsel %vm507_vm4, %v6735_v23, %v4730_v59  ;;  %v2812_v60 = vsel %vm507_vm4, %v6731_v62, %v4729_v22  ;;  %4337 = vmatprep.subr.bf16.mxu1 %v5147_v12 }
 0xfe5   :  { %v2828_v51 = vpack.c.bf16 %v2813_v21, %v2812_v60  ;;  %v4733_v50 = vpop.permute.xlu1 %4732  ;;  %v3295_v60 = vld [vmem:[%s7240_s2 + $0x1b8] sm:$0xff] }
 0xfe6   :  { %v4735_v27 = vunpack.i.h.bf16 %v4733_v50  ;;  %v4734_v13 = vunpack.i.l.bf16 %v4733_v50 }
 0xfe7   :  { %4338 = vmatpush3.bf16.msra.mxu1 %v2828_v51  ;;  %v3296_v51 = vld [vmem:[%s7240_s2 + $0x1c0] sm:$0xff] }
 0xfe8   :  { %v2811_v9 = vsel %vm507_vm4, %v6746_v39, %v4735_v27  ;;  %v2810_v28 = vsel %vm507_vm4, %v6742_v11, %v4734_v13  ;;  %4339 = vmatprep.subr.bf16.mxu1 %v5147_v12  ;;  %v3313_v50 = vpack.c.bf16 %v3296_v51, %v3295_v60  ;;  %v3294_v27 = vld [vmem:[%s7240_s2 + $0x1b0] sm:$0xff]  ;;  %v3291_v13 = vld [vmem:[%s7240_s2 + $0x198] sm:$0xff] }
 0xfe9   :  { %v2827_v36 = vpack.c.bf16 %v2811_v9, %v2810_v28  ;;  %v3311_v9 = vpack.c.bf16 %v3292_v24, %v3291_v13  ;;  %v3289_v28 = vld [vmem:[%s7240_s2 + $0x188] sm:$0xff] }
 0xfea   :  { %4363 = vmatprep.subr.bf16.mxu0 %v3313_v50 }
 0xfeb   :  { %4340 = vmatpush3.bf16.msra.mxu1 %v2827_v36  ;;  %4364 = vmatpush3.bf16.msra.mxu0 %v3313_v50  ;;  %v3290_v36 = vld [vmem:[%s7240_s2 + $0x190] sm:$0xff] }
 0xfee   :  { %4342 = vmatmul.mubr.bf16.vlgmr.msra.gmra.mxu1 %v2826_v41  ;;  %v3310_v41 = vpack.c.bf16 %v3290_v36, %v3289_v28 }
 0xfef   :  { %4347 = vmatprep.mubr.msk.bf16.mxu1 %vm201_vm3, %v5972_v49 }
0x10ae   :  { %v2869_v42 = vpop.f32.mrf.mxu1 }
0x10af   :  { %2879 = vrot.lane.b32.xlu0 %v2869_v42, %s5145_s10  ;;  %v2875_v4 = vsel %vm507_vm4, %v2869_v42, 0.0 }
0x10b0   :  { %2876 = vadd.xlane.f32.xlu1 %v2875_v4  ;;  %v4343_v40 = vpop.f32.mrf.mxu1 }
0x10b2   :  { %v2872_v54 = vpop.f32.mrf.mxu1 }
0x10b4   :  { %v4344_v32 = vpop.f32.mrf.mxu1 }
0x1121   :  { %v2880_v56 = vpop.permute.xlu0 %2879 }
0x1122   :  { %v2882_v61 = vsel %vm507_vm4, %v2880_v56, 0.0 }
0x1123   :  { %2883 = vadd.xlane.f32.xlu0 %v2882_v61  ;;  %v3287_v61 = vld [vmem:[%s7240_s2 + $0x178] sm:$0xff] }
0x1139   :  { %v2877_v16 = vpop.xlane.xlu1 %2876 }
0x113a   :  { %v2885_v30 = vmul.f32 %v2877_v16, %v2877_v16  ;;  %v2889_v49 = vsub.f32 0.0, %v2877_v16  ;;  %v3288_v16 = vld [vmem:[%s7240_s2 + $0x180] sm:$0xff] }
0x11ac   :  { %v2884_v53 = vpop.xlane.xlu0 %2883 }
0x11ad   :  { %v2886_v58 = vsub.f32 %v2884_v53, %v2885_v30  ;;  %v3309_v30 = vpack.c.bf16 %v3288_v16, %v3287_v61 }
0x11af   :  { %v2887_v19 = vadd.f32 1e-05, %v2886_v58 }
0x11b1   :  { %5056 = vrsqrt.f32 %v2887_v19 }
0x11be   :  { %v5057_v14 = vpop.eup %5056 }
0x11bf   :  { %v2890_v0 = vmul.f32 %v5057_v14, %v2889_v49 }
0x11c1   :  { %v2891_v31 = vsel %vm1334_vm8, %v5057_v14, %v2890_v0  ;;  %v3285_v0 = vld [vmem:[%s7240_s2 + $0x168] sm:$0xff] }
0x11c2   :  { %v2892_v55 = vpack.c.bf16 %v2891_v31, %v2891_v31  ;;  %v3286_v31 = vld [vmem:[%s7240_s2 + $0x170] sm:$0xff] }
0x11c4   :  { %4461 = vmatprep.subr.msk.bf16.mxu1 %vm226_vm1, %v2892_v55  ;;  %v2894_v43 = vsel %vm226_vm1, %v2892_v55, 0 }
0x11c5   :  { %4346 = vmatpush3.bf16.msra.mxu1 %v2894_v43  ;;  %v3284_v43 = vld [vmem:[%s7240_s2 + $0x160] sm:$0xff] }
0x11c6   :  { %4395 = vmatprep.subr.bf16.mxu1 %v5147_v12 }
0x11c8   :  { %4348 = vmatmul.mubr.msk.bf16.vlgmr.msra.gmra.mxu1 %vm201_vm3, %v5998_v2 }
0x11c9   :  { %4351 = vmatprep.mubr.msk.bf16.mxu1 %vm201_vm3, %v6000_v20 }
0x11d0   :  { %4352 = vmatmul.mubr.msk.bf16.gmra.mxu1 %vm201_vm3, %v6018_v37 }
0x11d1   :  { %4355 = vmatprep.mubr.msk.bf16.mxu1 %vm201_vm3, %v6020_v6 }
0x11d8   :  { %4356 = vmatmul.mubr.msk.bf16.gmra.mxu1 %vm201_vm3, %v6038_v26 }
0x11d9   :  { %4359 = vmatprep.mubr.msk.bf16.mxu1 %vm201_vm3, %v6040_v38 }
0x11e0   :  { %4360 = vmatmul.mubr.msk.bf16.gmra.mxu1 %vm201_vm3, %v6052_v5 }
0x11e1   :  { %4411 = vmatprep.mubr.msk.bf16.mxu1 %vm5148_vm7, %v5147_v12 }
0x1288   :  { %v4349_v44 = vpop.f32.mrf.mxu1 }
0x1289   :  { %3005 = vperm.xlu1 %4736, %v4349_v44  }
0x128a   :  { %v2930_v2 = vpop.f32.mrf.mxu1 }
0x128b   :  { %2995 = vperm.xlu0 %4738, %v2930_v2  }
0x128c   :  { %v4350_v20 = vpop.f32.mrf.mxu1 }
0x128d   :  { %4737 = vset.pattern.permute.xlu1 %v5150_v45 }
0x128e   :  { %3098 = vperm.xlu1 %4737, %v4349_v44   ;;  %v2933_v37 = vpop.f32.mrf.mxu1 }
0x128f   :  { %4740 = vset.pattern.permute.xlu0 %v5150_v45 }
0x1290   :  { %3102 = vperm.xlu0 %4740, %v4350_v20   ;;  %v4353_v6 = vpop.f32.mrf.mxu1 }
0x1292   :  { %3090 = vperm.xlu1 %4737, %v2930_v2   ;;  %v2946_v26 = vpop.f32.mrf.mxu1 }
0x1294   :  { %4742 = vset.pattern.permute.xlu0 %v5149_v47  ;;  %v4354_v38 = vpop.f32.mrf.mxu1 }
0x1295   :  { %3025 = vperm.xlu0 %4742, %v4353_v6  }
0x1296   :  { %4739 = vset.pattern.permute.xlu1 %v5149_v47  ;;  %v2949_v5 = vpop.f32.mrf.mxu1 }
0x1297   :  { %3010 = vperm.xlu1 %4739, %v4350_v20  }
0x1298   :  { %v4357_v25 = vpop.f32.mrf.mxu1 }
0x1299   :  { %4748 = vset.pattern.permute.xlu0 %v5150_v45 }
0x129a   :  { %3110 = vperm.xlu0 %4748, %v2949_v5   ;;  %v2962_v29 = vpop.f32.mrf.mxu1 }
0x129b   :  { %3000 = vperm.xlu1 %4739, %v2933_v37  }
0x129c   :  { %v4358_v35 = vpop.f32.mrf.mxu1 }
0x129e   :  { %4749 = vset.pattern.permute.xlu0 %v5149_v47  ;;  %v2965_v52 = vpop.f32.mrf.mxu1 }
0x129f   :  { %4741 = vset.pattern.permute.xlu1 %v5150_v45  ;;  %3045 = vperm.xlu0 %4749, %v4357_v25  }
0x12a0   :  { %3094 = vperm.xlu1 %4741, %v2933_v37   ;;  %v4361_v18 = vpop.f32.mrf.mxu1 }
0x12a2   :  { %v2978_v59 = vpop.f32.mrf.mxu1 }
0x12a3   :  { %4752 = vset.pattern.permute.xlu0 %v5150_v45 }
0x12a4   :  { %3114 = vperm.xlu1 %4741, %v4353_v6   ;;  %3122 = vperm.xlu0 %4752, %v2962_v29   ;;  %v4362_v22 = vpop.f32.mrf.mxu1 }
0x12a6   :  { %v2981_v21 = vpop.f32.mrf.mxu1 }
0x12a8   :  { %4743 = vset.pattern.permute.xlu1 %v5149_v47  ;;  %3126 = vperm.xlu0 %4752, %v2965_v52  }
0x12a9   :  { %3015 = vperm.xlu1 %4743, %v2946_v26  }
0x12ac   :  { %3138 = vperm.xlu0 %4752, %v2978_v59  }
0x12ad   :  { %4744 = vset.pattern.permute.xlu1 %v5150_v45 }
0x12ae   :  { %3106 = vperm.xlu1 %4744, %v2946_v26  }
0x12b0   :  { %4755 = vset.pattern.permute.xlu0 %v5149_v47 }
0x12b1   :  { %3065 = vperm.xlu0 %4755, %v4361_v18  }
0x12b2   :  { %4745 = vset.pattern.permute.xlu1 %v5149_v47 }
0x12b3   :  { %3030 = vperm.xlu1 %4745, %v4354_v38  }
0x12b5   :  { %4756 = vset.pattern.permute.xlu0 %v5150_v45 }
0x12b6   :  { %3146 = vperm.xlu0 %4756, %v4361_v18  }
0x12b7   :  { %4746 = vset.pattern.permute.xlu1 %v5150_v45 }
0x12b8   :  { %3118 = vperm.xlu1 %4746, %v4354_v38  }
0x12bc   :  { %4747 = vset.pattern.permute.xlu1 %v5149_v47 }
0x12bd   :  { %3020 = vperm.xlu1 %4747, %v2949_v5  }
0x12c1   :  { %4750 = vset.pattern.permute.xlu1 %v5150_v45 }
0x12c2   :  { %3130 = vperm.xlu1 %4750, %v4357_v25  }
0x12c6   :  { %4751 = vset.pattern.permute.xlu1 %v5149_v47 }
0x12c7   :  { %3035 = vperm.xlu1 %4751, %v2962_v29   ;;  %v3281_v29 = vld [vmem:[%s7240_s2 + $0x148] sm:$0xff] }
0x12cb   :  { %3050 = vperm.xlu1 %4751, %v4358_v35  }
0x12cf   :  { %4753 = vset.pattern.permute.xlu1 %v5150_v45 }
0x12d0   :  { %3134 = vperm.xlu1 %4753, %v4358_v35   ;;  %v3282_v35 = vld [vmem:[%s7240_s2 + $0x150] sm:$0xff] }
0x12d4   :  { %4754 = vset.pattern.permute.xlu1 %v5149_v47  ;;  %v3293_v47 = vld [vmem:[%s7240_s2 + $0x1a8] sm:$0xff] }
0x12d5   :  { %3040 = vperm.xlu1 %4754, %v2965_v52   ;;  %v3306_v52 = vpack.c.bf16 %v3282_v35, %v3281_v29 }
0x12d9   :  { %3055 = vperm.xlu1 %4754, %v2978_v59  }
0x12dd   :  { %3070 = vperm.xlu1 %4754, %v4362_v22  }
0x12e1   :  { %3060 = vperm.xlu1 %4754, %v2981_v21  }
0x12e5   :  { %4757 = vset.pattern.permute.xlu1 %v5150_v45  ;;  %v3312_v45 = vpack.c.bf16 %v3294_v27, %v3293_v47 }
0x12e6   :  { %3142 = vperm.xlu1 %4757, %v2981_v21  }
0x12e7   :  { %4365 = vmatprep.subr.bf16.mxu0 %v3312_v45 }
0x12e8   :  { %4366 = vmatpush3.bf16.msra.mxu0 %v3312_v45 }
0x12e9   :  { %4367 = vmatprep.subr.bf16.mxu0 %v3311_v9 }
0x12ea   :  { %3150 = vperm.xlu1 %4757, %v4362_v22  }
0x12ec   :  { %4368 = vmatpush3.bf16.msra.mxu0 %v3311_v9 }
0x12ed   :  { %4369 = vmatprep.subr.bf16.mxu0 %v3310_v41 }
0x12f0   :  { %4370 = vmatpush3.bf16.msra.mxu0 %v3310_v41 }
0x12f1   :  { %4371 = vmatprep.subr.bf16.mxu0 %v3309_v30 }
0x12f4   :  { %4372 = vmatpush3.bf16.msra.mxu0 %v3309_v30 }
0x1304   :  { %v3006_v42 = vpop.permute.xlu1 %3005 }
0x1305   :  { %v3075_v53 = vmul.f32 %v3006_v42, %v6731_v62  ;;  %v3308_v62 = vpack.c.bf16 %v3286_v31, %v3285_v0 }
0x1306   :  { %v2996_v32 = vpop.permute.xlu0 %2995 }
0x1307   :  { %v3073_v58 = vmul.f32 %v2996_v32, %v6742_v11  ;;  %v3283_v11 = vld [vmem:[%s7240_s2 + $0x158] sm:$0xff]  ;;  %4373 = vmatprep.subr.bf16.mxu0 %v3308_v62 }
0x1308   :  { %v3307_v44 = vpack.c.bf16 %v3284_v43, %v3283_v11  ;;  %4374 = vmatpush3.bf16.msra.mxu0 %v3308_v62 }
0x1309   :  { %v3099_v4 = vpop.permute.xlu1 %3098 }
0x130a   :  { %v6874_v19 = vadd.f32 %v3099_v4, %v3075_v53  ;;  %4375 = vmatprep.subr.bf16.mxu0 %v3307_v44 }
0x130b   :  { %v3103_v59 = vpop.permute.xlu0 %3102 }
0x130c   :  { %v3171_v2 = vrot.slane %v6874_v19, 1  ;;  %4376 = vmatpush3.bf16.msra.mxu0 %v3307_v44 }
0x130d   :  { %v3091_v40 = vpop.permute.xlu1 %3090  ;;  %4377 = vmatprep.subr.bf16.mxu0 %v3306_v52 }
0x130e   :  { %v6876_v49 = vadd.f32 %v3091_v40, %v3073_v58 }
0x1310   :  { %v3169_v20 = vrot.slane %v6876_v49, 1  ;;  %4378 = vmatpush3.bf16.msra.mxu0 %v3306_v52  ;;  %v3026_v9 = vpop.permute.xlu0 %3025 }
0x1311   :  { %4423 = vmatprep.subr.bf16.mxu0 %v5147_v12 }
0x1312   :  { %v3011_v54 = vpop.permute.xlu1 %3010 }
0x1313   :  { %v3076_v25 = vmul.f32 %v3011_v54, %v6735_v23 }
0x1315   :  { %v6910_v22 = vadd.f32 %v3103_v59, %v3076_v25  ;;  %v3111_v42 = vpop.permute.xlu0 %3110 }
0x1316   :  { %v3001_v56 = vpop.permute.xlu1 %3000 }
0x1317   :  { %v3074_v14 = vmul.f32 %v3001_v56, %v6746_v39  ;;  %v3172_v60 = vrot.slane %v6910_v22, 1 }
0x1319   :  { %v3197_v45 = vsel %vm88_vm0, %v3171_v2, %v3172_v60 }
0x131a   :  { %v3046_v16 = vpop.permute.xlu0 %3045 }
0x131b   :  { %v3095_v55 = vpop.permute.xlu1 %3094 }
0x131c   :  { %v6891_v39 = vadd.f32 %v3095_v55, %v3074_v14 }
0x131e   :  { %v3170_v37 = vrot.slane %v6891_v39, 1 }
0x131f   :  { %v3115_v6 = vpop.permute.xlu1 %3114  ;;  %v3123_v14 = vpop.permute.xlu0 %3122 }
0x1320   :  { %v3198_v26 = vsel %vm88_vm0, %v3170_v37, %v3171_v2  ;;  %v3199_v38 = vsel %vm88_vm0, %v3169_v20, %v3170_v37 }
0x1321   :  { %v4758_v5 = vpack.i.bf16 %v3198_v26, %v3199_v38 }
0x1323   :  { %4759 = vrot.lane.b32.xlu1 %v4758_v5, %s5145_s10  ;;  %v3127_v44 = vpop.permute.xlu0 %3126 }
0x1324   :  { %v3016_v18 = vpop.permute.xlu1 %3015 }
0x1325   :  { %v3077_v23 = vmul.f32 %v3016_v18, %v6720_v3  ;;  %v3079_v3 = vmul.f32 %v3026_v9, %v6709_v33 }
0x1327   :  { %v6924_v36 = vadd.f32 %v3115_v6, %v3079_v3  ;;  %v3139_v6 = vpop.permute.xlu0 %3138 }
0x1329   :  { %v3107_v21 = vpop.permute.xlu1 %3106  ;;  %v3175_v40 = vrot.slane %v6924_v36, 1 }
0x132a   :  { %v6915_v51 = vadd.f32 %v3107_v21, %v3077_v23 }
0x132c   :  { %v3173_v47 = vrot.slane %v6915_v51, 1 }
0x132e   :  { %v3196_v50 = vsel %vm88_vm0, %v3172_v60, %v3173_v47  ;;  %v3031_v27 = vpop.permute.xlu1 %3030 }
0x132f   :  { %v4763_v13 = vpack.i.bf16 %v3196_v50, %v3197_v45  ;;  %v3080_v56 = vmul.f32 %v3031_v27, %v6713_v1 }
0x1331   :  { %4764 = vrot.lane.b32.xlu0 %v4763_v13, %s5145_s10 }
0x1333   :  { %v3119_v24 = vpop.permute.xlu1 %3118 }
0x1334   :  { %v6936_v53 = vadd.f32 %v3119_v24, %v3080_v56 }
0x1336   :  { %v3176_v0 = vrot.slane %v6936_v53, 1 }
0x1338   :  { %v3021_v28 = vpop.permute.xlu1 %3020  ;;  %v3193_v62 = vsel %vm88_vm0, %v3175_v40, %v3176_v0 }
0x1339   :  { %v3078_v41 = vmul.f32 %v3021_v28, %v6724_v63 }
0x133b   :  { %v6927_v4 = vadd.f32 %v3111_v42, %v3078_v41 }
0x133d   :  { %v3174_v54 = vrot.slane %v6927_v4, 1  ;;  %v3131_v32 = vpop.permute.xlu1 %3130 }
0x133f   :  { %v3194_v61 = vsel %vm88_vm0, %v3174_v54, %v3175_v40  ;;  %v3195_v33 = vsel %vm88_vm0, %v3173_v47, %v3174_v54 }
0x1340   :  { %v4768_v30 = vpack.i.bf16 %v3194_v61, %v3195_v33 }
0x1342   :  { %v3036_v63 = vpop.permute.xlu1 %3035  ;;  %4769 = vrot.lane.b32.xlu1 %v4768_v30, %s5145_s10 }
0x1343   :  { %v3081_v58 = vmul.f32 %v3036_v63, %v6698_v7  ;;  %v3083_v7 = vmul.f32 %v3046_v16, %v6687_v8  ;;  %v3066_v8 = vpop.permute.xlu0 %3065 }
0x1344   :  { %v3087_v9 = vmul.f32 %v3066_v8, %v6667_v48 }
0x1345   :  { %v6941_v31 = vadd.f32 %v3123_v14, %v3081_v58  ;;  %v6950_v26 = vadd.f32 %v3131_v32, %v3083_v7 }
0x1346   :  { %v3051_v1 = vpop.permute.xlu1 %3050 }
0x1347   :  { %v3177_v55 = vrot.slane %v6941_v31, 1  ;;  %v3084_v38 = vmul.f32 %v3051_v1, %v6691_v57  ;;  %v3179_v52 = vrot.slane %v6950_v26, 1  ;;  %v3147_v24 = vpop.permute.xlu0 %3146 }
0x1348   :  { %v6976_v3 = vadd.f32 %v3147_v24, %v3087_v9 }
0x1349   :  { %v3192_v11 = vsel %vm88_vm0, %v3176_v0, %v3177_v55 }
0x134a   :  { %v4773_v43 = vpack.i.bf16 %v3192_v11, %v3193_v62  ;;  %v3183_v40 = vrot.slane %v6976_v3, 1 }
0x134b   :  { %v3135_v2 = vpop.permute.xlu1 %3134 }
0x134c   :  { %4774 = vrot.lane.b32.xlu0 %v4773_v43, %s5145_s10  ;;  %v6954_v25 = vadd.f32 %v3135_v2, %v3084_v38 }
0x134e   :  { %v3180_v23 = vrot.slane %v6954_v25, 1 }
0x1350   :  { %v3041_v37 = vpop.permute.xlu1 %3040 }
0x1351   :  { %v3082_v5 = vmul.f32 %v3041_v37, %v6702_v17 }
0x1353   :  { %v6956_v29 = vadd.f32 %v3127_v44, %v3082_v5 }
0x1354   :  { %v3056_v35 = vpop.permute.xlu1 %3055 }
0x1355   :  { %v3178_v18 = vrot.slane %v6956_v29, 1  ;;  %v3085_v59 = vmul.f32 %v3056_v35, %v6677_v15  ;;  %v3189_v15 = vsel %vm88_vm0, %v3179_v52, %v3180_v23 }
0x1357   :  { %v6962_v21 = vadd.f32 %v3139_v6, %v3085_v59  ;;  %v3190_v57 = vsel %vm88_vm0, %v3178_v18, %v3179_v52  ;;  %v3191_v17 = vsel %vm88_vm0, %v3177_v55, %v3178_v18 }
0x1358   :  { %v3071_v60 = vpop.permute.xlu1 %3070  ;;  %v4778_v47 = vpack.i.bf16 %v3190_v57, %v3191_v17 }
0x1359   :  { %v3181_v50 = vrot.slane %v6962_v21, 1  ;;  %v3088_v54 = vmul.f32 %v3071_v60, %v6670_v34 }
0x135a   :  { %4779 = vrot.lane.b32.xlu1 %v4778_v47, %s5145_s10 }
0x135b   :  { %v3188_v27 = vsel %vm88_vm0, %v3180_v23, %v3181_v50 }
0x135c   :  { %v3061_v45 = vpop.permute.xlu1 %3060  ;;  %v4783_v13 = vpack.i.bf16 %v3188_v27, %v3189_v15 }
0x135d   :  { %v3086_v28 = vmul.f32 %v3061_v45, %v6680_v46 }
0x135e   :  { %4784 = vrot.lane.b32.xlu0 %v4783_v13, %s5145_s10 }
0x1361   :  { %v3143_v41 = vpop.permute.xlu1 %3142 }
0x1362   :  { %v3166_v42 = vadd.f32 %v3143_v41, %v3086_v28 }
0x1364   :  { %v3182_v32 = vrot.slane %v3166_v42, 1 }
0x1365   :  { %v3151_v56 = vpop.permute.xlu1 %3150 }
0x1366   :  { %v3186_v61 = vsel %vm88_vm0, %v3182_v32, %v3183_v40  ;;  %v3187_v48 = vsel %vm88_vm0, %v3181_v50, %v3182_v32  ;;  %v3168_v33 = vadd.f32 %v3151_v56, %v3088_v54 }
0x1367   :  { %v4788_v16 = vpack.i.bf16 %v3186_v61, %v3187_v48 }
0x1368   :  { %v3184_v30 = vrot.slane %v3168_v33, 1 }
0x1369   :  { %4789 = vrot.lane.b32.xlu1 %v4788_v16, %s5145_s10 }
0x136a   :  { %v3185_v46 = vsel %vm88_vm0, %v3183_v40, %v3184_v30  ;;  %v3200_v34 = vsel %vm88_vm0, %v3184_v30, %v3169_v20 }
0x136b   :  { %v4793_v63 = vpack.i.bf16 %v3200_v34, %v3185_v46 }
0x136d   :  { %4794 = vrot.lane.b32.xlu0 %v4793_v63, %s5145_s10 }
0x1395   :  { %v4760_v58 = vpop.permute.xlu1 %4759 }
0x1396   :  { %v4762_v14 = vunpack.i.h.bf16 %v4760_v58  ;;  %v4761_v0 = vunpack.i.l.bf16 %v4760_v58 }
0x1398   :  { %v3265_v1 = vsel %vm507_vm4, %v6876_v49, %v4761_v0  ;;  %v3266_v55 = vsel %vm507_vm4, %v6891_v39, %v4762_v14 }
0x1399   :  { %v3298_v62 = vpack.c.bf16 %v3266_v55, %v3265_v1 }
0x139b   :  { %4379 = vmatprep.mubr.bf16.mxu0 %v3298_v62 }
0x13a3   :  { %v4765_v11 = vpop.permute.xlu0 %4764 }
0x13a4   :  { %v4767_v43 = vunpack.i.h.bf16 %v4765_v11  ;;  %v4766_v44 = vunpack.i.l.bf16 %v4765_v11 }
0x13a6   :  { %v3268_v10 = vsel %vm507_vm4, %v6910_v22, %v4767_v43  ;;  %v3267_v20 = vsel %vm507_vm4, %v6874_v19, %v4766_v44 }
0x13a7   :  { %v3299_v2 = vpack.c.bf16 %v3268_v10, %v3267_v20 }
0x13a9   :  { %4380 = vmatmul.mubr.bf16.vlgmr.msra.gmra.mxu0 %v3299_v2 }
0x13b4   :  { %v4770_v7 = vpop.permute.xlu1 %4769 }
0x13b5   :  { %v4772_v37 = vunpack.i.h.bf16 %v4770_v7  ;;  %v4771_v6 = vunpack.i.l.bf16 %v4770_v7 }
0x13b7   :  { %v3269_v49 = vsel %vm507_vm4, %v6915_v51, %v4771_v6  ;;  %v3270_v39 = vsel %vm507_vm4, %v6927_v4, %v4772_v37 }
0x13b8   :  { %v3300_v38 = vpack.c.bf16 %v3270_v39, %v3269_v49 }
0x13ba   :  { %4383 = vmatprep.mubr.bf16.mxu0 %v3300_v38 }
0x13be   :  { %v4775_v5 = vpop.permute.xlu0 %4774 }
0x13bf   :  { %v4777_v35 = vunpack.i.h.bf16 %v4775_v5  ;;  %v4776_v52 = vunpack.i.l.bf16 %v4775_v5 }
0x13c1   :  { %v3271_v22 = vsel %vm507_vm4, %v6924_v36, %v4776_v52  ;;  %v3272_v19 = vsel %vm507_vm4, %v6936_v53, %v4777_v35 }
0x13c2   :  { %v3301_v18 = vpack.c.bf16 %v3272_v19, %v3271_v22 }
0x13c4   :  { %4384 = vmatmul.mubr.bf16.gmra.mxu0 %v3301_v18 }
0x13cc   :  { %v4780_v59 = vpop.permute.xlu1 %4779 }
0x13cd   :  { %v4782_v8 = vunpack.i.h.bf16 %v4780_v59  ;;  %v4781_v23 = vunpack.i.l.bf16 %v4780_v59 }
0x13cf   :  { %v3273_v51 = vsel %vm507_vm4, %v6941_v31, %v4781_v23  ;;  %v3274_v4 = vsel %vm507_vm4, %v6956_v29, %v4782_v8 }
0x13d0   :  { %v4785_v57 = vpop.permute.xlu0 %4784  ;;  %v3302_v17 = vpack.c.bf16 %v3274_v4, %v3273_v51 }
0x13d1   :  { %v4787_v60 = vunpack.i.h.bf16 %v4785_v57  ;;  %v4786_v47 = vunpack.i.l.bf16 %v4785_v57 }
0x13d2   :  { %4387 = vmatprep.mubr.bf16.mxu0 %v3302_v17 }
0x13d3   :  { %v3275_v36 = vsel %vm507_vm4, %v6950_v26, %v4786_v47  ;;  %v3276_v53 = vsel %vm507_vm4, %v6954_v25, %v4787_v60 }
0x13d4   :  { %v3303_v50 = vpack.c.bf16 %v3276_v53, %v3275_v36 }
0x13d6   :  { %4388 = vmatmul.mubr.bf16.gmra.mxu0 %v3303_v50 }
0x13db   :  { %v4790_v15 = vpop.permute.xlu1 %4789 }
0x13dc   :  { %v4792_v27 = vunpack.i.h.bf16 %v4790_v15  ;;  %v4791_v45 = vunpack.i.l.bf16 %v4790_v15 }
0x13de   :  { %v3277_v31 = vsel %vm507_vm4, %v6962_v21, %v4791_v45  ;;  %v3278_v29 = vsel %vm507_vm4, %v3166_v42, %v4792_v27 }
0x13df   :  { %v4795_v13 = vpop.permute.xlu0 %4794  ;;  %v3304_v24 = vpack.c.bf16 %v3278_v29, %v3277_v31 }
0x13e0   :  { %v4797_v9 = vunpack.i.h.bf16 %v4795_v13  ;;  %v4796_v28 = vunpack.i.l.bf16 %v4795_v13 }
0x13e1   :  { %4391 = vmatprep.mubr.bf16.mxu0 %v3304_v24 }
0x13e2   :  { %v3279_v26 = vsel %vm507_vm4, %v6976_v3, %v4796_v28  ;;  %v3280_v25 = vsel %vm507_vm4, %v3168_v33, %v4797_v9  ;;  %v3901_v3 = vld [vmem:[%s7240_s2 + $0x28c] ss:$0 sm:$0xff] }
0x13e3   :  { %v3305_v41 = vpack.c.bf16 %v3280_v25, %v3279_v26 }
0x13e5   :  { %4392 = vmatmul.mubr.bf16.gmra.mxu0 %v3305_v41 }
0x13e6   :  { %4431 = vmatprep.mubr.msk.bf16.mxu0 %vm5148_vm7, %v5147_v12 }
0x1469   :  { %v4381_v40 = vpop.f32.mrf.mxu0 }
0x146a   :  { %v7061_v57 = vadd.f32 %v4381_v40, %v3901_v3 }
0x146b   :  { %v3352_v54 = vpop.f32.mrf.mxu0 }
0x146c   :  { %v3417_v50 = vsub.f32 0.0, %v7061_v57  ;;  %v7068_v15 = vadd.f32 %v3901_v3, %v3352_v54 }
0x146d   :  { %v4382_v21 = vpop.f32.mrf.mxu0 }
0x146e   :  { %v7070_v27 = vadd.f32 %v4382_v21, %v3901_v3  ;;  %v3435_v24 = vmul.f32 1.442695, %v3417_v50  ;;  %v3415_v9 = vsub.f32 0.0, %v7068_v15 }
0x146f   :  { %v7025_v32 = vpop.f32.mrf.mxu0 }
0x1470   :  { %v3418_v26 = vsub.f32 0.0, %v7070_v27  ;;  %v7076_v25 = vadd.f32 %v3901_v3, %v7025_v32 }
0x1484   :  { %v4385_v42 = vpop.f32.mrf.mxu0 }
0x1485   :  { %v7045_v2 = vadd.f32 %v4385_v42, %v3901_v3 }
0x1486   :  { %v3368_v56 = vpop.f32.mrf.mxu0 }
0x1487   :  { %v7054_v22 = vadd.f32 %v3901_v3, %v3368_v56  ;;  %v3421_v59 = vsub.f32 0.0, %v7045_v2  ;;  %v3431_v56 = vmul.f32 1.442695, %v3415_v9 }
0x1488   :  { %v4386_v61 = vpop.f32.mrf.mxu0 }
0x1489   :  { %v7058_v8 = vadd.f32 %v4386_v61, %v3901_v3  ;;  %v3419_v17 = vsub.f32 0.0, %v7054_v22  ;;  %v3443_v47 = vmul.f32 1.442695, %v3421_v59  ;;  %v3437_v61 = vmul.f32 1.442695, %v3418_v26 }
0x148a   :  { %v3371_v48 = vpop.f32.mrf.mxu0 }
0x148b   :  { %v7064_v60 = vadd.f32 %v3901_v3, %v3371_v48  ;;  %v3422_v36 = vsub.f32 0.0, %v7058_v8  ;;  %v3439_v45 = vmul.f32 1.442695, %v3419_v17  ;;  %v3416_v48 = vsub.f32 0.0, %v7076_v25 }
0x148d   :  { %v3420_v31 = vsub.f32 0.0, %v7064_v60  ;;  %v3445_v13 = vmul.f32 1.442695, %v3422_v36 }
0x148f   :  { %v3441_v41 = vmul.f32 1.442695, %v3420_v31 }
0x1496   :  { %v4389_v16 = vpop.f32.mrf.mxu0 }
0x1497   :  { %v7030_v34 = vadd.f32 %v4389_v16, %v3901_v3 }
0x1498   :  { %v3384_v30 = vpop.f32.mrf.mxu0 }
0x1499   :  { %v7034_v14 = vadd.f32 %v3901_v3, %v3384_v30  ;;  %v3425_v1 = vsub.f32 0.0, %v7030_v34 }
0x149a   :  { %v4390_v46 = vpop.f32.mrf.mxu0 }
0x149b   :  { %v7040_v11 = vadd.f32 %v4390_v46, %v3901_v3  ;;  %v3423_v7 = vsub.f32 0.0, %v7034_v14  ;;  %v3451_v6 = vmul.f32 1.442695, %v3425_v1 }
0x149c   :  { %v3387_v33 = vpop.f32.mrf.mxu0 }
0x149d   :  { %v3426_v38 = vsub.f32 0.0, %v7040_v11  ;;  %v7050_v5 = vadd.f32 %v3901_v3, %v3387_v33  ;;  %v3447_v19 = vmul.f32 1.442695, %v3423_v7 }
0x149f   :  { %v3453_v23 = vmul.f32 1.442695, %v3426_v38  ;;  %v3424_v51 = vsub.f32 0.0, %v7050_v5 }
0x14a1   :  { %v3449_v53 = vmul.f32 1.442695, %v3424_v51 }
0x14a5   :  { %v4393_v63 = vpop.f32.mrf.mxu0 }
0x14a6   :  { %v7032_v58 = vadd.f32 %v4393_v63, %v3901_v3  ;;  %v3433_v63 = vmul.f32 1.442695, %v3416_v48  ;;  %v3660_v48 = vld [vmem:[%s7240_s2 + $0x228] sm:$0xff] }
0x14a7   :  { %v3400_v0 = vpop.f32.mrf.mxu0 }
0x14a8   :  { %v3429_v55 = vsub.f32 0.0, %v7032_v58  ;;  %v7038_v62 = vadd.f32 %v3901_v3, %v3400_v0 }
0x14a9   :  { %v4394_v43 = vpop.f32.mrf.mxu0 }
0x14aa   :  { %v3459_v44 = vmul.f32 1.442695, %v3429_v55  ;;  %v3427_v10 = vsub.f32 0.0, %v7038_v62  ;;  %v7043_v20 = vadd.f32 %v4394_v43, %v3901_v3 }
0x14ab   :  { %v3403_v37 = vpop.f32.mrf.mxu0 }
0x14ac   :  { %5058 = vpow2.f32 %v3459_v44  ;;  %v3455_v49 = vmul.f32 1.442695, %v3427_v10  ;;  %v3430_v39 = vsub.f32 0.0, %v7043_v20  ;;  %v7052_v35 = vadd.f32 %v3901_v3, %v3403_v37 }
0x14ae   :  { %v3461_v52 = vmul.f32 1.442695, %v3430_v39  ;;  %5060 = vpow2.f32 %v3455_v49  ;;  %v3428_v18 = vsub.f32 0.0, %v7052_v35 }
0x14af   :  { %5062 = vpow2.f32 %v3451_v6 }
0x14b0   :  { %5064 = vpow2.f32 %v3461_v52  ;;  %v3457_v4 = vmul.f32 1.442695, %v3428_v18 }
0x14b1   :  { %5066 = vpow2.f32 %v3447_v19 }
0x14b2   :  { %5068 = vpow2.f32 %v3457_v4 }
0x14b3   :  { %5070 = vpow2.f32 %v3453_v23 }
0x14b4   :  { %5072 = vpow2.f32 %v3443_v47 }
0x14b5   :  { %5074 = vpow2.f32 %v3449_v53 }
0x14b6   :  { %5076 = vpow2.f32 %v3439_v45 }
0x14b9   :  { %v5059_v29 = vpop.eup %5058 }
0x14ba   :  { %v3477_v28 = vadd.f32 1.0, %v5059_v29 }
0x14bb   :  { %v5061_v40 = vpop.eup %5060 }
0x14bc   :  { %5078 = vrcp.f32 %v3477_v28  ;;  %v5063_v54 = vpop.eup %5062  ;;  %v3475_v21 = vadd.f32 1.0, %v5061_v40 }
0x14bd   :  { %5080 = vpow2.f32 %v3445_v13  ;;  %v5065_v42 = vpop.eup %5064  ;;  %v3473_v46 = vadd.f32 1.0, %v5063_v54 }
0x14be   :  { %5082 = vpow2.f32 %v3435_v24  ;;  %v3478_v16 = vadd.f32 1.0, %v5065_v42  ;;  %v5067_v30 = vpop.eup %5066  ;;  %v3662_v42 = vld [vmem:[%s7240_s2 + $0x238] sm:$0xff] }
0x14bf   :  { %5084 = vpow2.f32 %v3441_v41  ;;  %v5069_v32 = vpop.eup %5068  ;;  %v3471_v0 = vadd.f32 1.0, %v5067_v30 }
0x14c0   :  { %5086 = vrcp.f32 %v3475_v21  ;;  %v5071_v3 = vpop.eup %5070  ;;  %v3476_v33 = vadd.f32 1.0, %v5069_v32 }
0x14c1   :  { %5088 = vrcp.f32 %v3478_v16  ;;  %v5073_v1 = vpop.eup %5072  ;;  %v3474_v55 = vadd.f32 1.0, %v5071_v3  ;;  %v3661_v16 = vld [vmem:[%s7240_s2 + $0x230] sm:$0xff] }
0x14c2   :  { %5090 = vpow2.f32 %v3431_v56  ;;  %v5075_v43 = vpop.eup %5074  ;;  %v3469_v10 = vadd.f32 1.0, %v5073_v1  ;;  %v3663_v56 = vld [vmem:[%s7240_s2 + $0x240] sm:$0xff]  ;;  %v3667_v30 = vpack.c.bf16 %v3661_v16, %v3660_v48  ;;  %v3658_v16 = vld [vmem:[%s7240_s2 + $0x218] sm:$0xff] }
0x14c3   :  { %5092 = vpow2.f32 %v3437_v61  ;;  %v5077_v44 = vpop.eup %5076  ;;  %v3472_v37 = vadd.f32 1.0, %v5075_v43  ;;  %v3668_v61 = vpack.c.bf16 %v3663_v56, %v3662_v42  ;;  %v3643_v56 = vld [vmem:[%s7240_s2 + $0x1c8] sm:$0xff] }
0x14c4   :  { %5094 = vrcp.f32 %v3473_v46  ;;  %v3467_v38 = vadd.f32 1.0, %v5077_v44 }
0x14c5   :  { %5096 = vrcp.f32 %v3476_v33  ;;  %4424 = vmatpush3.bf16.msra.mxu0 %v3668_v61  ;;  %v3644_v61 = vld [vmem:[%s7240_s2 + $0x1d0] sm:$0xff] }
0x14c6   :  { %5098 = vpow2.f32 %v3433_v63  ;;  %4425 = vmatprep.subr.bf16.mxu0 %v5147_v12  ;;  %v3652_v48 = vpack.c.bf16 %v3644_v61, %v3643_v56 }
0x14c7   :  { %5100 = vrcp.f32 %v3471_v0 }
0x14c8   :  { %5102 = vrcp.f32 %v3474_v55 }
0x14c9   :  { %v5079_v7 = vpop.eup %5078  ;;  %5104 = vrcp.f32 %v3469_v10  ;;  %4426 = vmatpush3.bf16.msra.mxu0 %v3667_v30  ;;  %v3659_v30 = vld [vmem:[%s7240_s2 + $0x220] sm:$0xff] }
0x14ca   :  { %v5081_v6 = vpop.eup %5080  ;;  %3539 = vrot.lane.b32.xlu1 %v5079_v7, %s5145_s10  ;;  %5106 = vrcp.f32 %v3472_v37  ;;  %4427 = vmatprep.subr.bf16.mxu0 %v5147_v12 }
0x14cb   :  { %v5083_v49 = vpop.eup %5082  ;;  %v3470_v19 = vadd.f32 1.0, %v5081_v6  ;;  %5108 = vrcp.f32 %v3467_v38 }
0x14cc   :  { %v5085_v39 = vpop.eup %5084  ;;  %v3465_v51 = vadd.f32 1.0, %v5083_v49 }
0x14cd   :  { %v5087_v52 = vpop.eup %5086  ;;  %5110 = vrcp.f32 %v3470_v19  ;;  %v3468_v17 = vadd.f32 1.0, %v5085_v39 }
0x14ce   :  { %v5089_v18 = vpop.eup %5088  ;;  %3535 = vrot.lane.b32.xlu1 %v5087_v52, %s5145_s10  ;;  %5112 = vrcp.f32 %v3465_v51 }
0x14cf   :  { %v5091_v59 = vpop.eup %5090  ;;  %3541 = vrot.lane.b32.xlu0 %v5089_v18, %s5145_s10  ;;  %5114 = vrcp.f32 %v3468_v17 }
0x14d0   :  { %v5093_v23 = vpop.eup %5092  ;;  %v3463_v53 = vadd.f32 1.0, %v5091_v59 }
0x14d1   :  { %v5095_v4 = vpop.eup %5094  ;;  %v3466_v45 = vadd.f32 1.0, %v5093_v23 }
0x14d2   :  { %v5097_v47 = vpop.eup %5096  ;;  %3531 = vrot.lane.b32.xlu1 %v5095_v4, %s5145_s10  ;;  %5116 = vrcp.f32 %v3463_v53 }
0x14d3   :  { %3537 = vrot.lane.b32.xlu0 %v5097_v47, %s5145_s10  ;;  %v5099_v36 = vpop.eup %5098  ;;  %5118 = vrcp.f32 %v3466_v45 }
0x14d4   :  { %v5101_v50 = vpop.eup %5100  ;;  %v3464_v13 = vadd.f32 1.0, %v5099_v36 }
0x14d5   :  { %v5103_v31 = vpop.eup %5102 }
0x14d6   :  { %3527 = vrot.lane.b32.xlu1 %v5101_v50, %s5145_s10  ;;  %v5105_v29 = vpop.eup %5104  ;;  %5120 = vrcp.f32 %v3464_v13  ;;  %v34_v13 = vld [vmem:[%s7239_s1 + $0x90] sm:$0xff] }
0x14d7   :  { %3533 = vrot.lane.b32.xlu0 %v5103_v31, %s5145_s10  ;;  %v5107_v24 = vpop.eup %5106  ;;  %v3647_v31 = vld [vmem:[%s7240_s2 + $0x1e8] sm:$0xff] }
0x14d8   :  { %v5109_v9 = vpop.eup %5108 }
0x14da   :  { %3523 = vrot.lane.b32.xlu1 %v5105_v29, %s5145_s10  ;;  %v5111_v28 = vpop.eup %5110  ;;  %v3648_v29 = vld [vmem:[%s7240_s2 + $0x1f0] sm:$0xff] }
0x14db   :  { %3529 = vrot.lane.b32.xlu0 %v5107_v24, %s5145_s10  ;;  %v5113_v26 = vpop.eup %5112  ;;  %v35_v24 = vld [vmem:[%s7239_s1 + $0x98] sm:$0xff] }
0x14dc   :  { %v5115_v41 = vpop.eup %5114 }
0x14de   :  { %3519 = vrot.lane.b32.xlu1 %v5109_v9, %s5145_s10  ;;  %v3654_v9 = vpack.c.bf16 %v3648_v29, %v3647_v31 }
0x14df   :  { %3525 = vrot.lane.b32.xlu0 %v5111_v28, %s5145_s10  ;;  %v5117_v40 = vpop.eup %5116  ;;  %v3576_v28 = vpack.c.bf16 %v35_v24, %v34_v13 }
0x14e0   :  { %v5119_v54 = vpop.eup %5118 }
0x14e2   :  { %3515 = vrot.lane.b32.xlu1 %v5113_v26, %s5145_s10  ;;  %v36_v26 = vld [vmem:[%s7239_s1 + $0xa0] sm:$0xff] }
0x14e3   :  { %3521 = vrot.lane.b32.xlu0 %v5115_v41, %s5145_s10  ;;  %v5121_v21 = vpop.eup %5120  ;;  %v37_v41 = vld [vmem:[%s7239_s1 + $0xa8] sm:$0xff] }
0x14e6   :  { %3511 = vrot.lane.b32.xlu1 %v5117_v40, %s5145_s10  ;;  %v3577_v40 = vpack.c.bf16 %v37_v41, %v36_v26 }
0x14e7   :  { %3517 = vrot.lane.b32.xlu0 %v5119_v54, %s5145_s10  ;;  %v3645_v54 = vld [vmem:[%s7240_s2 + $0x1d8] sm:$0xff] }
0x14eb   :  { %3513 = vrot.lane.b32.xlu0 %v5121_v21, %s5145_s10  ;;  %v3646_v21 = vld [vmem:[%s7240_s2 + $0x1e0] sm:$0xff] }
0x14ec   :  { %v3653_v42 = vpack.c.bf16 %v3646_v21, %v3645_v54 }
0x153c   :  { %v3540_v46 = vpop.permute.xlu1 %3539 }
0x153d   :  { %v3573_v33 = vmul.f32 %v3540_v46, %v7032_v58  ;;  %v3666_v46 = vpack.c.bf16 %v3659_v30, %v3658_v16 }
0x153f   :  { %4428 = vmatpush3.bf16.msra.mxu0 %v3666_v46 }
0x1540   :  { %v3536_v32 = vpop.permute.xlu1 %3535  ;;  %4429 = vmatprep.subr.bf16.mxu0 %v5147_v12 }
0x1541   :  { %v3542_v3 = vpop.permute.xlu0 %3541  ;;  %v3571_v43 = vmul.f32 %v3536_v32, %v7038_v62  ;;  %v3656_v32 = vld [vmem:[%s7240_s2 + $0x208] sm:$0xff] }
0x1542   :  { %v3574_v63 = vmul.f32 %v3542_v3, %v7043_v20  ;;  %v3657_v3 = vld [vmem:[%s7240_s2 + $0x210] sm:$0xff] }
0x1544   :  { %v3585_v0 = vpack.c.bf16 %v3574_v63, %v3573_v33  ;;  %v3532_v1 = vpop.permute.xlu1 %3531  ;;  %v3665_v33 = vpack.c.bf16 %v3657_v3, %v3656_v32 }
0x1545   :  { %v3538_v55 = vpop.permute.xlu0 %3537  ;;  %v3569_v6 = vmul.f32 %v3532_v1, %v7030_v34 }
0x1546   :  { %v3572_v44 = vmul.f32 %v3538_v55, %v7052_v35  ;;  %4396 = vmatpush3.bf16.msra.mxu1 %v3585_v0  ;;  %4430 = vmatpush3.bf16.msra.mxu0 %v3665_v33 }
0x1547   :  { %4397 = vmatprep.subr.bf16.mxu1 %v5147_v12  ;;  %4447 = vmatprep.subr.bf16.mxu0 %v5147_v12 }
0x1548   :  { %v3584_v10 = vpack.c.bf16 %v3572_v44, %v3571_v43  ;;  %v3528_v7 = vpop.permute.xlu1 %3527 }
0x1549   :  { %v3534_v37 = vpop.permute.xlu0 %3533  ;;  %v3567_v62 = vmul.f32 %v3528_v7, %v7034_v14  ;;  %v3764_v7 = vld [vmem:[%s7240_s2 + $0x280] sm:$0xff] }
0x154a   :  { %v3570_v49 = vmul.f32 %v3534_v37, %v7040_v11  ;;  %4398 = vmatpush3.bf16.msra.mxu1 %v3584_v10  ;;  %v3763_v10 = vld [vmem:[%s7240_s2 + $0x278] sm:$0xff] }
0x154b   :  { %4399 = vmatprep.subr.bf16.mxu1 %v5147_v12 }
0x154c   :  { %v3583_v58 = vpack.c.bf16 %v3570_v49, %v3569_v6  ;;  %v3524_v20 = vpop.permute.xlu1 %3523  ;;  %v3769_v49 = vpack.c.bf16 %v3764_v7, %v3763_v10 }
0x154d   :  { %v3530_v39 = vpop.permute.xlu0 %3529  ;;  %v3565_v34 = vmul.f32 %v3524_v20, %v7045_v2  ;;  %v3761_v20 = vld [vmem:[%s7240_s2 + $0x268] sm:$0xff] }
0x154e   :  { %v3568_v35 = vmul.f32 %v3530_v39, %v7050_v5  ;;  %4400 = vmatpush3.bf16.msra.mxu1 %v3583_v58  ;;  %v3762_v39 = vld [vmem:[%s7240_s2 + $0x270] sm:$0xff] }
0x154f   :  { %4401 = vmatprep.subr.bf16.mxu1 %v5147_v12 }
0x1550   :  { %v3582_v38 = vpack.c.bf16 %v3568_v35, %v3567_v62  ;;  %v3520_v52 = vpop.permute.xlu1 %3519  ;;  %v3768_v35 = vpack.c.bf16 %v3762_v39, %v3761_v20 }
0x1551   :  { %v3526_v19 = vpop.permute.xlu0 %3525  ;;  %v3563_v14 = vmul.f32 %v3520_v52, %v7054_v22  ;;  %v3759_v52 = vld [vmem:[%s7240_s2 + $0x258] sm:$0xff] }
0x1552   :  { %v3566_v11 = vmul.f32 %v3526_v19, %v7058_v8  ;;  %4402 = vmatpush3.bf16.msra.mxu1 %v3582_v38  ;;  %v3760_v19 = vld [vmem:[%s7240_s2 + $0x260] sm:$0xff] }
0x1553   :  { %4403 = vmatprep.subr.bf16.mxu1 %v5147_v12 }
0x1554   :  { %v3581_v18 = vpack.c.bf16 %v3566_v11, %v3565_v34  ;;  %v3516_v23 = vpop.permute.xlu1 %3515  ;;  %v3767_v11 = vpack.c.bf16 %v3760_v19, %v3759_v52 }
0x1555   :  { %v3522_v59 = vpop.permute.xlu0 %3521  ;;  %v3561_v17 = vmul.f32 %v3516_v23, %v7061_v57  ;;  %v33_v57 = vld [vmem:[%s7239_s1 + $0x88] sm:$0xff]  ;;  %v3758_v23 = vld [vmem:[%s7240_s2 + $0x250] sm:$0xff] }
0x1556   :  { %v3564_v5 = vmul.f32 %v3522_v59, %v7064_v60  ;;  %4404 = vmatpush3.bf16.msra.mxu1 %v3581_v18  ;;  %v32_v60 = vld [vmem:[%s7239_s1 + $0x80] sm:$0xff]  ;;  %v3757_v59 = vld [vmem:[%s7240_s2 + $0x248] sm:$0xff]  ;;  %s3830_s1 = sshll.u32 %s5151_s29, 4  ;;  %s3831_s1 = int_to_ptr.vmem [resolvable:$true] %s3830_s1 }
0x1557   :  { %4405 = vmatprep.subr.bf16.mxu1 %v5147_v12  ;;  %v3575_v50 = vpack.c.bf16 %v33_v57, %v32_v60  ;;  %s5122_s30 = scalar_lea.vmem %s3831_s1, 256  ;;  %p5127_p1 = scmp.lt.s32.totalorder %s3831_s1, %s3831_s1 }
0x1558   :  { %v3580_v51 = vpack.c.bf16 %v3564_v5, %v3563_v14  ;;  %v3512_v8 = vpop.permute.xlu1 %3511  ;;  %v3766_v5 = vpack.c.bf16 %v3758_v23, %v3757_v59  ;;  %p5123_p0 = scmp.ne.s32.totalorder %s3831_s1, %s5122_s30  ;;  %p5128_p2 = scmp.lt.s32.totalorder %s5122_s30, %s5122_s30 }
0x1559   :  { %v3518_v4 = vpop.permute.xlu0 %3517  ;;  %v3559_v53 = vmul.f32 %v3512_v8, %v7068_v15  ;;  %v3650_v15 = vld [vmem:[%s7240_s2 + $0x200] sm:$0xff] }
0x155a   :  { %v3562_v2 = vmul.f32 %v3518_v4, %v7070_v27  ;;  %4406 = vmatpush3.bf16.msra.mxu1 %v3580_v51  ;;  %v3649_v27 = vld [vmem:[%s7240_s2 + $0x1f8] sm:$0xff]  ;;  %p5129_p3 = por %p5128_p2, %p5127_p1 }
0x155b   :  { %4407 = vmatprep.subr.bf16.mxu1 %v5147_v12  ;;  %v3655_v45 = vpack.c.bf16 %v3650_v15, %v3649_v27  ;;  %v3905_v27 = vld [vmem:[%s7240_s2 + $0x28d] ss:$0 sm:$0xff] }
0x155c   :  { %v3579_v47 = vpack.c.bf16 %v3562_v2, %v3561_v17  ;;  %p5130_p4 = pnand %p5129_p3, %p5123_p0 }
0x155d   :  { %v3514_v36 = vpop.permute.xlu0 %3513 }
0x155e   :  { %v3560_v22 = vmul.f32 %v3514_v36, %v7076_v25  ;;  %4408 = vmatpush3.bf16.msra.mxu1 %v3579_v47 }
0x155f   :  { %4409 = vmatprep.subr.bf16.mxu1 %v5147_v12 }
0x1560   :  { %v3578_v25 = vpack.c.bf16 %v3560_v22, %v3559_v53 }
0x1562   :  { %4410 = vmatpush3.bf16.msra.mxu1 %v3578_v25 }
0x1563   :  { %4435 = vmatprep.subr.bf16.mxu1 %v5147_v12 }
0x1565   :  { %4412 = vmatmul.mubr.bf16.vlgmr.msra.gmra.mxu1 %v3575_v50 }
0x1566   :  { %4415 = vmatprep.mubr.msk.bf16.mxu1 %vm5148_vm7, %v5147_v12  ;;  %4436 = vmatpush3.bf16.msra.mxu1 %v3655_v45 }
0x1567   :  { %4437 = vmatprep.subr.bf16.mxu1 %v5147_v12 }
0x156a   :  { %4438 = vmatpush3.bf16.msra.mxu1 %v3654_v9 }
0x156b   :  { %4439 = vmatprep.subr.bf16.mxu1 %v5147_v12 }
0x156d   :  { %4416 = vmatmul.mubr.bf16.gmra.mxu1 %v3576_v28 }
0x156e   :  { %4419 = vmatprep.mubr.msk.bf16.mxu1 %vm5148_vm7, %v5147_v12  ;;  %4440 = vmatpush3.bf16.msra.mxu1 %v3653_v42 }
0x156f   :  { %4441 = vmatprep.subr.bf16.mxu1 %v5147_v12 }
0x1572   :  { %4442 = vmatpush3.bf16.msra.mxu1 %v3652_v48 }
0x1575   :  { %4420 = vmatmul.mubr.bf16.gmra.mxu1 %v3577_v40 }
0x1576   :  { %4443 = vmatprep.mubr.msk.bf16.mxu1 %vm5148_vm7, %v5147_v12 }
0x1625   :  { %v3620_v63 = vpop.f32.mrf.mxu1 }
0x1627   :  { %v4413_v0 = vpop.f32.mrf.mxu1 }
0x1629   :  { %v3623_v1 = vpop.f32.mrf.mxu1 }
0x162a   :  { %v3651_v55 = vpack.c.bf16 %v3623_v1, %v3620_v63 }
0x162b   :  { %v4414_v43 = vpop.f32.mrf.mxu1 }
0x162c   :  { %4444 = vmatmul.mubr.msk.bf16.vlgmr.msra.gmra.mxu1 %vm507_vm4, %v3651_v55 }
0x162d   :  { %v3628_v44 = vpop.f32.mrf.mxu1 }
0x162f   :  { %v4417_v37 = vpop.f32.mrf.mxu1 }
0x1631   :  { %v3631_v6 = vpop.f32.mrf.mxu1 }
0x1632   :  { %v3664_v58 = vpack.c.bf16 %v3631_v6, %v3628_v44 }
0x1633   :  { %v4418_v62 = vpop.f32.mrf.mxu1 }
0x1634   :  { %4432 = vmatmul.mubr.msk.bf16.vlgmr.msra.gmra.mxu0 %vm507_vm4, %v3664_v58 }
0x1635   :  { %4448 = vmatpush3.bf16.msra.mxu0 %v3769_v49  ;;  %v3636_v38 = vpop.f32.mrf.mxu1  ;;  %4455 = vmatprep.mubr.msk.bf16.mxu0 %vm5148_vm7, %v5147_v12 }
0x1636   :  { %4449 = vmatprep.subr.bf16.mxu0 %v5147_v12 }
0x1637   :  { %v4421_v34 = vpop.f32.mrf.mxu1 }
0x1639   :  { %4450 = vmatpush3.bf16.msra.mxu0 %v3768_v35  ;;  %v3639_v18 = vpop.f32.mrf.mxu1 }
0x163a   :  { %4451 = vmatprep.subr.bf16.mxu0 %v5147_v12  ;;  %v3765_v51 = vpack.c.bf16 %v3639_v18, %v3636_v38 }
0x163b   :  { %v4422_v14 = vpop.f32.mrf.mxu1 }
0x163d   :  { %4452 = vmatpush3.bf16.msra.mxu0 %v3767_v11 }
0x163e   :  { %4453 = vmatprep.subr.bf16.mxu0 %v5147_v12 }
0x1641   :  { %4454 = vmatpush3.bf16.msra.mxu0 %v3766_v5 }
0x1644   :  { %4456 = vmatmul.mubr.msk.bf16.vlgmr.msra.gmra.mxu0 %vm507_vm4, %v3765_v51 }
0x16ec   :  { %v3750_v4 = vpop.f32.mrf.mxu1 }
0x16ee   :  { %v4445_v17 = vpop.f32.mrf.mxu1 }
0x16f0   :  { %v3753_v2 = vpop.f32.mrf.mxu1 }
0x16f2   :  { %v4446_v8 = vpop.f32.mrf.mxu1 }
0x16f4   :  { %v3706_v47 = vpop.f32.mrf.mxu0 }
0x16f5   :  { %v3751_v60 = vadd.f32 %v3750_v4, %v3706_v47 }
0x16f6   :  { %v4433_v36 = vpop.f32.mrf.mxu0 }
0x16f8   :  { %v3709_v53 = vpop.f32.mrf.mxu0 }
0x16f9   :  { %v3754_v25 = vadd.f32 %v3753_v2, %v3709_v53 }
0x16fa   :  { %v4434_v22 = vpop.f32.mrf.mxu0 }
0x1704   :  { %v3807_v57 = vpop.f32.mrf.mxu0 }
0x1705   :  { %v3814_v15 = vadd.f32 %v3807_v57, %v3751_v60 }
0x1706   :  { %v4457_v12 = vpop.f32.mrf.mxu0 }
0x1707   :  { %v3821_v50 = vadd.f32 %v3905_v27, %v3814_v15 }
0x1708   :  { %v3810_v45 = vpop.f32.mrf.mxu0 }
0x1709   :  { %3823 = vst.msk [vmem:[#allocation2] sm:$0xff] %vm201_vm3, %v3821_v50  ;;  %v3815_v31 = vadd.f32 %v3810_v45, %v3754_v25 }
0x170a   :  { %v4458_v29 = vpop.f32.mrf.mxu0 }
0x170b   :  { %v3822_v13 = vadd.f32 %v3905_v27, %v3815_v31 }
0x170d   :  { %3824 = vst.msk [vmem:[#allocation2 + $0x8] sm:$0xff] %vm201_vm3, %v3822_v13 }
0x170e   :  { %5133 = shalt.err (!%p5130_p4)
}
0x170f   :  { %s5152_s2 = smov 128   ;;  %s5153_s4 = smov 8  }
0x1710   :  { %3836 = dma.vmem_to_hbm [thread:$0]  %s3831_s1, 256, %s7241_s3, [#allocation3], %s5152_s2, %s5152_s2, %s5153_s4  }
0x1711   :  { %5142 = dma.done.wait [#allocation3], 256  }
0x1712   :  { %5143 = vsyncadd [#allocation3], 4294967040 }
0x1713   :  { %3840 = vsyncpa [#allocation3], 1 }

</bundles_post_ra>
